<compile_context>
chip_gen: v6e
topology: v6e:2x2x1
jax: 0.10.0
libtpu: 0.0.40
codegen_flags: <defaults>
</compile_context>

<pallas_src>
import math

import jax
import jax.numpy as jnp
from jax.experimental import pallas as pl
from jax.experimental.pallas import tpu as pltpu

NUM_LAYERS = 3          # nn.TransformerEncoder(num_layers=3)
DIM_FF = 2048           # nn.TransformerEncoderLayer default dim_feedforward
LN_EPS = 1e-5           # nn.LayerNorm default eps
FF_CHUNK = 512          # feed-forward chunking along dim_feedforward


def _layer_norm(x, gamma, beta):
    mu = jnp.mean(x, axis=-1, keepdims=True)
    xc = x - mu
    var = jnp.mean(xc * xc, axis=-1, keepdims=True)
    return xc * jax.lax.rsqrt(var + LN_EPS) * gamma + beta


def _roll_rows(x, shift):
    """Static circular roll along axis 0 (jnp.roll semantics) via aligned slices+concat.

    shift is always a multiple of W (= 8 here), i.e. sublane-group aligned, so this
    lowers to cheap sublane moves on the XLU path.
    """
    n = x.shape[0]
    shift = shift % n
    if shift == 0:
        return x
    return jnp.concatenate([x[n - shift:, :], x[:n - shift, :]], axis=0)


def _tree_sum(xs):
    """Balanced-tree sum of a list of arrays (breaks serial accumulation chains)."""
    xs = list(xs)
    while len(xs) > 1:
        nxt = [xs[i] + xs[i + 1] for i in range(0, len(xs) - 1, 2)]
        if len(xs) % 2:
            nxt.append(xs[-1])
        xs = nxt
    return xs[0]


def fused_kernel(x_ref, embpe_ref, ew_ref,
                 qkvw_ref, qkvb_ref, ow_ref, ob_ref,
                 l1w_ref, l1b_ref, l2w_ref, l2b_ref,
                 n1w_ref, n1b_ref, n2w_ref, n2b_ref,
                 w1cat_ref, mask_ref, fold_ref, b1_ref, w2_ref, b2_ref,
                 out_ref):
    BW = x_ref.shape[0]
    B = out_ref.shape[0]
    W = BW // B
    E = ew_ref.shape[1]
    L = qkvw_ref.shape[0]
    FF = l1w_ref.shape[2]
    Hh = fold_ref.shape[1]
    CH = min(FF_CHUNK, FF)
    n_chunks = FF // CH
    scale = 1.0 / math.sqrt(E)          # single head -> head_dim == E
    bf16, f32 = jnp.bfloat16, jnp.float32

    # fc_embedding + (bias + positional encoding); rows are (b, w), b-major.
    h = jnp.dot(x_ref[...].astype(bf16), ew_ref[...],
                preferred_element_type=f32) + embpe_ref[...]

    for l in range(L):
        # ----- fused Q/K/V projection: one MXU push, then static lane slices -----
        hb = h.astype(bf16)
        qkv = jnp.dot(hb, qkvw_ref[l], preferred_element_type=f32) + qkvb_ref[l]
        q = qkv[:, :E] * scale          # scale folded in once, before the d-loop
        k = qkv[:, E:2 * E]
        v = qkv[:, 2 * E:3 * E]

        # Single-head attention across the original batch axis (PyTorch's seq dim 0),
        # batched over w.  Rolling rows by d*W pairs row (b, w) with ((b-d)%B, w);
        # softmax over d == softmax over the batch partners.  Pure VPU/XLU work.
        scores, vals = [], []
        for d in range(B):
            kd = _roll_rows(k, d * W)
            vd = _roll_rows(v, d * W)
            scores.append(jnp.sum(q * kd, axis=-1, keepdims=True))
            vals.append(vd)
        m = scores[0]
        for d in range(1, B):
            m = jnp.maximum(m, scores[d])
        exps = [jnp.exp(s - m) for s in scores]
        denom = _tree_sum(exps)
        inv = pl.reciprocal(denom, approx=True)
        attn = _tree_sum([exps[d] * vals[d] for d in range(B)]) * inv

        a = jnp.dot(attn.astype(bf16), ow_ref[l],
                    preferred_element_type=f32) + ob_ref[l]
        h = _layer_norm(h + a, n1w_ref[l], n1b_ref[l])

        # ----- feed-forward (relu), post-norm, CHUNKED over DIM_FF -----
        # Never materializes the full (BW, DIM_FF) f32 activation; each chunk keeps
        # ~12 live vregs and every MXU push stays >= 256 lanes wide.
        hb = h.astype(bf16)
        parts = []
        for c in range(n_chunks):
            c0 = c * CH
            f_c = jnp.dot(hb, l1w_ref[l, :, c0:c0 + CH],
                          preferred_element_type=f32) + l1b_ref[l, :, c0:c0 + CH]
            f_c = jnp.maximum(f_c, 0.0).astype(bf16)
            parts.append(jnp.dot(f_c, l2w_ref[l, c0:c0 + CH, :],
                                 preferred_element_type=f32))
        ff = _tree_sum(parts) + l2b_ref[l]
        h = _layer_norm(h + ff, n2w_ref[l], n2b_ref[l])

    # ----- fused head: out2 = out1.view(B, -1); Linear -> ReLU -> (Dropout=id) -> Linear
    # b-major rows: out[b, j] = sum_w h[b*W+w, :] @ w1[w, :, j].
    # Realized without a VMEM scratch or a serial 8-matmul chain:
    #   big[r, w*Hh+j] = h[r] @ w1[w][:, j]            (one wide MXU push)
    #   mask keeps only the w == (r mod W) blocks       (cheap VPU multiply)
    #   fold collapses the Hh-wide lane blocks          (one MXU push, 0/1 matrix)
    #   per-batch sublane reduction collapses the W rows of each batch (XLU).
    hb = h.astype(bf16)
    big = jnp.dot(hb, w1cat_ref[...], preferred_element_type=f32)       # (BW, W*Hh)
    folded = jnp.dot((big * mask_ref[...]).astype(bf16), fold_ref[...],
                     preferred_element_type=f32)                        # (BW, Hh)
    rows = [jnp.sum(folded[b * W:(b + 1) * W, :], axis=0, keepdims=True)
            for b in range(B)]
    acc = jnp.concatenate(rows, axis=0)                                  # (B, Hh)
    z = jnp.maximum(acc + b1_ref[...], 0.0)
    out_ref[...] = jnp.dot(z.astype(bf16), w2_ref[...],
                           preferred_element_type=f32) + b2_ref[...]


def init_params(key, input_size, embedding, window_size, hidden, output_size):
    ks = jax.random.split(key, 12)
    std = 0.05
    bf16, f32 = jnp.bfloat16, jnp.float32

    def nrm(k, shape, dtype):
        return (std * jax.random.normal(k, shape)).astype(dtype)

    L, E, W, Hh = NUM_LAYERS, embedding, window_size, hidden

    qw = nrm(ks[1], (L, E, E), bf16)
    kw = nrm(ks[2], (L, E, E), bf16)
    vw = nrm(ks[3], (L, E, E), bf16)
    qb = nrm(ks[4], (L, 1, E), f32)
    kb = nrm(ks[5], (L, 1, E), f32)
    vb = nrm(ks[6], (L, 1, E), f32)
    w1 = nrm(ks[10], (W, E, Hh), bf16)   # Linear(E*W, hidden) weight, per-window-slab

    p = {
        "ew": nrm(ks[0], (input_size, E), bf16),
        "eb": jnp.zeros((1, E), f32),
        # fused in_proj: columns [Q | K | V]
        "qkvw": jnp.concatenate([qw, kw, vw], axis=-1),     # (L, E, 3E) bf16
        "qkvb": jnp.concatenate([qb, kb, vb], axis=-1),     # (L, 1, 3E) f32
        "ow": nrm(ks[7], (L, E, E), bf16), "ob": jnp.zeros((L, 1, E), f32),
        "l1w": nrm(ks[8], (L, E, DIM_FF), bf16), "l1b": jnp.zeros((L, 1, DIM_FF), f32),
        "l2w": nrm(ks[9], (L, DIM_FF, E), bf16), "l2b": jnp.zeros((L, 1, E), f32),
        "n1w": jnp.ones((L, 1, E), f32), "n1b": jnp.zeros((L, 1, E), f32),
        "n2w": jnp.ones((L, 1, E), f32), "n2b": jnp.zeros((L, 1, E), f32),
        # last_fc layer 1 weight in two layouts:
        #   w1    (W, E, Hh): reference;  w1.reshape(W*E, Hh) == Linear weight (transposed)
        #   w1cat (E, W*Hh) : kernel;     column w*Hh + j  ==  w1[w, :, j]
        "w1": w1,
        "w1cat": jnp.transpose(w1, (1, 0, 2)).reshape(E, W * Hh),
        "fold": jnp.tile(jnp.eye(Hh, dtype=bf16), (W, 1)),   # (W*Hh, Hh) 0/1
        "b1": jnp.zeros((1, Hh), f32),
        "w2": nrm(ks[11], (Hh, output_size), bf16),
        "b2": jnp.zeros((1, output_size), f32),
    }
    # Positional_Encoding table (window_size, embedding), same formula as the module.
    pos = jnp.arange(W, dtype=f32)[:, None]
    i = jnp.arange(E, dtype=f32)[None, :]
    angle = pos / jnp.power(10000.0, (jnp.floor(i / 2.0) * 2.0) / E)
    p["pe"] = jnp.where((jnp.arange(E) % 2)[None, :] == 0,
                        jnp.sin(angle), jnp.cos(angle)).astype(f32)
    return p


@jax.jit
def transformer_forward(x, p):
    B, W, I = x.shape
    E = p["ew"].shape[1]
    Hh = p["w2"].shape[0]
    O = p["w2"].shape[1]

    # Wrapper-side layout plumbing only (tiny, constant-foldable XLA ops):
    x2 = x.reshape(B * W, I)                               # b-major rows (b, w)
    embpe = jnp.tile(p["eb"] + p["pe"], (B, 1))            # (B*W, E) = eb + pe[w]
    # Head block-diagonal selection mask: mask[b*W + w, w2*Hh + j] = (w == w2)
    row_w = jnp.tile(jnp.arange(W), B)                     # (B*W,)
    col_w = jnp.repeat(jnp.arange(W), Hh)                  # (W*Hh,)
    mask = (row_w[:, None] == col_w[None, :]).astype(jnp.float32)

    args = (x2, embpe, p["ew"],
            p["qkvw"], p["qkvb"], p["ow"], p["ob"],
            p["l1w"], p["l1b"], p["l2w"], p["l2b"],
            p["n1w"], p["n1b"], p["n2w"], p["n2b"],
            p["w1cat"], mask, p["fold"], p["b1"], p["w2"], p["b2"])

    return pl.pallas_call(
        fused_kernel,
        out_shape=jax.ShapeDtypeStruct((B, O), jnp.float32),
        in_specs=[pl.BlockSpec(memory_space=pltpu.MemorySpace.VMEM)] * len(args),
        out_specs=pl.BlockSpec(memory_space=pltpu.MemorySpace.VMEM),
    )(*args)


def reference_forward(x, p):
    """Plain-JAX reference (f32 math with the same bf16-stored weights)."""
    B, W, I = x.shape
    E = p["ew"].shape[1]
    scale = 1.0 / math.sqrt(E)
    f32 = lambda a: a.astype(jnp.float32)

    def ln(y, g, b):
        mu = jnp.mean(y, axis=-1, keepdims=True)
        var = jnp.mean((y - mu) ** 2, axis=-1, keepdims=True)
        return (y - mu) / jnp.sqrt(var + LN_EPS) * g + b

    h = jnp.einsum("bwi,ie->bwe", x, f32(p["ew"])) + p["eb"][0] + p["pe"][None, :, :]
    for l in range(NUM_LAYERS):
        wqkv = f32(p["qkvw"][l])
        bqkv = p["qkvb"][l, 0]
        q = h @ wqkv[:, :E] + bqkv[:E]
        k = h @ wqkv[:, E:2 * E] + bqkv[E:2 * E]
        v = h @ wqkv[:, 2 * E:] + bqkv[2 * E:]
        s = jnp.einsum("bwe,cwe->wbc", q, k) * scale       # attention over batch axis
        a = jax.nn.softmax(s, axis=-1)
        ao = jnp.einsum("wbc,cwe->bwe", a, v)
        ao = ao @ f32(p["ow"][l]) + p["ob"][l, 0]
        h = ln(h + ao, p["n1w"][l, 0], p["n1b"][l, 0])
        f = jax.nn.relu(h @ f32(p["l1w"][l]) + p["l1b"][l, 0])
        f = f @ f32(p["l2w"][l]) + p["l2b"][l, 0]
        h = ln(h + f, p["n2w"][l, 0], p["n2b"][l, 0])
    flat = h.reshape(B, W * E)
    w1_2d = f32(p["w1"]).reshape(W * E, -1)
    z = jax.nn.relu(flat @ w1_2d + p["b1"][0])
    return z @ f32(p["w2"]) + p["b2"][0]


if __name__ == "__main__":
    # config: batch=2, window_size=8, input_size=16, embedding=32, hidden=32, output_size=4
    B, W, I = 2, 8, 16
    E, H, O = 32, 32, 4

    key = jax.random.PRNGKey(0)
    kx, kp = jax.random.split(key)
    x = jax.random.normal(kx, (B, W, I), dtype=jnp.float32)
    params = init_params(kp, I, E, W, H, O)

    out = jax.block_until_ready(transformer_forward(x, params))
    ref = reference_forward(x, params)
    err = float(jnp.max(jnp.abs(out - ref)))
    assert out.shape == (B, O), out.shape
    assert err < 3e-2, f"kernel/reference mismatch: max abs err = {err}"
    print("KERNEL_OK")
</pallas_src>

<mosaic_0001>
module attributes {stable_mosaic.version = 11 : i64} {
  func.func @fused_kernel(%arg0: memref<16x16xf32, #tpu.memory_space<vmem>>, %arg1: memref<16x32xf32, #tpu.memory_space<vmem>>, %arg2: memref<16x32xbf16, #tpu.memory_space<vmem>>, %arg3: memref<3x32x96xbf16, #tpu.memory_space<vmem>>, %arg4: memref<3x1x96xf32, #tpu.memory_space<vmem>>, %arg5: memref<3x32x32xbf16, #tpu.memory_space<vmem>>, %arg6: memref<3x1x32xf32, #tpu.memory_space<vmem>>, %arg7: memref<3x32x2048xbf16, #tpu.memory_space<vmem>>, %arg8: memref<3x1x2048xf32, #tpu.memory_space<vmem>>, %arg9: memref<3x2048x32xbf16, #tpu.memory_space<vmem>>, %arg10: memref<3x1x32xf32, #tpu.memory_space<vmem>>, %arg11: memref<3x1x32xf32, #tpu.memory_space<vmem>>, %arg12: memref<3x1x32xf32, #tpu.memory_space<vmem>>, %arg13: memref<3x1x32xf32, #tpu.memory_space<vmem>>, %arg14: memref<3x1x32xf32, #tpu.memory_space<vmem>>, %arg15: memref<32x256xbf16, #tpu.memory_space<vmem>>, %arg16: memref<16x256xf32, #tpu.memory_space<vmem>>, %arg17: memref<256x32xbf16, #tpu.memory_space<vmem>>, %arg18: memref<1x32xf32, #tpu.memory_space<vmem>>, %arg19: memref<32x4xbf16, #tpu.memory_space<vmem>>, %arg20: memref<1x4xf32, #tpu.memory_space<vmem>>, %arg21: memref<2x4xf32, #tpu.memory_space<vmem>>) attributes {dimension_semantics = [], scalar_prefetch = 0 : i64, scratch_operands = 0 : i64, tpu.core_type = #tpu.core_type<tc>} {
    %c0 = arith.constant 0 : index
    %c0_0 = arith.constant 0 : index
    %0 = vector.load %arg0[%c0, %c0_0] : memref<16x16xf32, #tpu.memory_space<vmem>>, vector<16x16xf32>
    %1 = arith.truncf %0 : vector<16x16xf32> to vector<16x16xbf16>
    %c0_1 = arith.constant 0 : index
    %c0_2 = arith.constant 0 : index
    %2 = vector.load %arg2[%c0_1, %c0_2] : memref<16x32xbf16, #tpu.memory_space<vmem>>, vector<16x32xbf16>
    %cst = arith.constant dense<0.000000e+00> : vector<16x32xf32>
    %3 = tpu.matmul %1, %2, %cst {dimension_numbers = #tpu.dot_dimension_numbers<[1], [0], [0], [1], [0, 0, 1, 1], [], []>} : vector<16x16xbf16>, vector<16x32xbf16>, vector<16x32xf32> -> vector<16x32xf32>
    %c0_3 = arith.constant 0 : index
    %c0_4 = arith.constant 0 : index
    %4 = vector.load %arg1[%c0_3, %c0_4] : memref<16x32xf32, #tpu.memory_space<vmem>>, vector<16x32xf32>
    %5 = arith.addf %3, %4 : vector<16x32xf32>
    %6 = arith.truncf %5 : vector<16x32xf32> to vector<16x32xbf16>
    %c0_5 = arith.constant 0 : index
    %c0_6 = arith.constant 0 : index
    %c0_7 = arith.constant 0 : index
    %7 = vector.load %arg3[%c0_5, %c0_6, %c0_7] : memref<3x32x96xbf16, #tpu.memory_space<vmem>>, vector<1x32x96xbf16>
    %8 = vector.shape_cast %7 : vector<1x32x96xbf16> to vector<32x96xbf16>
    %cst_8 = arith.constant dense<0.000000e+00> : vector<16x96xf32>
    %9 = tpu.matmul %6, %8, %cst_8 {dimension_numbers = #tpu.dot_dimension_numbers<[1], [0], [0], [1], [0, 0, 1, 1], [], []>} : vector<16x32xbf16>, vector<32x96xbf16>, vector<16x96xf32> -> vector<16x96xf32>
    %c0_9 = arith.constant 0 : index
    %c0_10 = arith.constant 0 : index
    %c0_11 = arith.constant 0 : index
    %10 = vector.load %arg4[%c0_9, %c0_10, %c0_11] : memref<3x1x96xf32, #tpu.memory_space<vmem>>, vector<1x1x96xf32>
    %11 = vector.shape_cast %10 : vector<1x1x96xf32> to vector<1x96xf32>
    %12 = vector.broadcast %11 : vector<1x96xf32> to vector<16x96xf32>
    %13 = arith.addf %9, %12 : vector<16x96xf32>
    %14 = vector.extract_strided_slice %13 {offsets = [0, 0], sizes = [16, 32], strides = [1, 1]} : vector<16x96xf32> to vector<16x32xf32>
    %cst_12 = arith.constant 0.176776692 : f32
    %15 = vector.broadcast %cst_12 : f32 to vector<16x32xf32>
    %16 = arith.mulf %14, %15 : vector<16x32xf32>
    %17 = vector.extract_strided_slice %13 {offsets = [0, 32], sizes = [16, 32], strides = [1, 1]} : vector<16x96xf32> to vector<16x32xf32>
    %18 = vector.extract_strided_slice %13 {offsets = [0, 64], sizes = [16, 32], strides = [1, 1]} : vector<16x96xf32> to vector<16x32xf32>
    %19 = arith.mulf %16, %17 : vector<16x32xf32>
    %cst_13 = arith.constant dense<0.000000e+00> : vector<16xf32>
    %20 = vector.multi_reduction <add>, %19, %cst_13 [1] : vector<16x32xf32> to vector<16xf32>
    %21 = vector.shape_cast %20 : vector<16xf32> to vector<16x1xf32>
    %22 = vector.extract_strided_slice %17 {offsets = [8, 0], sizes = [8, 32], strides = [1, 1]} : vector<16x32xf32> to vector<8x32xf32>
    %23 = vector.extract_strided_slice %17 {offsets = [0, 0], sizes = [8, 32], strides = [1, 1]} : vector<16x32xf32> to vector<8x32xf32>
    %24 = tpu.concatenate %22, %23 in 0 : vector<8x32xf32>, vector<8x32xf32> -> vector<16x32xf32>
    %25 = vector.extract_strided_slice %18 {offsets = [8, 0], sizes = [8, 32], strides = [1, 1]} : vector<16x32xf32> to vector<8x32xf32>
    %26 = vector.extract_strided_slice %18 {offsets = [0, 0], sizes = [8, 32], strides = [1, 1]} : vector<16x32xf32> to vector<8x32xf32>
    %27 = tpu.concatenate %25, %26 in 0 : vector<8x32xf32>, vector<8x32xf32> -> vector<16x32xf32>
    %28 = arith.mulf %16, %24 : vector<16x32xf32>
    %cst_14 = arith.constant dense<0.000000e+00> : vector<16xf32>
    %29 = vector.multi_reduction <add>, %28, %cst_14 [1] : vector<16x32xf32> to vector<16xf32>
    %30 = vector.shape_cast %29 : vector<16xf32> to vector<16x1xf32>
    %31 = arith.maximumf %21, %30 : vector<16x1xf32>
    %32 = arith.subf %21, %31 : vector<16x1xf32>
    %33 = math.exp %32 : vector<16x1xf32>
    %34 = arith.subf %30, %31 : vector<16x1xf32>
    %35 = math.exp %34 : vector<16x1xf32>
    %36 = arith.addf %33, %35 : vector<16x1xf32>
    %37 = tpu.reciprocal %36 {approx = true} : vector<16x1xf32> -> vector<16x1xf32>
    %38 = vector.broadcast %33 : vector<16x1xf32> to vector<16x32xf32>
    %39 = arith.mulf %38, %18 : vector<16x32xf32>
    %40 = vector.broadcast %35 : vector<16x1xf32> to vector<16x32xf32>
    %41 = arith.mulf %40, %27 : vector<16x32xf32>
    %42 = arith.addf %39, %41 : vector<16x32xf32>
    %43 = vector.broadcast %37 : vector<16x1xf32> to vector<16x32xf32>
    %44 = arith.mulf %42, %43 : vector<16x32xf32>
    %45 = arith.truncf %44 : vector<16x32xf32> to vector<16x32xbf16>
    %c0_15 = arith.constant 0 : index
    %c0_16 = arith.constant 0 : index
    %c0_17 = arith.constant 0 : index
    %46 = vector.load %arg5[%c0_15, %c0_16, %c0_17] : memref<3x32x32xbf16, #tpu.memory_space<vmem>>, vector<1x32x32xbf16>
    %47 = vector.shape_cast %46 : vector<1x32x32xbf16> to vector<32x32xbf16>
    %cst_18 = arith.constant dense<0.000000e+00> : vector<16x32xf32>
    %48 = tpu.matmul %45, %47, %cst_18 {dimension_numbers = #tpu.dot_dimension_numbers<[1], [0], [0], [1], [0, 0, 1, 1], [], []>} : vector<16x32xbf16>, vector<32x32xbf16>, vector<16x32xf32> -> vector<16x32xf32>
    %c0_19 = arith.constant 0 : index
    %c0_20 = arith.constant 0 : index
    %c0_21 = arith.constant 0 : index
    %49 = vector.load %arg6[%c0_19, %c0_20, %c0_21] : memref<3x1x32xf32, #tpu.memory_space<vmem>>, vector<1x1x32xf32>
    %50 = vector.shape_cast %49 : vector<1x1x32xf32> to vector<1x32xf32>
    %51 = vector.broadcast %50 : vector<1x32xf32> to vector<16x32xf32>
    %52 = arith.addf %48, %51 : vector<16x32xf32>
    %53 = arith.addf %5, %52 : vector<16x32xf32>
    %c0_22 = arith.constant 0 : index
    %c0_23 = arith.constant 0 : index
    %c0_24 = arith.constant 0 : index
    %54 = vector.load %arg11[%c0_22, %c0_23, %c0_24] : memref<3x1x32xf32, #tpu.memory_space<vmem>>, vector<1x1x32xf32>
    %55 = vector.shape_cast %54 : vector<1x1x32xf32> to vector<1x32xf32>
    %c0_25 = arith.constant 0 : index
    %c0_26 = arith.constant 0 : index
    %c0_27 = arith.constant 0 : index
    %56 = vector.load %arg12[%c0_25, %c0_26, %c0_27] : memref<3x1x32xf32, #tpu.memory_space<vmem>>, vector<1x1x32xf32>
    %57 = vector.shape_cast %56 : vector<1x1x32xf32> to vector<1x32xf32>
    %cst_28 = arith.constant dense<0.000000e+00> : vector<16xf32>
    %58 = vector.multi_reduction <add>, %53, %cst_28 [1] : vector<16x32xf32> to vector<16xf32>
    %59 = vector.shape_cast %58 : vector<16xf32> to vector<16x1xf32>
    %cst_29 = arith.constant 3.200000e+01 : f32
    %60 = vector.broadcast %cst_29 : f32 to vector<16x1xf32>
    %61 = arith.divf %59, %60 : vector<16x1xf32>
    %62 = vector.broadcast %61 : vector<16x1xf32> to vector<16x32xf32>
    %63 = arith.subf %53, %62 : vector<16x32xf32>
    %64 = arith.mulf %63, %63 : vector<16x32xf32>
    %cst_30 = arith.constant dense<0.000000e+00> : vector<16xf32>
    %65 = vector.multi_reduction <add>, %64, %cst_30 [1] : vector<16x32xf32> to vector<16xf32>
    %66 = vector.shape_cast %65 : vector<16xf32> to vector<16x1xf32>
    %cst_31 = arith.constant 3.200000e+01 : f32
    %67 = vector.broadcast %cst_31 : f32 to vector<16x1xf32>
    %68 = arith.divf %66, %67 : vector<16x1xf32>
    %cst_32 = arith.constant 9.99999974E-6 : f32
    %69 = vector.broadcast %cst_32 : f32 to vector<16x1xf32>
    %70 = arith.addf %68, %69 : vector<16x1xf32>
    %71 = math.rsqrt %70 : vector<16x1xf32>
    %72 = vector.broadcast %71 : vector<16x1xf32> to vector<16x32xf32>
    %73 = arith.mulf %63, %72 : vector<16x32xf32>
    %74 = vector.broadcast %55 : vector<1x32xf32> to vector<16x32xf32>
    %75 = arith.mulf %73, %74 : vector<16x32xf32>
    %76 = vector.broadcast %57 : vector<1x32xf32> to vector<16x32xf32>
    %77 = arith.addf %75, %76 : vector<16x32xf32>
    %78 = arith.truncf %77 : vector<16x32xf32> to vector<16x32xbf16>
    %c0_33 = arith.constant 0 : index
    %c0_34 = arith.constant 0 : index
    %c0_35 = arith.constant 0 : index
    %79 = vector.load %arg7[%c0_33, %c0_34, %c0_35] : memref<3x32x2048xbf16, #tpu.memory_space<vmem>>, vector<1x32x512xbf16>
    %80 = vector.shape_cast %79 : vector<1x32x512xbf16> to vector<32x512xbf16>
    %cst_36 = arith.constant dense<0.000000e+00> : vector<16x512xf32>
    %81 = tpu.matmul %78, %80, %cst_36 {dimension_numbers = #tpu.dot_dimension_numbers<[1], [0], [0], [1], [0, 0, 1, 1], [], []>} : vector<16x32xbf16>, vector<32x512xbf16>, vector<16x512xf32> -> vector<16x512xf32>
    %c0_37 = arith.constant 0 : index
    %c0_38 = arith.constant 0 : index
    %c0_39 = arith.constant 0 : index
    %82 = vector.load %arg8[%c0_37, %c0_38, %c0_39] : memref<3x1x2048xf32, #tpu.memory_space<vmem>>, vector<1x1x512xf32>
    %83 = vector.shape_cast %82 : vector<1x1x512xf32> to vector<1x512xf32>
    %84 = vector.broadcast %83 : vector<1x512xf32> to vector<16x512xf32>
    %85 = arith.addf %81, %84 : vector<16x512xf32>
    %cst_40 = arith.constant 0.000000e+00 : f32
    %86 = vector.broadcast %cst_40 : f32 to vector<16x512xf32>
    %87 = arith.maximumf %85, %86 : vector<16x512xf32>
    %88 = arith.truncf %87 : vector<16x512xf32> to vector<16x512xbf16>
    %c0_41 = arith.constant 0 : index
    %c0_42 = arith.constant 0 : index
    %c0_43 = arith.constant 0 : index
    %89 = vector.load %arg9[%c0_41, %c0_42, %c0_43] : memref<3x2048x32xbf16, #tpu.memory_space<vmem>>, vector<1x512x32xbf16>
    %90 = vector.shape_cast %89 : vector<1x512x32xbf16> to vector<512x32xbf16>
    %cst_44 = arith.constant dense<0.000000e+00> : vector<16x32xf32>
    %91 = tpu.matmul %88, %90, %cst_44 {dimension_numbers = #tpu.dot_dimension_numbers<[1], [0], [0], [1], [0, 0, 1, 1], [], []>} : vector<16x512xbf16>, vector<512x32xbf16>, vector<16x32xf32> -> vector<16x32xf32>
    %c0_45 = arith.constant 0 : index
    %c0_46 = arith.constant 0 : index
    %c512 = arith.constant 512 : index
    %92 = vector.load %arg7[%c0_45, %c0_46, %c512] : memref<3x32x2048xbf16, #tpu.memory_space<vmem>>, vector<1x32x512xbf16>
    %93 = vector.shape_cast %92 : vector<1x32x512xbf16> to vector<32x512xbf16>
    %cst_47 = arith.constant dense<0.000000e+00> : vector<16x512xf32>
    %94 = tpu.matmul %78, %93, %cst_47 {dimension_numbers = #tpu.dot_dimension_numbers<[1], [0], [0], [1], [0, 0, 1, 1], [], []>} : vector<16x32xbf16>, vector<32x512xbf16>, vector<16x512xf32> -> vector<16x512xf32>
    %c0_48 = arith.constant 0 : index
    %c0_49 = arith.constant 0 : index
    %c512_50 = arith.constant 512 : index
    %95 = vector.load %arg8[%c0_48, %c0_49, %c512_50] : memref<3x1x2048xf32, #tpu.memory_space<vmem>>, vector<1x1x512xf32>
    %96 = vector.shape_cast %95 : vector<1x1x512xf32> to vector<1x512xf32>
    %97 = vector.broadcast %96 : vector<1x512xf32> to vector<16x512xf32>
    %98 = arith.addf %94, %97 : vector<16x512xf32>
    %cst_51 = arith.constant 0.000000e+00 : f32
    %99 = vector.broadcast %cst_51 : f32 to vector<16x512xf32>
    %100 = arith.maximumf %98, %99 : vector<16x512xf32>
    %101 = arith.truncf %100 : vector<16x512xf32> to vector<16x512xbf16>
    %c0_52 = arith.constant 0 : index
    %c512_53 = arith.constant 512 : index
    %c0_54 = arith.constant 0 : index
    %102 = vector.load %arg9[%c0_52, %c512_53, %c0_54] : memref<3x2048x32xbf16, #tpu.memory_space<vmem>>, vector<1x512x32xbf16>
    %103 = vector.shape_cast %102 : vector<1x512x32xbf16> to vector<512x32xbf16>
    %cst_55 = arith.constant dense<0.000000e+00> : vector<16x32xf32>
    %104 = tpu.matmul %101, %103, %cst_55 {dimension_numbers = #tpu.dot_dimension_numbers<[1], [0], [0], [1], [0, 0, 1, 1], [], []>} : vector<16x512xbf16>, vector<512x32xbf16>, vector<16x32xf32> -> vector<16x32xf32>
    %c0_56 = arith.constant 0 : index
    %c0_57 = arith.constant 0 : index
    %c1024 = arith.constant 1024 : index
    %105 = vector.load %arg7[%c0_56, %c0_57, %c1024] : memref<3x32x2048xbf16, #tpu.memory_space<vmem>>, vector<1x32x512xbf16>
    %106 = vector.shape_cast %105 : vector<1x32x512xbf16> to vector<32x512xbf16>
    %cst_58 = arith.constant dense<0.000000e+00> : vector<16x512xf32>
    %107 = tpu.matmul %78, %106, %cst_58 {dimension_numbers = #tpu.dot_dimension_numbers<[1], [0], [0], [1], [0, 0, 1, 1], [], []>} : vector<16x32xbf16>, vector<32x512xbf16>, vector<16x512xf32> -> vector<16x512xf32>
    %c0_59 = arith.constant 0 : index
    %c0_60 = arith.constant 0 : index
    %c1024_61 = arith.constant 1024 : index
    %108 = vector.load %arg8[%c0_59, %c0_60, %c1024_61] : memref<3x1x2048xf32, #tpu.memory_space<vmem>>, vector<1x1x512xf32>
    %109 = vector.shape_cast %108 : vector<1x1x512xf32> to vector<1x512xf32>
    %110 = vector.broadcast %109 : vector<1x512xf32> to vector<16x512xf32>
    %111 = arith.addf %107, %110 : vector<16x512xf32>
    %cst_62 = arith.constant 0.000000e+00 : f32
    %112 = vector.broadcast %cst_62 : f32 to vector<16x512xf32>
    %113 = arith.maximumf %111, %112 : vector<16x512xf32>
    %114 = arith.truncf %113 : vector<16x512xf32> to vector<16x512xbf16>
    %c0_63 = arith.constant 0 : index
    %c1024_64 = arith.constant 1024 : index
    %c0_65 = arith.constant 0 : index
    %115 = vector.load %arg9[%c0_63, %c1024_64, %c0_65] : memref<3x2048x32xbf16, #tpu.memory_space<vmem>>, vector<1x512x32xbf16>
    %116 = vector.shape_cast %115 : vector<1x512x32xbf16> to vector<512x32xbf16>
    %cst_66 = arith.constant dense<0.000000e+00> : vector<16x32xf32>
    %117 = tpu.matmul %114, %116, %cst_66 {dimension_numbers = #tpu.dot_dimension_numbers<[1], [0], [0], [1], [0, 0, 1, 1], [], []>} : vector<16x512xbf16>, vector<512x32xbf16>, vector<16x32xf32> -> vector<16x32xf32>
    %c0_67 = arith.constant 0 : index
    %c0_68 = arith.constant 0 : index
    %c1536 = arith.constant 1536 : index
    %118 = vector.load %arg7[%c0_67, %c0_68, %c1536] : memref<3x32x2048xbf16, #tpu.memory_space<vmem>>, vector<1x32x512xbf16>
    %119 = vector.shape_cast %118 : vector<1x32x512xbf16> to vector<32x512xbf16>
    %cst_69 = arith.constant dense<0.000000e+00> : vector<16x512xf32>
    %120 = tpu.matmul %78, %119, %cst_69 {dimension_numbers = #tpu.dot_dimension_numbers<[1], [0], [0], [1], [0, 0, 1, 1], [], []>} : vector<16x32xbf16>, vector<32x512xbf16>, vector<16x512xf32> -> vector<16x512xf32>
    %c0_70 = arith.constant 0 : index
    %c0_71 = arith.constant 0 : index
    %c1536_72 = arith.constant 1536 : index
    %121 = vector.load %arg8[%c0_70, %c0_71, %c1536_72] : memref<3x1x2048xf32, #tpu.memory_space<vmem>>, vector<1x1x512xf32>
    %122 = vector.shape_cast %121 : vector<1x1x512xf32> to vector<1x512xf32>
    %123 = vector.broadcast %122 : vector<1x512xf32> to vector<16x512xf32>
    %124 = arith.addf %120, %123 : vector<16x512xf32>
    %cst_73 = arith.constant 0.000000e+00 : f32
    %125 = vector.broadcast %cst_73 : f32 to vector<16x512xf32>
    %126 = arith.maximumf %124, %125 : vector<16x512xf32>
    %127 = arith.truncf %126 : vector<16x512xf32> to vector<16x512xbf16>
    %c0_74 = arith.constant 0 : index
    %c1536_75 = arith.constant 1536 : index
    %c0_76 = arith.constant 0 : index
    %128 = vector.load %arg9[%c0_74, %c1536_75, %c0_76] : memref<3x2048x32xbf16, #tpu.memory_space<vmem>>, vector<1x512x32xbf16>
    %129 = vector.shape_cast %128 : vector<1x512x32xbf16> to vector<512x32xbf16>
    %cst_77 = arith.constant dense<0.000000e+00> : vector<16x32xf32>
    %130 = tpu.matmul %127, %129, %cst_77 {dimension_numbers = #tpu.dot_dimension_numbers<[1], [0], [0], [1], [0, 0, 1, 1], [], []>} : vector<16x512xbf16>, vector<512x32xbf16>, vector<16x32xf32> -> vector<16x32xf32>
    %131 = arith.addf %91, %104 : vector<16x32xf32>
    %132 = arith.addf %117, %130 : vector<16x32xf32>
    %133 = arith.addf %131, %132 : vector<16x32xf32>
    %c0_78 = arith.constant 0 : index
    %c0_79 = arith.constant 0 : index
    %c0_80 = arith.constant 0 : index
    %134 = vector.load %arg10[%c0_78, %c0_79, %c0_80] : memref<3x1x32xf32, #tpu.memory_space<vmem>>, vector<1x1x32xf32>
    %135 = vector.shape_cast %134 : vector<1x1x32xf32> to vector<1x32xf32>
    %136 = vector.broadcast %135 : vector<1x32xf32> to vector<16x32xf32>
    %137 = arith.addf %133, %136 : vector<16x32xf32>
    %138 = arith.addf %77, %137 : vector<16x32xf32>
    %c0_81 = arith.constant 0 : index
    %c0_82 = arith.constant 0 : index
    %c0_83 = arith.constant 0 : index
    %139 = vector.load %arg13[%c0_81, %c0_82, %c0_83] : memref<3x1x32xf32, #tpu.memory_space<vmem>>, vector<1x1x32xf32>
    %140 = vector.shape_cast %139 : vector<1x1x32xf32> to vector<1x32xf32>
    %c0_84 = arith.constant 0 : index
    %c0_85 = arith.constant 0 : index
    %c0_86 = arith.constant 0 : index
    %141 = vector.load %arg14[%c0_84, %c0_85, %c0_86] : memref<3x1x32xf32, #tpu.memory_space<vmem>>, vector<1x1x32xf32>
    %142 = vector.shape_cast %141 : vector<1x1x32xf32> to vector<1x32xf32>
    %cst_87 = arith.constant dense<0.000000e+00> : vector<16xf32>
    %143 = vector.multi_reduction <add>, %138, %cst_87 [1] : vector<16x32xf32> to vector<16xf32>
    %144 = vector.shape_cast %143 : vector<16xf32> to vector<16x1xf32>
    %cst_88 = arith.constant 3.200000e+01 : f32
    %145 = vector.broadcast %cst_88 : f32 to vector<16x1xf32>
    %146 = arith.divf %144, %145 : vector<16x1xf32>
    %147 = vector.broadcast %146 : vector<16x1xf32> to vector<16x32xf32>
    %148 = arith.subf %138, %147 : vector<16x32xf32>
    %149 = arith.mulf %148, %148 : vector<16x32xf32>
    %cst_89 = arith.constant dense<0.000000e+00> : vector<16xf32>
    %150 = vector.multi_reduction <add>, %149, %cst_89 [1] : vector<16x32xf32> to vector<16xf32>
    %151 = vector.shape_cast %150 : vector<16xf32> to vector<16x1xf32>
    %cst_90 = arith.constant 3.200000e+01 : f32
    %152 = vector.broadcast %cst_90 : f32 to vector<16x1xf32>
    %153 = arith.divf %151, %152 : vector<16x1xf32>
    %cst_91 = arith.constant 9.99999974E-6 : f32
    %154 = vector.broadcast %cst_91 : f32 to vector<16x1xf32>
    %155 = arith.addf %153, %154 : vector<16x1xf32>
    %156 = math.rsqrt %155 : vector<16x1xf32>
    %157 = vector.broadcast %156 : vector<16x1xf32> to vector<16x32xf32>
    %158 = arith.mulf %148, %157 : vector<16x32xf32>
    %159 = vector.broadcast %140 : vector<1x32xf32> to vector<16x32xf32>
    %160 = arith.mulf %158, %159 : vector<16x32xf32>
    %161 = vector.broadcast %142 : vector<1x32xf32> to vector<16x32xf32>
    %162 = arith.addf %160, %161 : vector<16x32xf32>
    %163 = arith.truncf %162 : vector<16x32xf32> to vector<16x32xbf16>
    %c1 = arith.constant 1 : index
    %c0_92 = arith.constant 0 : index
    %c0_93 = arith.constant 0 : index
    %164 = vector.load %arg3[%c1, %c0_92, %c0_93] : memref<3x32x96xbf16, #tpu.memory_space<vmem>>, vector<1x32x96xbf16>
    %165 = vector.shape_cast %164 : vector<1x32x96xbf16> to vector<32x96xbf16>
    %cst_94 = arith.constant dense<0.000000e+00> : vector<16x96xf32>
    %166 = tpu.matmul %163, %165, %cst_94 {dimension_numbers = #tpu.dot_dimension_numbers<[1], [0], [0], [1], [0, 0, 1, 1], [], []>} : vector<16x32xbf16>, vector<32x96xbf16>, vector<16x96xf32> -> vector<16x96xf32>
    %c1_95 = arith.constant 1 : index
    %c0_96 = arith.constant 0 : index
    %c0_97 = arith.constant 0 : index
    %167 = vector.load %arg4[%c1_95, %c0_96, %c0_97] : memref<3x1x96xf32, #tpu.memory_space<vmem>>, vector<1x1x96xf32>
    %168 = vector.shape_cast %167 : vector<1x1x96xf32> to vector<1x96xf32>
    %169 = vector.broadcast %168 : vector<1x96xf32> to vector<16x96xf32>
    %170 = arith.addf %166, %169 : vector<16x96xf32>
    %171 = vector.extract_strided_slice %170 {offsets = [0, 0], sizes = [16, 32], strides = [1, 1]} : vector<16x96xf32> to vector<16x32xf32>
    %cst_98 = arith.constant 0.176776692 : f32
    %172 = vector.broadcast %cst_98 : f32 to vector<16x32xf32>
    %173 = arith.mulf %171, %172 : vector<16x32xf32>
    %174 = vector.extract_strided_slice %170 {offsets = [0, 32], sizes = [16, 32], strides = [1, 1]} : vector<16x96xf32> to vector<16x32xf32>
    %175 = vector.extract_strided_slice %170 {offsets = [0, 64], sizes = [16, 32], strides = [1, 1]} : vector<16x96xf32> to vector<16x32xf32>
    %176 = arith.mulf %173, %174 : vector<16x32xf32>
    %cst_99 = arith.constant dense<0.000000e+00> : vector<16xf32>
    %177 = vector.multi_reduction <add>, %176, %cst_99 [1] : vector<16x32xf32> to vector<16xf32>
    %178 = vector.shape_cast %177 : vector<16xf32> to vector<16x1xf32>
    %179 = vector.extract_strided_slice %174 {offsets = [8, 0], sizes = [8, 32], strides = [1, 1]} : vector<16x32xf32> to vector<8x32xf32>
    %180 = vector.extract_strided_slice %174 {offsets = [0, 0], sizes = [8, 32], strides = [1, 1]} : vector<16x32xf32> to vector<8x32xf32>
    %181 = tpu.concatenate %179, %180 in 0 : vector<8x32xf32>, vector<8x32xf32> -> vector<16x32xf32>
    %182 = vector.extract_strided_slice %175 {offsets = [8, 0], sizes = [8, 32], strides = [1, 1]} : vector<16x32xf32> to vector<8x32xf32>
    %183 = vector.extract_strided_slice %175 {offsets = [0, 0], sizes = [8, 32], strides = [1, 1]} : vector<16x32xf32> to vector<8x32xf32>
    %184 = tpu.concatenate %182, %183 in 0 : vector<8x32xf32>, vector<8x32xf32> -> vector<16x32xf32>
    %185 = arith.mulf %173, %181 : vector<16x32xf32>
    %cst_100 = arith.constant dense<0.000000e+00> : vector<16xf32>
    %186 = vector.multi_reduction <add>, %185, %cst_100 [1] : vector<16x32xf32> to vector<16xf32>
    %187 = vector.shape_cast %186 : vector<16xf32> to vector<16x1xf32>
    %188 = arith.maximumf %178, %187 : vector<16x1xf32>
    %189 = arith.subf %178, %188 : vector<16x1xf32>
    %190 = math.exp %189 : vector<16x1xf32>
    %191 = arith.subf %187, %188 : vector<16x1xf32>
    %192 = math.exp %191 : vector<16x1xf32>
    %193 = arith.addf %190, %192 : vector<16x1xf32>
    %194 = tpu.reciprocal %193 {approx = true} : vector<16x1xf32> -> vector<16x1xf32>
    %195 = vector.broadcast %190 : vector<16x1xf32> to vector<16x32xf32>
    %196 = arith.mulf %195, %175 : vector<16x32xf32>
    %197 = vector.broadcast %192 : vector<16x1xf32> to vector<16x32xf32>
    %198 = arith.mulf %197, %184 : vector<16x32xf32>
    %199 = arith.addf %196, %198 : vector<16x32xf32>
    %200 = vector.broadcast %194 : vector<16x1xf32> to vector<16x32xf32>
    %201 = arith.mulf %199, %200 : vector<16x32xf32>
    %202 = arith.truncf %201 : vector<16x32xf32> to vector<16x32xbf16>
    %c1_101 = arith.constant 1 : index
    %c0_102 = arith.constant 0 : index
    %c0_103 = arith.constant 0 : index
    %203 = vector.load %arg5[%c1_101, %c0_102, %c0_103] : memref<3x32x32xbf16, #tpu.memory_space<vmem>>, vector<1x32x32xbf16>
    %204 = vector.shape_cast %203 : vector<1x32x32xbf16> to vector<32x32xbf16>
    %cst_104 = arith.constant dense<0.000000e+00> : vector<16x32xf32>
    %205 = tpu.matmul %202, %204, %cst_104 {dimension_numbers = #tpu.dot_dimension_numbers<[1], [0], [0], [1], [0, 0, 1, 1], [], []>} : vector<16x32xbf16>, vector<32x32xbf16>, vector<16x32xf32> -> vector<16x32xf32>
    %c1_105 = arith.constant 1 : index
    %c0_106 = arith.constant 0 : index
    %c0_107 = arith.constant 0 : index
    %206 = vector.load %arg6[%c1_105, %c0_106, %c0_107] : memref<3x1x32xf32, #tpu.memory_space<vmem>>, vector<1x1x32xf32>
    %207 = vector.shape_cast %206 : vector<1x1x32xf32> to vector<1x32xf32>
    %208 = vector.broadcast %207 : vector<1x32xf32> to vector<16x32xf32>
    %209 = arith.addf %205, %208 : vector<16x32xf32>
    %210 = arith.addf %162, %209 : vector<16x32xf32>
    %c1_108 = arith.constant 1 : index
    %c0_109 = arith.constant 0 : index
    %c0_110 = arith.constant 0 : index
    %211 = vector.load %arg11[%c1_108, %c0_109, %c0_110] : memref<3x1x32xf32, #tpu.memory_space<vmem>>, vector<1x1x32xf32>
    %212 = vector.shape_cast %211 : vector<1x1x32xf32> to vector<1x32xf32>
    %c1_111 = arith.constant 1 : index
    %c0_112 = arith.constant 0 : index
    %c0_113 = arith.constant 0 : index
    %213 = vector.load %arg12[%c1_111, %c0_112, %c0_113] : memref<3x1x32xf32, #tpu.memory_space<vmem>>, vector<1x1x32xf32>
    %214 = vector.shape_cast %213 : vector<1x1x32xf32> to vector<1x32xf32>
    %cst_114 = arith.constant dense<0.000000e+00> : vector<16xf32>
    %215 = vector.multi_reduction <add>, %210, %cst_114 [1] : vector<16x32xf32> to vector<16xf32>
    %216 = vector.shape_cast %215 : vector<16xf32> to vector<16x1xf32>
    %cst_115 = arith.constant 3.200000e+01 : f32
    %217 = vector.broadcast %cst_115 : f32 to vector<16x1xf32>
    %218 = arith.divf %216, %217 : vector<16x1xf32>
    %219 = vector.broadcast %218 : vector<16x1xf32> to vector<16x32xf32>
    %220 = arith.subf %210, %219 : vector<16x32xf32>
    %221 = arith.mulf %220, %220 : vector<16x32xf32>
    %cst_116 = arith.constant dense<0.000000e+00> : vector<16xf32>
    %222 = vector.multi_reduction <add>, %221, %cst_116 [1] : vector<16x32xf32> to vector<16xf32>
    %223 = vector.shape_cast %222 : vector<16xf32> to vector<16x1xf32>
    %cst_117 = arith.constant 3.200000e+01 : f32
    %224 = vector.broadcast %cst_117 : f32 to vector<16x1xf32>
    %225 = arith.divf %223, %224 : vector<16x1xf32>
    %cst_118 = arith.constant 9.99999974E-6 : f32
    %226 = vector.broadcast %cst_118 : f32 to vector<16x1xf32>
    %227 = arith.addf %225, %226 : vector<16x1xf32>
    %228 = math.rsqrt %227 : vector<16x1xf32>
    %229 = vector.broadcast %228 : vector<16x1xf32> to vector<16x32xf32>
    %230 = arith.mulf %220, %229 : vector<16x32xf32>
    %231 = vector.broadcast %212 : vector<1x32xf32> to vector<16x32xf32>
    %232 = arith.mulf %230, %231 : vector<16x32xf32>
    %233 = vector.broadcast %214 : vector<1x32xf32> to vector<16x32xf32>
    %234 = arith.addf %232, %233 : vector<16x32xf32>
    %235 = arith.truncf %234 : vector<16x32xf32> to vector<16x32xbf16>
    %c1_119 = arith.constant 1 : index
    %c0_120 = arith.constant 0 : index
    %c0_121 = arith.constant 0 : index
    %236 = vector.load %arg7[%c1_119, %c0_120, %c0_121] : memref<3x32x2048xbf16, #tpu.memory_space<vmem>>, vector<1x32x512xbf16>
    %237 = vector.shape_cast %236 : vector<1x32x512xbf16> to vector<32x512xbf16>
    %cst_122 = arith.constant dense<0.000000e+00> : vector<16x512xf32>
    %238 = tpu.matmul %235, %237, %cst_122 {dimension_numbers = #tpu.dot_dimension_numbers<[1], [0], [0], [1], [0, 0, 1, 1], [], []>} : vector<16x32xbf16>, vector<32x512xbf16>, vector<16x512xf32> -> vector<16x512xf32>
    %c1_123 = arith.constant 1 : index
    %c0_124 = arith.constant 0 : index
    %c0_125 = arith.constant 0 : index
    %239 = vector.load %arg8[%c1_123, %c0_124, %c0_125] : memref<3x1x2048xf32, #tpu.memory_space<vmem>>, vector<1x1x512xf32>
    %240 = vector.shape_cast %239 : vector<1x1x512xf32> to vector<1x512xf32>
    %241 = vector.broadcast %240 : vector<1x512xf32> to vector<16x512xf32>
    %242 = arith.addf %238, %241 : vector<16x512xf32>
    %cst_126 = arith.constant 0.000000e+00 : f32
    %243 = vector.broadcast %cst_126 : f32 to vector<16x512xf32>
    %244 = arith.maximumf %242, %243 : vector<16x512xf32>
    %245 = arith.truncf %244 : vector<16x512xf32> to vector<16x512xbf16>
    %c1_127 = arith.constant 1 : index
    %c0_128 = arith.constant 0 : index
    %c0_129 = arith.constant 0 : index
    %246 = vector.load %arg9[%c1_127, %c0_128, %c0_129] : memref<3x2048x32xbf16, #tpu.memory_space<vmem>>, vector<1x512x32xbf16>
    %247 = vector.shape_cast %246 : vector<1x512x32xbf16> to vector<512x32xbf16>
    %cst_130 = arith.constant dense<0.000000e+00> : vector<16x32xf32>
    %248 = tpu.matmul %245, %247, %cst_130 {dimension_numbers = #tpu.dot_dimension_numbers<[1], [0], [0], [1], [0, 0, 1, 1], [], []>} : vector<16x512xbf16>, vector<512x32xbf16>, vector<16x32xf32> -> vector<16x32xf32>
    %c1_131 = arith.constant 1 : index
    %c0_132 = arith.constant 0 : index
    %c512_133 = arith.constant 512 : index
    %249 = vector.load %arg7[%c1_131, %c0_132, %c512_133] : memref<3x32x2048xbf16, #tpu.memory_space<vmem>>, vector<1x32x512xbf16>
    %250 = vector.shape_cast %249 : vector<1x32x512xbf16> to vector<32x512xbf16>
    %cst_134 = arith.constant dense<0.000000e+00> : vector<16x512xf32>
    %251 = tpu.matmul %235, %250, %cst_134 {dimension_numbers = #tpu.dot_dimension_numbers<[1], [0], [0], [1], [0, 0, 1, 1], [], []>} : vector<16x32xbf16>, vector<32x512xbf16>, vector<16x512xf32> -> vector<16x512xf32>
    %c1_135 = arith.constant 1 : index
    %c0_136 = arith.constant 0 : index
    %c512_137 = arith.constant 512 : index
    %252 = vector.load %arg8[%c1_135, %c0_136, %c512_137] : memref<3x1x2048xf32, #tpu.memory_space<vmem>>, vector<1x1x512xf32>
    %253 = vector.shape_cast %252 : vector<1x1x512xf32> to vector<1x512xf32>
    %254 = vector.broadcast %253 : vector<1x512xf32> to vector<16x512xf32>
    %255 = arith.addf %251, %254 : vector<16x512xf32>
    %cst_138 = arith.constant 0.000000e+00 : f32
    %256 = vector.broadcast %cst_138 : f32 to vector<16x512xf32>
    %257 = arith.maximumf %255, %256 : vector<16x512xf32>
    %258 = arith.truncf %257 : vector<16x512xf32> to vector<16x512xbf16>
    %c1_139 = arith.constant 1 : index
    %c512_140 = arith.constant 512 : index
    %c0_141 = arith.constant 0 : index
    %259 = vector.load %arg9[%c1_139, %c512_140, %c0_141] : memref<3x2048x32xbf16, #tpu.memory_space<vmem>>, vector<1x512x32xbf16>
    %260 = vector.shape_cast %259 : vector<1x512x32xbf16> to vector<512x32xbf16>
    %cst_142 = arith.constant dense<0.000000e+00> : vector<16x32xf32>
    %261 = tpu.matmul %258, %260, %cst_142 {dimension_numbers = #tpu.dot_dimension_numbers<[1], [0], [0], [1], [0, 0, 1, 1], [], []>} : vector<16x512xbf16>, vector<512x32xbf16>, vector<16x32xf32> -> vector<16x32xf32>
    %c1_143 = arith.constant 1 : index
    %c0_144 = arith.constant 0 : index
    %c1024_145 = arith.constant 1024 : index
    %262 = vector.load %arg7[%c1_143, %c0_144, %c1024_145] : memref<3x32x2048xbf16, #tpu.memory_space<vmem>>, vector<1x32x512xbf16>
    %263 = vector.shape_cast %262 : vector<1x32x512xbf16> to vector<32x512xbf16>
    %cst_146 = arith.constant dense<0.000000e+00> : vector<16x512xf32>
    %264 = tpu.matmul %235, %263, %cst_146 {dimension_numbers = #tpu.dot_dimension_numbers<[1], [0], [0], [1], [0, 0, 1, 1], [], []>} : vector<16x32xbf16>, vector<32x512xbf16>, vector<16x512xf32> -> vector<16x512xf32>
    %c1_147 = arith.constant 1 : index
    %c0_148 = arith.constant 0 : index
    %c1024_149 = arith.constant 1024 : index
    %265 = vector.load %arg8[%c1_147, %c0_148, %c1024_149] : memref<3x1x2048xf32, #tpu.memory_space<vmem>>, vector<1x1x512xf32>
    %266 = vector.shape_cast %265 : vector<1x1x512xf32> to vector<1x512xf32>
    %267 = vector.broadcast %266 : vector<1x512xf32> to vector<16x512xf32>
    %268 = arith.addf %264, %267 : vector<16x512xf32>
    %cst_150 = arith.constant 0.000000e+00 : f32
    %269 = vector.broadcast %cst_150 : f32 to vector<16x512xf32>
    %270 = arith.maximumf %268, %269 : vector<16x512xf32>
    %271 = arith.truncf %270 : vector<16x512xf32> to vector<16x512xbf16>
    %c1_151 = arith.constant 1 : index
    %c1024_152 = arith.constant 1024 : index
    %c0_153 = arith.constant 0 : index
    %272 = vector.load %arg9[%c1_151, %c1024_152, %c0_153] : memref<3x2048x32xbf16, #tpu.memory_space<vmem>>, vector<1x512x32xbf16>
    %273 = vector.shape_cast %272 : vector<1x512x32xbf16> to vector<512x32xbf16>
    %cst_154 = arith.constant dense<0.000000e+00> : vector<16x32xf32>
    %274 = tpu.matmul %271, %273, %cst_154 {dimension_numbers = #tpu.dot_dimension_numbers<[1], [0], [0], [1], [0, 0, 1, 1], [], []>} : vector<16x512xbf16>, vector<512x32xbf16>, vector<16x32xf32> -> vector<16x32xf32>
    %c1_155 = arith.constant 1 : index
    %c0_156 = arith.constant 0 : index
    %c1536_157 = arith.constant 1536 : index
    %275 = vector.load %arg7[%c1_155, %c0_156, %c1536_157] : memref<3x32x2048xbf16, #tpu.memory_space<vmem>>, vector<1x32x512xbf16>
    %276 = vector.shape_cast %275 : vector<1x32x512xbf16> to vector<32x512xbf16>
    %cst_158 = arith.constant dense<0.000000e+00> : vector<16x512xf32>
    %277 = tpu.matmul %235, %276, %cst_158 {dimension_numbers = #tpu.dot_dimension_numbers<[1], [0], [0], [1], [0, 0, 1, 1], [], []>} : vector<16x32xbf16>, vector<32x512xbf16>, vector<16x512xf32> -> vector<16x512xf32>
    %c1_159 = arith.constant 1 : index
    %c0_160 = arith.constant 0 : index
    %c1536_161 = arith.constant 1536 : index
    %278 = vector.load %arg8[%c1_159, %c0_160, %c1536_161] : memref<3x1x2048xf32, #tpu.memory_space<vmem>>, vector<1x1x512xf32>
    %279 = vector.shape_cast %278 : vector<1x1x512xf32> to vector<1x512xf32>
    %280 = vector.broadcast %279 : vector<1x512xf32> to vector<16x512xf32>
    %281 = arith.addf %277, %280 : vector<16x512xf32>
    %cst_162 = arith.constant 0.000000e+00 : f32
    %282 = vector.broadcast %cst_162 : f32 to vector<16x512xf32>
    %283 = arith.maximumf %281, %282 : vector<16x512xf32>
    %284 = arith.truncf %283 : vector<16x512xf32> to vector<16x512xbf16>
    %c1_163 = arith.constant 1 : index
    %c1536_164 = arith.constant 1536 : index
    %c0_165 = arith.constant 0 : index
    %285 = vector.load %arg9[%c1_163, %c1536_164, %c0_165] : memref<3x2048x32xbf16, #tpu.memory_space<vmem>>, vector<1x512x32xbf16>
    %286 = vector.shape_cast %285 : vector<1x512x32xbf16> to vector<512x32xbf16>
    %cst_166 = arith.constant dense<0.000000e+00> : vector<16x32xf32>
    %287 = tpu.matmul %284, %286, %cst_166 {dimension_numbers = #tpu.dot_dimension_numbers<[1], [0], [0], [1], [0, 0, 1, 1], [], []>} : vector<16x512xbf16>, vector<512x32xbf16>, vector<16x32xf32> -> vector<16x32xf32>
    %288 = arith.addf %248, %261 : vector<16x32xf32>
    %289 = arith.addf %274, %287 : vector<16x32xf32>
    %290 = arith.addf %288, %289 : vector<16x32xf32>
    %c1_167 = arith.constant 1 : index
    %c0_168 = arith.constant 0 : index
    %c0_169 = arith.constant 0 : index
    %291 = vector.load %arg10[%c1_167, %c0_168, %c0_169] : memref<3x1x32xf32, #tpu.memory_space<vmem>>, vector<1x1x32xf32>
    %292 = vector.shape_cast %291 : vector<1x1x32xf32> to vector<1x32xf32>
    %293 = vector.broadcast %292 : vector<1x32xf32> to vector<16x32xf32>
    %294 = arith.addf %290, %293 : vector<16x32xf32>
    %295 = arith.addf %234, %294 : vector<16x32xf32>
    %c1_170 = arith.constant 1 : index
    %c0_171 = arith.constant 0 : index
    %c0_172 = arith.constant 0 : index
    %296 = vector.load %arg13[%c1_170, %c0_171, %c0_172] : memref<3x1x32xf32, #tpu.memory_space<vmem>>, vector<1x1x32xf32>
    %297 = vector.shape_cast %296 : vector<1x1x32xf32> to vector<1x32xf32>
    %c1_173 = arith.constant 1 : index
    %c0_174 = arith.constant 0 : index
    %c0_175 = arith.constant 0 : index
    %298 = vector.load %arg14[%c1_173, %c0_174, %c0_175] : memref<3x1x32xf32, #tpu.memory_space<vmem>>, vector<1x1x32xf32>
    %299 = vector.shape_cast %298 : vector<1x1x32xf32> to vector<1x32xf32>
    %cst_176 = arith.constant dense<0.000000e+00> : vector<16xf32>
    %300 = vector.multi_reduction <add>, %295, %cst_176 [1] : vector<16x32xf32> to vector<16xf32>
    %301 = vector.shape_cast %300 : vector<16xf32> to vector<16x1xf32>
    %cst_177 = arith.constant 3.200000e+01 : f32
    %302 = vector.broadcast %cst_177 : f32 to vector<16x1xf32>
    %303 = arith.divf %301, %302 : vector<16x1xf32>
    %304 = vector.broadcast %303 : vector<16x1xf32> to vector<16x32xf32>
    %305 = arith.subf %295, %304 : vector<16x32xf32>
    %306 = arith.mulf %305, %305 : vector<16x32xf32>
    %cst_178 = arith.constant dense<0.000000e+00> : vector<16xf32>
    %307 = vector.multi_reduction <add>, %306, %cst_178 [1] : vector<16x32xf32> to vector<16xf32>
    %308 = vector.shape_cast %307 : vector<16xf32> to vector<16x1xf32>
    %cst_179 = arith.constant 3.200000e+01 : f32
    %309 = vector.broadcast %cst_179 : f32 to vector<16x1xf32>
    %310 = arith.divf %308, %309 : vector<16x1xf32>
    %cst_180 = arith.constant 9.99999974E-6 : f32
    %311 = vector.broadcast %cst_180 : f32 to vector<16x1xf32>
    %312 = arith.addf %310, %311 : vector<16x1xf32>
    %313 = math.rsqrt %312 : vector<16x1xf32>
    %314 = vector.broadcast %313 : vector<16x1xf32> to vector<16x32xf32>
    %315 = arith.mulf %305, %314 : vector<16x32xf32>
    %316 = vector.broadcast %297 : vector<1x32xf32> to vector<16x32xf32>
    %317 = arith.mulf %315, %316 : vector<16x32xf32>
    %318 = vector.broadcast %299 : vector<1x32xf32> to vector<16x32xf32>
    %319 = arith.addf %317, %318 : vector<16x32xf32>
    %320 = arith.truncf %319 : vector<16x32xf32> to vector<16x32xbf16>
    %c2 = arith.constant 2 : index
    %c0_181 = arith.constant 0 : index
    %c0_182 = arith.constant 0 : index
    %321 = vector.load %arg3[%c2, %c0_181, %c0_182] : memref<3x32x96xbf16, #tpu.memory_space<vmem>>, vector<1x32x96xbf16>
    %322 = vector.shape_cast %321 : vector<1x32x96xbf16> to vector<32x96xbf16>
    %cst_183 = arith.constant dense<0.000000e+00> : vector<16x96xf32>
    %323 = tpu.matmul %320, %322, %cst_183 {dimension_numbers = #tpu.dot_dimension_numbers<[1], [0], [0], [1], [0, 0, 1, 1], [], []>} : vector<16x32xbf16>, vector<32x96xbf16>, vector<16x96xf32> -> vector<16x96xf32>
    %c2_184 = arith.constant 2 : index
    %c0_185 = arith.constant 0 : index
    %c0_186 = arith.constant 0 : index
    %324 = vector.load %arg4[%c2_184, %c0_185, %c0_186] : memref<3x1x96xf32, #tpu.memory_space<vmem>>, vector<1x1x96xf32>
    %325 = vector.shape_cast %324 : vector<1x1x96xf32> to vector<1x96xf32>
    %326 = vector.broadcast %325 : vector<1x96xf32> to vector<16x96xf32>
    %327 = arith.addf %323, %326 : vector<16x96xf32>
    %328 = vector.extract_strided_slice %327 {offsets = [0, 0], sizes = [16, 32], strides = [1, 1]} : vector<16x96xf32> to vector<16x32xf32>
    %cst_187 = arith.constant 0.176776692 : f32
    %329 = vector.broadcast %cst_187 : f32 to vector<16x32xf32>
    %330 = arith.mulf %328, %329 : vector<16x32xf32>
    %331 = vector.extract_strided_slice %327 {offsets = [0, 32], sizes = [16, 32], strides = [1, 1]} : vector<16x96xf32> to vector<16x32xf32>
    %332 = vector.extract_strided_slice %327 {offsets = [0, 64], sizes = [16, 32], strides = [1, 1]} : vector<16x96xf32> to vector<16x32xf32>
    %333 = arith.mulf %330, %331 : vector<16x32xf32>
    %cst_188 = arith.constant dense<0.000000e+00> : vector<16xf32>
    %334 = vector.multi_reduction <add>, %333, %cst_188 [1] : vector<16x32xf32> to vector<16xf32>
    %335 = vector.shape_cast %334 : vector<16xf32> to vector<16x1xf32>
    %336 = vector.extract_strided_slice %331 {offsets = [8, 0], sizes = [8, 32], strides = [1, 1]} : vector<16x32xf32> to vector<8x32xf32>
    %337 = vector.extract_strided_slice %331 {offsets = [0, 0], sizes = [8, 32], strides = [1, 1]} : vector<16x32xf32> to vector<8x32xf32>
    %338 = tpu.concatenate %336, %337 in 0 : vector<8x32xf32>, vector<8x32xf32> -> vector<16x32xf32>
    %339 = vector.extract_strided_slice %332 {offsets = [8, 0], sizes = [8, 32], strides = [1, 1]} : vector<16x32xf32> to vector<8x32xf32>
    %340 = vector.extract_strided_slice %332 {offsets = [0, 0], sizes = [8, 32], strides = [1, 1]} : vector<16x32xf32> to vector<8x32xf32>
    %341 = tpu.concatenate %339, %340 in 0 : vector<8x32xf32>, vector<8x32xf32> -> vector<16x32xf32>
    %342 = arith.mulf %330, %338 : vector<16x32xf32>
    %cst_189 = arith.constant dense<0.000000e+00> : vector<16xf32>
    %343 = vector.multi_reduction <add>, %342, %cst_189 [1] : vector<16x32xf32> to vector<16xf32>
    %344 = vector.shape_cast %343 : vector<16xf32> to vector<16x1xf32>
    %345 = arith.maximumf %335, %344 : vector<16x1xf32>
    %346 = arith.subf %335, %345 : vector<16x1xf32>
    %347 = math.exp %346 : vector<16x1xf32>
    %348 = arith.subf %344, %345 : vector<16x1xf32>
    %349 = math.exp %348 : vector<16x1xf32>
    %350 = arith.addf %347, %349 : vector<16x1xf32>
    %351 = tpu.reciprocal %350 {approx = true} : vector<16x1xf32> -> vector<16x1xf32>
    %352 = vector.broadcast %347 : vector<16x1xf32> to vector<16x32xf32>
    %353 = arith.mulf %352, %332 : vector<16x32xf32>
    %354 = vector.broadcast %349 : vector<16x1xf32> to vector<16x32xf32>
    %355 = arith.mulf %354, %341 : vector<16x32xf32>
    %356 = arith.addf %353, %355 : vector<16x32xf32>
    %357 = vector.broadcast %351 : vector<16x1xf32> to vector<16x32xf32>
    %358 = arith.mulf %356, %357 : vector<16x32xf32>
    %359 = arith.truncf %358 : vector<16x32xf32> to vector<16x32xbf16>
    %c2_190 = arith.constant 2 : index
    %c0_191 = arith.constant 0 : index
    %c0_192 = arith.constant 0 : index
    %360 = vector.load %arg5[%c2_190, %c0_191, %c0_192] : memref<3x32x32xbf16, #tpu.memory_space<vmem>>, vector<1x32x32xbf16>
    %361 = vector.shape_cast %360 : vector<1x32x32xbf16> to vector<32x32xbf16>
    %cst_193 = arith.constant dense<0.000000e+00> : vector<16x32xf32>
    %362 = tpu.matmul %359, %361, %cst_193 {dimension_numbers = #tpu.dot_dimension_numbers<[1], [0], [0], [1], [0, 0, 1, 1], [], []>} : vector<16x32xbf16>, vector<32x32xbf16>, vector<16x32xf32> -> vector<16x32xf32>
    %c2_194 = arith.constant 2 : index
    %c0_195 = arith.constant 0 : index
    %c0_196 = arith.constant 0 : index
    %363 = vector.load %arg6[%c2_194, %c0_195, %c0_196] : memref<3x1x32xf32, #tpu.memory_space<vmem>>, vector<1x1x32xf32>
    %364 = vector.shape_cast %363 : vector<1x1x32xf32> to vector<1x32xf32>
    %365 = vector.broadcast %364 : vector<1x32xf32> to vector<16x32xf32>
    %366 = arith.addf %362, %365 : vector<16x32xf32>
    %367 = arith.addf %319, %366 : vector<16x32xf32>
    %c2_197 = arith.constant 2 : index
    %c0_198 = arith.constant 0 : index
    %c0_199 = arith.constant 0 : index
    %368 = vector.load %arg11[%c2_197, %c0_198, %c0_199] : memref<3x1x32xf32, #tpu.memory_space<vmem>>, vector<1x1x32xf32>
    %369 = vector.shape_cast %368 : vector<1x1x32xf32> to vector<1x32xf32>
    %c2_200 = arith.constant 2 : index
    %c0_201 = arith.constant 0 : index
    %c0_202 = arith.constant 0 : index
    %370 = vector.load %arg12[%c2_200, %c0_201, %c0_202] : memref<3x1x32xf32, #tpu.memory_space<vmem>>, vector<1x1x32xf32>
    %371 = vector.shape_cast %370 : vector<1x1x32xf32> to vector<1x32xf32>
    %cst_203 = arith.constant dense<0.000000e+00> : vector<16xf32>
    %372 = vector.multi_reduction <add>, %367, %cst_203 [1] : vector<16x32xf32> to vector<16xf32>
    %373 = vector.shape_cast %372 : vector<16xf32> to vector<16x1xf32>
    %cst_204 = arith.constant 3.200000e+01 : f32
    %374 = vector.broadcast %cst_204 : f32 to vector<16x1xf32>
    %375 = arith.divf %373, %374 : vector<16x1xf32>
    %376 = vector.broadcast %375 : vector<16x1xf32> to vector<16x32xf32>
    %377 = arith.subf %367, %376 : vector<16x32xf32>
    %378 = arith.mulf %377, %377 : vector<16x32xf32>
    %cst_205 = arith.constant dense<0.000000e+00> : vector<16xf32>
    %379 = vector.multi_reduction <add>, %378, %cst_205 [1] : vector<16x32xf32> to vector<16xf32>
    %380 = vector.shape_cast %379 : vector<16xf32> to vector<16x1xf32>
    %cst_206 = arith.constant 3.200000e+01 : f32
    %381 = vector.broadcast %cst_206 : f32 to vector<16x1xf32>
    %382 = arith.divf %380, %381 : vector<16x1xf32>
    %cst_207 = arith.constant 9.99999974E-6 : f32
    %383 = vector.broadcast %cst_207 : f32 to vector<16x1xf32>
    %384 = arith.addf %382, %383 : vector<16x1xf32>
    %385 = math.rsqrt %384 : vector<16x1xf32>
    %386 = vector.broadcast %385 : vector<16x1xf32> to vector<16x32xf32>
    %387 = arith.mulf %377, %386 : vector<16x32xf32>
    %388 = vector.broadcast %369 : vector<1x32xf32> to vector<16x32xf32>
    %389 = arith.mulf %387, %388 : vector<16x32xf32>
    %390 = vector.broadcast %371 : vector<1x32xf32> to vector<16x32xf32>
    %391 = arith.addf %389, %390 : vector<16x32xf32>
    %392 = arith.truncf %391 : vector<16x32xf32> to vector<16x32xbf16>
    %c2_208 = arith.constant 2 : index
    %c0_209 = arith.constant 0 : index
    %c0_210 = arith.constant 0 : index
    %393 = vector.load %arg7[%c2_208, %c0_209, %c0_210] : memref<3x32x2048xbf16, #tpu.memory_space<vmem>>, vector<1x32x512xbf16>
    %394 = vector.shape_cast %393 : vector<1x32x512xbf16> to vector<32x512xbf16>
    %cst_211 = arith.constant dense<0.000000e+00> : vector<16x512xf32>
    %395 = tpu.matmul %392, %394, %cst_211 {dimension_numbers = #tpu.dot_dimension_numbers<[1], [0], [0], [1], [0, 0, 1, 1], [], []>} : vector<16x32xbf16>, vector<32x512xbf16>, vector<16x512xf32> -> vector<16x512xf32>
    %c2_212 = arith.constant 2 : index
    %c0_213 = arith.constant 0 : index
    %c0_214 = arith.constant 0 : index
    %396 = vector.load %arg8[%c2_212, %c0_213, %c0_214] : memref<3x1x2048xf32, #tpu.memory_space<vmem>>, vector<1x1x512xf32>
    %397 = vector.shape_cast %396 : vector<1x1x512xf32> to vector<1x512xf32>
    %398 = vector.broadcast %397 : vector<1x512xf32> to vector<16x512xf32>
    %399 = arith.addf %395, %398 : vector<16x512xf32>
    %cst_215 = arith.constant 0.000000e+00 : f32
    %400 = vector.broadcast %cst_215 : f32 to vector<16x512xf32>
    %401 = arith.maximumf %399, %400 : vector<16x512xf32>
    %402 = arith.truncf %401 : vector<16x512xf32> to vector<16x512xbf16>
    %c2_216 = arith.constant 2 : index
    %c0_217 = arith.constant 0 : index
    %c0_218 = arith.constant 0 : index
    %403 = vector.load %arg9[%c2_216, %c0_217, %c0_218] : memref<3x2048x32xbf16, #tpu.memory_space<vmem>>, vector<1x512x32xbf16>
    %404 = vector.shape_cast %403 : vector<1x512x32xbf16> to vector<512x32xbf16>
    %cst_219 = arith.constant dense<0.000000e+00> : vector<16x32xf32>
    %405 = tpu.matmul %402, %404, %cst_219 {dimension_numbers = #tpu.dot_dimension_numbers<[1], [0], [0], [1], [0, 0, 1, 1], [], []>} : vector<16x512xbf16>, vector<512x32xbf16>, vector<16x32xf32> -> vector<16x32xf32>
    %c2_220 = arith.constant 2 : index
    %c0_221 = arith.constant 0 : index
    %c512_222 = arith.constant 512 : index
    %406 = vector.load %arg7[%c2_220, %c0_221, %c512_222] : memref<3x32x2048xbf16, #tpu.memory_space<vmem>>, vector<1x32x512xbf16>
    %407 = vector.shape_cast %406 : vector<1x32x512xbf16> to vector<32x512xbf16>
    %cst_223 = arith.constant dense<0.000000e+00> : vector<16x512xf32>
    %408 = tpu.matmul %392, %407, %cst_223 {dimension_numbers = #tpu.dot_dimension_numbers<[1], [0], [0], [1], [0, 0, 1, 1], [], []>} : vector<16x32xbf16>, vector<32x512xbf16>, vector<16x512xf32> -> vector<16x512xf32>
    %c2_224 = arith.constant 2 : index
    %c0_225 = arith.constant 0 : index
    %c512_226 = arith.constant 512 : index
    %409 = vector.load %arg8[%c2_224, %c0_225, %c512_226] : memref<3x1x2048xf32, #tpu.memory_space<vmem>>, vector<1x1x512xf32>
    %410 = vector.shape_cast %409 : vector<1x1x512xf32> to vector<1x512xf32>
    %411 = vector.broadcast %410 : vector<1x512xf32> to vector<16x512xf32>
    %412 = arith.addf %408, %411 : vector<16x512xf32>
    %cst_227 = arith.constant 0.000000e+00 : f32
    %413 = vector.broadcast %cst_227 : f32 to vector<16x512xf32>
    %414 = arith.maximumf %412, %413 : vector<16x512xf32>
    %415 = arith.truncf %414 : vector<16x512xf32> to vector<16x512xbf16>
    %c2_228 = arith.constant 2 : index
    %c512_229 = arith.constant 512 : index
    %c0_230 = arith.constant 0 : index
    %416 = vector.load %arg9[%c2_228, %c512_229, %c0_230] : memref<3x2048x32xbf16, #tpu.memory_space<vmem>>, vector<1x512x32xbf16>
    %417 = vector.shape_cast %416 : vector<1x512x32xbf16> to vector<512x32xbf16>
    %cst_231 = arith.constant dense<0.000000e+00> : vector<16x32xf32>
    %418 = tpu.matmul %415, %417, %cst_231 {dimension_numbers = #tpu.dot_dimension_numbers<[1], [0], [0], [1], [0, 0, 1, 1], [], []>} : vector<16x512xbf16>, vector<512x32xbf16>, vector<16x32xf32> -> vector<16x32xf32>
    %c2_232 = arith.constant 2 : index
    %c0_233 = arith.constant 0 : index
    %c1024_234 = arith.constant 1024 : index
    %419 = vector.load %arg7[%c2_232, %c0_233, %c1024_234] : memref<3x32x2048xbf16, #tpu.memory_space<vmem>>, vector<1x32x512xbf16>
    %420 = vector.shape_cast %419 : vector<1x32x512xbf16> to vector<32x512xbf16>
    %cst_235 = arith.constant dense<0.000000e+00> : vector<16x512xf32>
    %421 = tpu.matmul %392, %420, %cst_235 {dimension_numbers = #tpu.dot_dimension_numbers<[1], [0], [0], [1], [0, 0, 1, 1], [], []>} : vector<16x32xbf16>, vector<32x512xbf16>, vector<16x512xf32> -> vector<16x512xf32>
    %c2_236 = arith.constant 2 : index
    %c0_237 = arith.constant 0 : index
    %c1024_238 = arith.constant 1024 : index
    %422 = vector.load %arg8[%c2_236, %c0_237, %c1024_238] : memref<3x1x2048xf32, #tpu.memory_space<vmem>>, vector<1x1x512xf32>
    %423 = vector.shape_cast %422 : vector<1x1x512xf32> to vector<1x512xf32>
    %424 = vector.broadcast %423 : vector<1x512xf32> to vector<16x512xf32>
    %425 = arith.addf %421, %424 : vector<16x512xf32>
    %cst_239 = arith.constant 0.000000e+00 : f32
    %426 = vector.broadcast %cst_239 : f32 to vector<16x512xf32>
    %427 = arith.maximumf %425, %426 : vector<16x512xf32>
    %428 = arith.truncf %427 : vector<16x512xf32> to vector<16x512xbf16>
    %c2_240 = arith.constant 2 : index
    %c1024_241 = arith.constant 1024 : index
    %c0_242 = arith.constant 0 : index
    %429 = vector.load %arg9[%c2_240, %c1024_241, %c0_242] : memref<3x2048x32xbf16, #tpu.memory_space<vmem>>, vector<1x512x32xbf16>
    %430 = vector.shape_cast %429 : vector<1x512x32xbf16> to vector<512x32xbf16>
    %cst_243 = arith.constant dense<0.000000e+00> : vector<16x32xf32>
    %431 = tpu.matmul %428, %430, %cst_243 {dimension_numbers = #tpu.dot_dimension_numbers<[1], [0], [0], [1], [0, 0, 1, 1], [], []>} : vector<16x512xbf16>, vector<512x32xbf16>, vector<16x32xf32> -> vector<16x32xf32>
    %c2_244 = arith.constant 2 : index
    %c0_245 = arith.constant 0 : index
    %c1536_246 = arith.constant 1536 : index
    %432 = vector.load %arg7[%c2_244, %c0_245, %c1536_246] : memref<3x32x2048xbf16, #tpu.memory_space<vmem>>, vector<1x32x512xbf16>
    %433 = vector.shape_cast %432 : vector<1x32x512xbf16> to vector<32x512xbf16>
    %cst_247 = arith.constant dense<0.000000e+00> : vector<16x512xf32>
    %434 = tpu.matmul %392, %433, %cst_247 {dimension_numbers = #tpu.dot_dimension_numbers<[1], [0], [0], [1], [0, 0, 1, 1], [], []>} : vector<16x32xbf16>, vector<32x512xbf16>, vector<16x512xf32> -> vector<16x512xf32>
    %c2_248 = arith.constant 2 : index
    %c0_249 = arith.constant 0 : index
    %c1536_250 = arith.constant 1536 : index
    %435 = vector.load %arg8[%c2_248, %c0_249, %c1536_250] : memref<3x1x2048xf32, #tpu.memory_space<vmem>>, vector<1x1x512xf32>
    %436 = vector.shape_cast %435 : vector<1x1x512xf32> to vector<1x512xf32>
    %437 = vector.broadcast %436 : vector<1x512xf32> to vector<16x512xf32>
    %438 = arith.addf %434, %437 : vector<16x512xf32>
    %cst_251 = arith.constant 0.000000e+00 : f32
    %439 = vector.broadcast %cst_251 : f32 to vector<16x512xf32>
    %440 = arith.maximumf %438, %439 : vector<16x512xf32>
    %441 = arith.truncf %440 : vector<16x512xf32> to vector<16x512xbf16>
    %c2_252 = arith.constant 2 : index
    %c1536_253 = arith.constant 1536 : index
    %c0_254 = arith.constant 0 : index
    %442 = vector.load %arg9[%c2_252, %c1536_253, %c0_254] : memref<3x2048x32xbf16, #tpu.memory_space<vmem>>, vector<1x512x32xbf16>
    %443 = vector.shape_cast %442 : vector<1x512x32xbf16> to vector<512x32xbf16>
    %cst_255 = arith.constant dense<0.000000e+00> : vector<16x32xf32>
    %444 = tpu.matmul %441, %443, %cst_255 {dimension_numbers = #tpu.dot_dimension_numbers<[1], [0], [0], [1], [0, 0, 1, 1], [], []>} : vector<16x512xbf16>, vector<512x32xbf16>, vector<16x32xf32> -> vector<16x32xf32>
    %445 = arith.addf %405, %418 : vector<16x32xf32>
    %446 = arith.addf %431, %444 : vector<16x32xf32>
    %447 = arith.addf %445, %446 : vector<16x32xf32>
    %c2_256 = arith.constant 2 : index
    %c0_257 = arith.constant 0 : index
    %c0_258 = arith.constant 0 : index
    %448 = vector.load %arg10[%c2_256, %c0_257, %c0_258] : memref<3x1x32xf32, #tpu.memory_space<vmem>>, vector<1x1x32xf32>
    %449 = vector.shape_cast %448 : vector<1x1x32xf32> to vector<1x32xf32>
    %450 = vector.broadcast %449 : vector<1x32xf32> to vector<16x32xf32>
    %451 = arith.addf %447, %450 : vector<16x32xf32>
    %452 = arith.addf %391, %451 : vector<16x32xf32>
    %c2_259 = arith.constant 2 : index
    %c0_260 = arith.constant 0 : index
    %c0_261 = arith.constant 0 : index
    %453 = vector.load %arg13[%c2_259, %c0_260, %c0_261] : memref<3x1x32xf32, #tpu.memory_space<vmem>>, vector<1x1x32xf32>
    %454 = vector.shape_cast %453 : vector<1x1x32xf32> to vector<1x32xf32>
    %c2_262 = arith.constant 2 : index
    %c0_263 = arith.constant 0 : index
    %c0_264 = arith.constant 0 : index
    %455 = vector.load %arg14[%c2_262, %c0_263, %c0_264] : memref<3x1x32xf32, #tpu.memory_space<vmem>>, vector<1x1x32xf32>
    %456 = vector.shape_cast %455 : vector<1x1x32xf32> to vector<1x32xf32>
    %cst_265 = arith.constant dense<0.000000e+00> : vector<16xf32>
    %457 = vector.multi_reduction <add>, %452, %cst_265 [1] : vector<16x32xf32> to vector<16xf32>
    %458 = vector.shape_cast %457 : vector<16xf32> to vector<16x1xf32>
    %cst_266 = arith.constant 3.200000e+01 : f32
    %459 = vector.broadcast %cst_266 : f32 to vector<16x1xf32>
    %460 = arith.divf %458, %459 : vector<16x1xf32>
    %461 = vector.broadcast %460 : vector<16x1xf32> to vector<16x32xf32>
    %462 = arith.subf %452, %461 : vector<16x32xf32>
    %463 = arith.mulf %462, %462 : vector<16x32xf32>
    %cst_267 = arith.constant dense<0.000000e+00> : vector<16xf32>
    %464 = vector.multi_reduction <add>, %463, %cst_267 [1] : vector<16x32xf32> to vector<16xf32>
    %465 = vector.shape_cast %464 : vector<16xf32> to vector<16x1xf32>
    %cst_268 = arith.constant 3.200000e+01 : f32
    %466 = vector.broadcast %cst_268 : f32 to vector<16x1xf32>
    %467 = arith.divf %465, %466 : vector<16x1xf32>
    %cst_269 = arith.constant 9.99999974E-6 : f32
    %468 = vector.broadcast %cst_269 : f32 to vector<16x1xf32>
    %469 = arith.addf %467, %468 : vector<16x1xf32>
    %470 = math.rsqrt %469 : vector<16x1xf32>
    %471 = vector.broadcast %470 : vector<16x1xf32> to vector<16x32xf32>
    %472 = arith.mulf %462, %471 : vector<16x32xf32>
    %473 = vector.broadcast %454 : vector<1x32xf32> to vector<16x32xf32>
    %474 = arith.mulf %472, %473 : vector<16x32xf32>
    %475 = vector.broadcast %456 : vector<1x32xf32> to vector<16x32xf32>
    %476 = arith.addf %474, %475 : vector<16x32xf32>
    %477 = arith.truncf %476 : vector<16x32xf32> to vector<16x32xbf16>
    %c0_270 = arith.constant 0 : index
    %c0_271 = arith.constant 0 : index
    %478 = vector.load %arg15[%c0_270, %c0_271] : memref<32x256xbf16, #tpu.memory_space<vmem>>, vector<32x256xbf16>
    %cst_272 = arith.constant dense<0.000000e+00> : vector<16x256xf32>
    %479 = tpu.matmul %477, %478, %cst_272 {dimension_numbers = #tpu.dot_dimension_numbers<[1], [0], [0], [1], [0, 0, 1, 1], [], []>} : vector<16x32xbf16>, vector<32x256xbf16>, vector<16x256xf32> -> vector<16x256xf32>
    %c0_273 = arith.constant 0 : index
    %c0_274 = arith.constant 0 : index
    %480 = vector.load %arg16[%c0_273, %c0_274] : memref<16x256xf32, #tpu.memory_space<vmem>>, vector<16x256xf32>
    %481 = arith.mulf %479, %480 : vector<16x256xf32>
    %482 = arith.truncf %481 : vector<16x256xf32> to vector<16x256xbf16>
    %c0_275 = arith.constant 0 : index
    %c0_276 = arith.constant 0 : index
    %483 = vector.load %arg17[%c0_275, %c0_276] : memref<256x32xbf16, #tpu.memory_space<vmem>>, vector<256x32xbf16>
    %cst_277 = arith.constant dense<0.000000e+00> : vector<16x32xf32>
    %484 = tpu.matmul %482, %483, %cst_277 {dimension_numbers = #tpu.dot_dimension_numbers<[1], [0], [0], [1], [0, 0, 1, 1], [], []>} : vector<16x256xbf16>, vector<256x32xbf16>, vector<16x32xf32> -> vector<16x32xf32>
    %485 = vector.extract_strided_slice %484 {offsets = [0, 0], sizes = [8, 32], strides = [1, 1]} : vector<16x32xf32> to vector<8x32xf32>
    %cst_278 = arith.constant dense<0.000000e+00> : vector<32xf32>
    %486 = vector.multi_reduction <add>, %485, %cst_278 [0] : vector<8x32xf32> to vector<32xf32>
    %487 = vector.shape_cast %486 : vector<32xf32> to vector<1x32xf32>
    %488 = vector.extract_strided_slice %484 {offsets = [8, 0], sizes = [8, 32], strides = [1, 1]} : vector<16x32xf32> to vector<8x32xf32>
    %cst_279 = arith.constant dense<0.000000e+00> : vector<32xf32>
    %489 = vector.multi_reduction <add>, %488, %cst_279 [0] : vector<8x32xf32> to vector<32xf32>
    %490 = vector.shape_cast %489 : vector<32xf32> to vector<1x32xf32>
    %491 = tpu.concatenate %487, %490 in 0 : vector<1x32xf32>, vector<1x32xf32> -> vector<2x32xf32>
    %c0_280 = arith.constant 0 : index
    %c0_281 = arith.constant 0 : index
    %492 = vector.load %arg18[%c0_280, %c0_281] : memref<1x32xf32, #tpu.memory_space<vmem>>, vector<1x32xf32>
    %493 = vector.broadcast %492 : vector<1x32xf32> to vector<2x32xf32>
    %494 = arith.addf %491, %493 : vector<2x32xf32>
    %cst_282 = arith.constant 0.000000e+00 : f32
    %495 = vector.broadcast %cst_282 : f32 to vector<2x32xf32>
    %496 = arith.maximumf %494, %495 : vector<2x32xf32>
    %497 = arith.truncf %496 : vector<2x32xf32> to vector<2x32xbf16>
    %c0_283 = arith.constant 0 : index
    %c0_284 = arith.constant 0 : index
    %498 = vector.load %arg19[%c0_283, %c0_284] : memref<32x4xbf16, #tpu.memory_space<vmem>>, vector<32x4xbf16>
    %cst_285 = arith.constant dense<0.000000e+00> : vector<2x4xf32>
    %499 = tpu.matmul %497, %498, %cst_285 {dimension_numbers = #tpu.dot_dimension_numbers<[1], [0], [0], [1], [0, 0, 1, 1], [], []>} : vector<2x32xbf16>, vector<32x4xbf16>, vector<2x4xf32> -> vector<2x4xf32>
    %c0_286 = arith.constant 0 : index
    %c0_287 = arith.constant 0 : index
    %500 = vector.load %arg20[%c0_286, %c0_287] : memref<1x4xf32, #tpu.memory_space<vmem>>, vector<1x4xf32>
    %501 = vector.broadcast %500 : vector<1x4xf32> to vector<2x4xf32>
    %502 = arith.addf %499, %501 : vector<2x4xf32>
    %c0_288 = arith.constant 0 : index
    %c0_289 = arith.constant 0 : index
    %503 = vector.load %arg21[%c0_288, %c0_289] : memref<2x4xf32, #tpu.memory_space<vmem>>, vector<2x4xf32>
    tpu.vector_store %arg21[%c0_288, %c0_289], %502 {strides = array<i32>} : memref<2x4xf32, #tpu.memory_space<vmem>>, vector<2x4xf32>,
    return
  }
}

</mosaic_0001>

<bundles_post_ra>
// kernel: eq.8
= control target key start
LH: loop header
LB: loop body
LE: loop exit
PB: predicated region body
PF: predicated region fallthrough
CT: control target
= control target key end

     0   :  { %vm8_vm0 = vcmask 64512   ;;  %vm14_vm1 = vcmask 130112   ;;  %s42_s0 = inlined_call_operand.vmem [shape: s32[2,8], index: 0, kind: input, shape index: {}]   ;;  %s43_s1 = inlined_call_operand.vmem [shape: s32[16], index: 1, kind: output, shape index: {}]  }
   0x1   :  { %v5_v0 = vld [vmem:[%s42_s0] sm:$0x3]  ;;  %s25_s0 = smov 8  }
   0x2   :  { %6 = vst [vmem:[#allocation1] sm:$0x3] %v5_v0 }
   0x9   :  { %v11_v1 = vld [vmem:[#allocation1 + $0x1] sm:$0x1]   ;;  %v7_v2 = vld [vmem:[#allocation1] sm:$0x1]  }
   0xa   :  { %12 = vrot.lane.b32.xlu0 %v11_v1, %s25_s0  ;;  %9 = vst.msk [vmem:[#allocation0] sm:$0x1] %vm8_vm0, %v7_v2  }
  0x7c   :  { %v13_v3 = vpop.permute.xlu0 %12  }
  0x7d   :  { %15 = vst.msk [vmem:[#allocation0] sm:$0x1] %vm14_vm1, %v13_v3  }
  0x84   :  { %v20_v4 = vld [vmem:[#allocation0] sm:$0x1] }
  0x85   :  { %23 = vst [vmem:[%s43_s1] sm:$0x1] %v20_v4 }

// kernel: eq.11
= control target key start
LH: loop header
LB: loop body
LE: loop exit
PB: predicated region body
PF: predicated region fallthrough
CT: control target
= control target key end

     0   :  { %s7_s6 = smov 3  ;;  %s14_s9 = smov 3  ;;  %vm4_vm0 = vcmask 261120   ;;  %vm11_vm1 = vcmask 1048320   ;;  %vm18_vm2 = vcmask 785920   ;;  %vm25_vm3 = vcmask 523520   ;;  %s69_s0 = inlined_call_operand.vmem [shape: s32[8,32], index: 0, kind: input, shape index: {}]   ;;  %s70_s1 = inlined_call_operand.vmem [shape: s32[256], index: 1, kind: output, shape index: {}]  }
   0x1   :  { %v35_v0 = vld [vmem:[%s69_s0 + $0x3] ss:$4 sm:%s7_s6]   ;;  %s41_s10 = smov 96   ;;  %s21_s11 = smov 3  ;;  %v36_v1 = vld [vmem:[%s69_s0 + $0x2] ss:$4 sm:%s14_s9]  }
   0x2   :  { %9 = vrot.lane.b32.xlu0 %v35_v0, %s41_s10  ;;  %v37_v2 = vld [vmem:[%s69_s0 + $0x1] ss:$4 sm:%s21_s11]   ;;  %s2_s16 = smov 3  ;;  %s42_s17 = smov 32  }
   0x3   :  { %23 = vrot.lane.b32.xlu1 %v37_v2, %s42_s17  ;;  %v3_v3 = vld [vmem:[%s69_s0] ss:$4 sm:%s2_s16]   ;;  %s43_s0 = smov 64  }
   0x4   :  { %5 = vst.msk [vmem:[#allocation0] sm:$0x3] %vm4_vm0, %v3_v3  }
   0x6   :  { %16 = vrot.lane.b32.xlu0 %v36_v1, %s43_s0 }
  0x74   :  { %v10_v4 = vpop.permute.xlu0 %9  }
  0x75   :  { %12 = vst.msk [vmem:[#allocation0] sm:$0x3] %vm11_vm1, %v10_v4   ;;  %v24_v5 = vpop.permute.xlu1 %23  }
  0x78   :  { %v17_v6 = vpop.permute.xlu0 %16  }
  0x79   :  { %19 = vst.msk [vmem:[#allocation0] sm:$0x3] %vm18_vm2, %v17_v6  }
  0x7a   :  { %26 = vst.msk [vmem:[#allocation0] sm:$0x3] %vm25_vm3, %v24_v5  }
  0x81   :  { %v31_v7 = vld [vmem:[#allocation0] sm:$0x3] }
  0x82   :  { %34 = vst [vmem:[%s70_s1] sm:$0x3] %v31_v7 }

// kernel: transformer_forward.1
= control target key start
LH: loop header
LB: loop body
LE: loop exit
PB: predicated region body
PF: predicated region fallthrough
CT: control target
= control target key end

     0   :  { %s12061_s0 = inlined_call_operand.vmem [shape: f32[16,16], index: 0, kind: input, shape index: {}]   ;;  %s12062_s1 = inlined_call_operand.vmem [shape: f32[16,32], index: 1, kind: input, shape index: {}]   ;;  %s12063_s2 = inlined_call_operand.vmem [shape: bf16[16,32], index: 2, kind: input, shape index: {}]   ;;  %s12064_s3 = inlined_call_operand.vmem [shape: bf16[3,32,96], index: 3, kind: input, shape index: {}]   ;;  %s12065_s4 = inlined_call_operand.vmem [shape: f32[3,1,96], index: 4, kind: input, shape index: {}]   ;;  %s12066_s5 = inlined_call_operand.vmem [shape: bf16[3,32,32], index: 5, kind: input, shape index: {}]   ;;  %s12067_s6 = inlined_call_operand.vmem [shape: f32[3,1,32], index: 6, kind: input, shape index: {}]   ;;  %s12068_s7 = inlined_call_operand.vmem [shape: bf16[3,32,2048], index: 7, kind: input, shape index: {}]   ;;  %s12069_s8 = inlined_call_operand.vmem [shape: f32[3,1,2048], index: 8, kind: input, shape index: {}]   ;;  %s12070_s9 = inlined_call_operand.vmem [shape: bf16[3,2048,32], index: 9, kind: input, shape index: {}]   ;;  %s12071_s10 = inlined_call_operand.vmem [shape: f32[3,1,32], index: 10, kind: input, shape index: {}]   ;;  %s12072_s11 = inlined_call_operand.vmem [shape: f32[3,1,32], index: 11, kind: input, shape index: {}]   ;;  %s12073_s12 = inlined_call_operand.vmem [shape: f32[3,1,32], index: 12, kind: input, shape index: {}]   ;;  %s12074_s13 = inlined_call_operand.vmem [shape: f32[3,1,32], index: 13, kind: input, shape index: {}]   ;;  %s12075_s14 = inlined_call_operand.vmem [shape: f32[3,1,32], index: 14, kind: input, shape index: {}]   ;;  %s12076_s15 = inlined_call_operand.vmem [shape: bf16[32,256], index: 15, kind: input, shape index: {}]   ;;  %s12077_s16 = inlined_call_operand.vmem [shape: f32[16,256], index: 16, kind: input, shape index: {}]   ;;  %s12078_s17 = inlined_call_operand.vmem [shape: bf16[256,32], index: 17, kind: input, shape index: {}]   ;;  %s12079_s18 = inlined_call_operand.vmem [shape: f32[1,32], index: 18, kind: input, shape index: {}]   ;;  %s12080_s19 = inlined_call_operand.vmem [shape: bf16[32,4], index: 19, kind: input, shape index: {}]   ;;  %s12081_s20 = inlined_call_operand.vmem [shape: f32[1,4], index: 20, kind: input, shape index: {}]   ;;  %s12082_s21 = inlined_call_operand.hbm [shape: f32[2,4], index: 21, kind: output, shape index: {}]  }
   0x1   :  { %12088 = sst [smem:[#allocation5_spill]] %s12061_s0 }
   0x2   :  { %12089 = sst [smem:[#allocation6_spill]] %s12062_s1 }
   0x3   :  { %12090 = sst [smem:[#allocation7_spill]] %s12063_s2 }
   0x4   :  { %12091 = sst [smem:[#allocation8_spill]] %s12064_s3 }
   0x5   :  { %12092 = sst [smem:[#allocation9_spill]] %s12065_s4 }
   0x6   :  { %12093 = sst [smem:[#allocation10_spill]] %s12066_s5 }
   0x7   :  { %s12094_s26 = sld [smem:[#allocation7_spill]]  ;;  %v9807_v1 = vmov 0.0   ;;  %vm83_vm0 = vcmask 130048   ;;  %vm9808_vm1 = vmmov 0   ;;  %vm152_vm2 = vcmask 261120  }
   0x8   :  { %9236 = vmatprep.subr.bf16.mxu0 %v9807_v1  ;;  %s12095_s28 = sld [smem:[#allocation5_spill]]  ;;  %9242 = vmatprep.subr.bf16.mxu1 %v9807_v1 }
   0x9   :  { %9238 = vmatprep.mubr.msk.bf16.mxu0 %vm9808_vm1, %v9807_v1  ;;  %9246 = vmatprep.mubr.msk.bf16.mxu1 %vm9808_vm1, %v9807_v1  ;;  %s12096_s5 = sld [smem:[#allocation8_spill]] }
   0xa   :  { %s12097_s2 = sld [smem:[#allocation6_spill]] }
   0xd   :  { %v9304_v0 = vld [vmem:[%s12094_s26] sm:$0xff]  }
   0xe   :  { %v70_v2 = vld [vmem:[%s12095_s28] sm:$0xff]  ;;  %v71_v3 = vld [vmem:[%s12095_s28 + $0x8] sm:$0xff]  ;;  %9237 = vmatpush3.bf16.msra.mxu0 %v9304_v0 }
   0xf   :  { %v72_v4 = vpack.c.bf16 %v71_v3, %v70_v2  ;;  %v9305_v5 = vld [vmem:[%s12096_s5 + $0x8] sm:$0xff]   ;;  %v9306_v6 = vld [vmem:[%s12096_s5] sm:$0xff]  }
  0x10   :  { %9243 = vmatpush3.bf16.msra.mxu1 %v9305_v5  ;;  %v75_v7 = vld [vmem:[%s12097_s2] sm:$0xff]  ;;  %v76_v9 = vld [vmem:[%s12097_s2 + $0x8] sm:$0xff] }
  0x11   :  { %9239 = vmatmul.mubr.msk.bf16.vlgmr.msra.gmra.mxu0 %vm83_vm0, %v72_v4  ;;  %9244 = vmatprep.subr.bf16.mxu1 %v9807_v1 }
  0x14   :  { %9245 = vmatpush3.bf16.msra.mxu1 %v9306_v6 }
  0x15   :  { %9250 = vmatprep.subr.bf16.mxu1 %v9807_v1 }
  0xd1   :  { %v121_v8 = vpop.f32.mrf.mxu0 }
  0xd2   :  { %v9952_v12 = vadd.f32 %v121_v8, %v75_v7 }
  0xd3   :  { %v9240_v10 = vpop.f32.mrf.mxu0 }
  0xd5   :  { %v124_v11 = vpop.f32.mrf.mxu0 }
  0xd6   :  { %v9954_v13 = vadd.f32 %v124_v11, %v76_v9 }
  0xd7   :  { %v9241_v14 = vpop.f32.mrf.mxu0 }
  0xd8   :  { %v128_v15 = vpack.c.bf16 %v9954_v13, %v9952_v12 }
  0xda   :  { %9247 = vmatmul.mubr.msk.bf16.vlgmr.msra.gmra.mxu1 %vm152_vm2, %v128_v15 }
  0xdb   :  { %9254 = vmatprep.mubr.msk.bf16.mxu1 %vm9808_vm1, %v9807_v1 }
  0xdc   :  { %26 = vsyncpa [#allocation3], 0  ;;  %s12098_s28 = sld [smem:[#allocation9_spill]]  ;;  %s9809_s29 = smov 96   ;;  %v7484_v6 = vld [vmem:[%s12067_s6] ss:$0 sm:$0xff] }
  0xdd   :  { %s12099_s30 = sld [smem:[#allocation10_spill]]  ;;  %s9810_s1 = smov 64   ;;  %vm7384_vm3 = vcmask 1040384   ;;  %vm7462_vm4 = vcmask 25600  }
  0xde   :  { %s9812_s22 = smov [#allocation2]  }
  0xe2   :  { %v7480_v16 = vld [vmem:[%s12098_s28] ss:$0 sm:$0xff] }
  0xe3   :  { %v9307_v35 = vld [vmem:[%s12099_s30 + $0x8] sm:$0xff]   ;;  %v9308_v36 = vld [vmem:[%s12099_s30] sm:$0xff]  }
  0xe4   :  { %9251 = vmatpush3.bf16.msra.mxu1 %v9307_v35  ;;  %v368_v35 = vld [vmem:[%s12068_s7] sm:$0xff] }
  0xe5   :  { %9252 = vmatprep.subr.bf16.mxu1 %v9807_v1 }
  0xe8   :  { %9253 = vmatpush3.bf16.msra.mxu1 %v9308_v36  ;;  %v370_v36 = vld [vmem:[%s12068_s7 + $0x40] sm:$0xff] }
 0x19a   :  { %v190_v17 = vpop.f32.mrf.mxu1 }
 0x19b   :  { %v191_v18 = vadd.f32 %v7480_v16, %v190_v17 }
 0x19c   :  { %v9248_v19 = vpop.f32.mrf.mxu1 }
 0x19d   :  { %201 = vrot.lane.b32.xlu0 %v191_v18, %s9809_s29  ;;  %v197_v23 = vmul.f32 0.17677669, %v191_v18 }
 0x19e   :  { %v193_v20 = vpop.f32.mrf.mxu1 }
 0x19f   :  { %v194_v21 = vadd.f32 %v7480_v16, %v193_v20 }
 0x1a0   :  { %v9249_v22 = vpop.f32.mrf.mxu1 }
 0x1a1   :  { %203 = vrot.lane.b32.xlu0 %v194_v21, %s9809_s29  ;;  %v198_v26 = vmul.f32 0.17677669, %v194_v21 }
 0x20f   :  { %v202_v24 = vpop.permute.xlu0 %201 }
 0x210   :  { %v207_v25 = vmul.f32 %v202_v24, %v197_v23  ;;  %v216_v31 = vmul.f32 %v202_v24, %v198_v26 }
 0x212   :  { %v209_v27 = vsel %vm152_vm2, %v207_v25, 0.0  ;;  %v220_v34 = vsel %vm152_vm2, %v216_v31, 0.0  ;;  %v375_v31 = vld [vmem:[%s12068_s7 + $0xc8] sm:$0xff] }
 0x213   :  { %210 = vadd.xlane.f32.xlu1 %v209_v27  ;;  %v204_v28 = vpop.permute.xlu0 %203 }
 0x214   :  { %v208_v29 = vmul.f32 %v204_v28, %v198_v26  ;;  %v215_v30 = vmul.f32 %v204_v28, %v197_v23  ;;  %v374_v28 = vld [vmem:[%s12068_s7 + $0xc0] sm:$0xff] }
 0x216   :  { %v217_v32 = vsel %vm152_vm2, %v215_v30, 0.0  ;;  %v212_v33 = vsel %vm152_vm2, %v208_v29, 0.0  ;;  %v373_v29 = vld [vmem:[%s12068_s7 + $0x88] sm:$0xff] }
 0x217   :  { %218 = vadd.xlane.f32.xlu0 %v217_v32  ;;  %213 = vadd.xlane.f32.xlu1 %v212_v33  ;;  %v7496_v33 = vcombine.low %v373_v29, %v375_v31 }
 0x21b   :  { %221 = vadd.xlane.f32.xlu1 %v220_v34  ;;  %v7497_v34 = vcombine.high %v373_v29, %v375_v31  ;;  %v9324_v29 = vld [vmem:[%s12070_s9 + $0x1a0] sm:$0xff]   ;;  %v9327_v31 = vld [vmem:[%s12070_s9 + $0x1d8] sm:$0xff]  }
 0x21d   :  { %496 = vmatprep.subr.bf16.mxu0 %v7497_v34  ;;  %v9329_v34 = vld [vmem:[%s12070_s9 + $0x150] sm:$0xff]  }
 0x21e   :  { %497 = vmatpush1.bf16.msra.mxu0 %v7496_v33  ;;  %v9328_v33 = vld [vmem:[%s12070_s9 + $0x198] sm:$0xff]  }
 0x29c   :  { %v211_v37 = vpop.xlane.xlu1 %210 }
 0x2a0   :  { %v219_v38 = vpop.xlane.xlu0 %218  ;;  %v214_v39 = vpop.xlane.xlu1 %213 }
 0x2a1   :  { %v223_v40 = vmax.f32 %v211_v37, %v219_v38 }
 0x2a3   :  { %v225_v41 = vsub.f32 %v211_v37, %v223_v40  ;;  %v231_v42 = vsub.f32 %v219_v38, %v223_v40  ;;  %v369_v37 = vld [vmem:[%s12068_s7 + $0x8] sm:$0xff]  ;;  %v7491_v38 = vcombine.high %v368_v35, %v370_v36  ;;  %v7490_v40 = vcombine.low %v368_v35, %v370_v36  ;;  %v9331_v35 = vld [vmem:[%s12070_s9 + $0x1d0] sm:$0xff]  }
 0x2a4   :  { %v222_v43 = vpop.xlane.xlu1 %221  ;;  %v9330_v36 = vld [vmem:[%s12070_s9 + $0x110] sm:$0xff]  }
 0x2a5   :  { %v227_v44 = vmul.f32 1.442695, %v225_v41  ;;  %v233_v45 = vmul.f32 1.442695, %v231_v42  ;;  %v224_v46 = vmax.f32 %v214_v39, %v222_v43 }
 0x2a7   :  { %9725 = vpow2.f32 %v227_v44  ;;  %v226_v47 = vsub.f32 %v214_v39, %v224_v46  ;;  %v232_v48 = vsub.f32 %v222_v43, %v224_v46  ;;  %v371_v39 = vld [vmem:[%s12068_s7 + $0x48] sm:$0xff]  ;;  %v607_v43 = vld [vmem:[%s12068_s7 + $0x90] sm:$0xff] }
 0x2a8   :  { %9727 = vpow2.f32 %v233_v45  ;;  %v7492_v41 = vcombine.low %v369_v37, %v371_v39  ;;  %v7493_v42 = vcombine.high %v369_v37, %v371_v39  ;;  %v609_v44 = vld [vmem:[%s12068_s7 + $0xd0] sm:$0xff]  ;;  %v608_v45 = vld [vmem:[%s12068_s7 + $0x98] sm:$0xff]  ;;  %v9335_v39 = vld [vmem:[%s12070_s9 + $0x1c8] sm:$0xff]  }
 0x2a9   :  { %v229_v49 = vmul.f32 1.442695, %v226_v47  ;;  %v235_v50 = vmul.f32 1.442695, %v232_v48  ;;  %v7504_v46 = vcombine.low %v607_v43, %v609_v44  ;;  %v7505_v47 = vcombine.high %v607_v43, %v609_v44  ;;  %v610_v48 = vld [vmem:[%s12068_s7 + $0xd8] sm:$0xff]  ;;  %v9332_v37 = vld [vmem:[%s12070_s9 + $0x190] sm:$0xff]  }
 0x2aa   :  { %498 = vmatprep.subr.bf16.mxu0 %v7493_v42  ;;  %v9337_v42 = vld [vmem:[%s12070_s9 + $0x140] sm:$0xff]  }
 0x2ab   :  { %9729 = vpow2.f32 %v229_v49  ;;  %499 = vmatpush1.bf16.msra.mxu0 %v7492_v41  ;;  %v9811_v49 = vmov 0   ;;  %v9336_v41 = vld [vmem:[%s12070_s9 + $0x188] sm:$0xff]   ;;  %v9339_v43 = vld [vmem:[%s12070_s9 + $0x1c0] sm:$0xff]  }
 0x2ac   :  { %9731 = vpow2.f32 %v235_v50  ;;  %516 = vmatprep.mubr.bf16.mxu0 %v9811_v49  ;;  %v7506_v50 = vcombine.low %v608_v45, %v610_v48  ;;  %v9338_v44 = vld [vmem:[%s12070_s9 + $0x100] sm:$0xff]  }
 0x2b4   :  { %v9726_v51 = vpop.eup %9725 }
 0x2b5   :  { %v9728_v52 = vpop.eup %9727  ;;  %v241_v57 = vmul.f32 %v9726_v51, %v191_v18 }
 0x2b6   :  { %v237_v53 = vadd.f32 %v9728_v52, %v9726_v51  ;;  %v243_v59 = vmul.f32 %v9728_v52, %v194_v21  ;;  %v7507_v51 = vcombine.high %v608_v45, %v610_v48  ;;  %v9340_v45 = vld [vmem:[%s12070_s9 + $0x180] sm:$0xff]   ;;  %v10171_v48 = vld [vmem:[%s12068_s7 + $0xa8] sm:$0xff] }
 0x2b8   :  { %v9730_v54 = vpop.eup %9729  ;;  %9733 = vrcp.f32 %v237_v53  ;;  %v245_v62 = vadd.f32 %v243_v59, %v241_v57  ;;  %728 = vmatprep.subr.bf16.mxu0 %v7507_v51 }
 0x2b9   :  { %v9732_v55 = vpop.eup %9731  ;;  %v242_v58 = vmul.f32 %v9730_v54, %v194_v21 }
 0x2ba   :  { %v238_v56 = vadd.f32 %v9732_v55, %v9730_v54  ;;  %v244_v60 = vmul.f32 %v9732_v55, %v191_v18 }
 0x2bc   :  { %9735 = vrcp.f32 %v238_v56  ;;  %v246_v63 = vadd.f32 %v244_v60, %v242_v58  ;;  %v7488_v60 = vld [vmem:[%s12072_s11] ss:$0 sm:$0xff] }
 0x2c5   :  { %v9734_v61 = vpop.eup %9733 }
 0x2c6   :  { %v247_v2 = vmul.f32 %v9734_v61, %v245_v62 }
 0x2c9   :  { %v9736_v0 = vpop.eup %9735 }
 0x2ca   :  { %v248_v3 = vmul.f32 %v9736_v0, %v246_v63  ;;  %v7489_v0 = vld [vmem:[%s12073_s12] ss:$0 sm:$0xff] }
 0x2cc   :  { %v249_v4 = vpack.c.bf16 %v248_v3, %v247_v2  ;;  %v603_v3 = vld [vmem:[%s12068_s7 + $0x10] sm:$0xff] }
 0x2ce   :  { %262 = vrot.lane.b32.xlu1 %v249_v4, %s9810_s1  ;;  %v605_v4 = vld [vmem:[%s12068_s7 + $0x50] sm:$0xff] }
 0x340   :  { %v263_v5 = vpop.permute.xlu1 %262 }
 0x341   :  { %9255 = vmatmul.mubr.msk.bf16.vlgmr.msra.gmra.mxu1 %vm152_vm2, %v263_v5  ;;  %v604_v5 = vld [vmem:[%s12068_s7 + $0x18] sm:$0xff] }
 0x342   :  { %473 = vmatprep.mubr.bf16.mxu1 %v9811_v49 }
 0x401   :  { %v313_v7 = vpop.f32.mrf.mxu1 }
 0x402   :  { %v314_v8 = vadd.f32 %v7484_v6, %v313_v7 }
 0x403   :  { %v9256_v9 = vpop.f32.mrf.mxu1 }
 0x404   :  { %v320_v10 = vadd.f32 %v314_v8, %v9952_v12 }
 0x405   :  { %v316_v11 = vpop.f32.mrf.mxu1 }
 0x406   :  { %v317_v14 = vadd.f32 %v7484_v6, %v316_v11  ;;  %v324_v15 = vsel %vm152_vm2, %v320_v10, 0.0  ;;  %v606_v6 = vld [vmem:[%s12068_s7 + $0x58] sm:$0xff] }
 0x407   :  { %325 = vadd.xlane.f32.xlu1 %v324_v15  ;;  %v9257_v16 = vpop.f32.mrf.mxu1  ;;  %v7503_v11 = vcombine.high %v604_v5, %v606_v6  ;;  %v7502_v15 = vcombine.low %v604_v5, %v606_v6 }
 0x408   :  { %v321_v17 = vadd.f32 %v317_v14, %v9954_v13  ;;  %v372_v13 = vld [vmem:[%s12068_s7 + $0x80] sm:$0xff]  ;;  %v7500_v14 = vcombine.low %v603_v3, %v605_v4  ;;  %v9309_v16 = vld [vmem:[%s12070_s9 + $0x178] sm:$0xff]  }
 0x409   :  { %v7495_v30 = vcombine.high %v372_v13, %v374_v28  ;;  %v7494_v32 = vcombine.low %v372_v13, %v374_v28  ;;  %v9323_v13 = vld [vmem:[%s12070_s9 + $0x1e0] sm:$0xff]  }
 0x40a   :  { %v327_v18 = vsel %vm152_vm2, %v321_v17, 0.0  ;;  %v9322_v28 = vld [vmem:[%s12070_s9 + $0x120] sm:$0xff]  }
 0x40b   :  { %328 = vadd.xlane.f32.xlu0 %v327_v18  ;;  %453 = vmatprep.subr.bf16.mxu1 %v7495_v30  ;;  %v9310_v18 = vld [vmem:[%s12070_s9 + $0x138] sm:$0xff]  }
 0x40c   :  { %454 = vmatpush1.bf16.msra.mxu1 %v7494_v32  ;;  %v9325_v30 = vld [vmem:[%s12070_s9 + $0x158] sm:$0xff]  }
 0x40d   :  { %455 = vmatprep.subr.bf16.mxu1 %v7491_v38  ;;  %v9326_v32 = vld [vmem:[%s12070_s9 + $0x118] sm:$0xff]   ;;  %v9333_v38 = vld [vmem:[%s12070_s9 + $0x148] sm:$0xff]  }
 0x410   :  { %456 = vmatpush1.bf16.msra.mxu1 %v7490_v40  ;;  %v9334_v40 = vld [vmem:[%s12070_s9 + $0x108] sm:$0xff]  }
 0x411   :  { %685 = vmatprep.subr.bf16.mxu1 %v7505_v47  ;;  %v10166_v47 = vld [vmem:[%s12068_s7 + $0xe0] sm:$0xff] }
 0x490   :  { %v326_v19 = vpop.xlane.xlu1 %325 }
 0x491   :  { %v331_v20 = vmul.f32 0.03125, %v326_v19  ;;  %v9312_v19 = vld [vmem:[%s12070_s9 + $0x1b8] sm:$0xff]  }
 0x493   :  { %v333_v21 = vsub.f32 %v320_v10, %v331_v20  ;;  %v7501_v10 = vcombine.high %v603_v3, %v605_v4  ;;  %v9313_v20 = vld [vmem:[%s12070_s9 + $0x170] sm:$0xff]  }
 0x494   :  { %v329_v22 = vpop.xlane.xlu0 %328 }
 0x495   :  { %v332_v23 = vmul.f32 0.03125, %v329_v22  ;;  %v335_v24 = vmul.f32 %v333_v21, %v333_v21  ;;  %v9314_v22 = vld [vmem:[%s12070_s9 + $0x130] sm:$0xff]  }
 0x497   :  { %v334_v25 = vsub.f32 %v321_v17, %v332_v23  ;;  %v337_v12 = vsel %vm152_vm2, %v335_v24, 0.0  ;;  %v9311_v17 = vld [vmem:[%s12070_s9 + $0x1f8] sm:$0xff]   ;;  %v9316_v23 = vld [vmem:[%s12070_s9 + $0x1b0] sm:$0xff]   ;;  %v9317_v24 = vld [vmem:[%s12070_s9 + $0x168] sm:$0xff]  }
 0x498   :  { %338 = vadd.xlane.f32.xlu0 %v337_v12  ;;  %v9318_v12 = vld [vmem:[%s12070_s9 + $0x128] sm:$0xff]  }
 0x499   :  { %v336_v26 = vmul.f32 %v334_v25, %v334_v25 }
 0x49b   :  { %v340_v27 = vsel %vm152_vm2, %v336_v26, 0.0  ;;  %v9320_v26 = vld [vmem:[%s12070_s9 + $0x1a8] sm:$0xff]  }
 0x49c   :  { %341 = vadd.xlane.f32.xlu0 %v340_v27  ;;  %v9321_v27 = vld [vmem:[%s12070_s9 + $0x160] sm:$0xff]  }
 0x521   :  { %v339_v52 = vpop.xlane.xlu0 %338 }
 0x522   :  { %v343_v53 = vmul.f32 0.03125, %v339_v52  ;;  %v10180_v52 = vld [vmem:[%s12068_s7 + $0xe8] sm:$0xff] }
 0x524   :  { %v345_v54 = vadd.f32 1e-05, %v343_v53  ;;  %v7548_v53 = vcombine.low %v10171_v48, %v10180_v52 }
 0x525   :  { %v342_v55 = vpop.xlane.xlu0 %341 }
 0x526   :  { %9737 = vrsqrt.f32 %v345_v54  ;;  %v344_v56 = vmul.f32 0.03125, %v342_v55  ;;  %v7549_v54 = vcombine.high %v10171_v48, %v10180_v52  ;;  %v378_v55 = vlaneseq  ;;  %v1344_v48 = vld [vmem:[%s12068_s7 + $0x78] sm:$0xff] }
 0x528   :  { %v346_v57 = vadd.f32 1e-05, %v344_v56  ;;  %v379_v56 = vshrl.u32 %v378_v55, 7 }
 0x52a   :  { %9739 = vrsqrt.f32 %v346_v57  ;;  %v10186_v57 = vsub.s32 0, %v379_v56 }
 0x533   :  { %v9738_v58 = vpop.eup %9737 }
 0x534   :  { %v349_v59 = vmul.f32 %v9738_v58, %v333_v21  ;;  %v9315_v21 = vld [vmem:[%s12070_s9 + $0x1f0] sm:$0xff]   ;;  %v10188_v58 = vsub.s32 2, %v379_v56 }
 0x536   :  { %v357_v62 = vmul.f32 %v7488_v60, %v349_v59  ;;  %v376_v59 = vld [vmem:[%s12069_s8] sm:$0xf] }
 0x537   :  { %v9740_v61 = vpop.eup %9739 }
 0x538   :  { %v350_v63 = vmul.f32 %v9740_v61, %v334_v25  ;;  %v10044_v7 = vadd.f32 %v7489_v0, %v357_v62  ;;  %v9319_v25 = vld [vmem:[%s12070_s9 + $0x1e8] sm:$0xff]   ;;  %v10195_v61 = vsub.s32 3, %v379_v56  ;;  %v381_v62 = vrot.slane %v376_v59, %v10186_v57 }
 0x53a   :  { %v358_v2 = vmul.f32 %v7488_v60, %v350_v63  ;;  %v10193_v60 = vsub.s32 1, %v379_v56  ;;  %v389_v63 = vrot.slane %v376_v59, %v10188_v58  ;;  %v393_v4 = vrot.slane %v376_v59, %v10195_v61 }
 0x53c   :  { %v10046_v8 = vadd.f32 %v7489_v0, %v358_v2  ;;  %v385_v3 = vrot.slane %v376_v59, %v10193_v60 }
 0x53e   :  { %v10050_v9 = vpack.c.bf16 %v10046_v8, %v10044_v7 }
 0x540   :  { %7498 = vmatmul.mubr.msk.bf16.vlgmr.msra.gmra.mxu1 %vm152_vm2, %v10050_v9  ;;  %7499 = vmatmul.mubr.msk.bf16.vlgmr.msra.gmra.mxu0 %vm152_vm2, %v10050_v9 }
 0x541   :  { %686 = vmatpush1.bf16.msra.mxu1 %v7504_v46  ;;  %729 = vmatpush1.bf16.msra.mxu0 %v7506_v50  ;;  %v10161_v46 = vld [vmem:[%s12068_s7 + $0xa0] sm:$0xff] }
 0x542   :  { %687 = vmatprep.subr.bf16.mxu1 %v7501_v10  ;;  %730 = vmatprep.subr.bf16.mxu0 %v7503_v11  ;;  %v7546_v50 = vcombine.low %v10161_v46, %v10166_v47  ;;  %v7547_v51 = vcombine.high %v10161_v46, %v10166_v47  ;;  %v1343_v46 = vld [vmem:[%s12068_s7 + $0x70] sm:$0xff]  ;;  %v1342_v47 = vld [vmem:[%s12068_s7 + $0x38] sm:$0xff] }
 0x543   :  { %705 = vmatprep.mubr.bf16.mxu1 %v9811_v49  ;;  %748 = vmatprep.mubr.bf16.mxu0 %v9811_v49 }
 0x545   :  { %688 = vmatpush1.bf16.msra.mxu1 %v7500_v14  ;;  %731 = vmatpush1.bf16.msra.mxu0 %v7502_v15 }
 0x546   :  { %8671 = vmatprep.subr.bf16.mxu1 %v9309_v16  ;;  %8693 = vmatprep.subr.bf16.mxu0 %v9311_v17 }
 0x548   :  { %7508 = vmatmul.mubr.msk.bf16.vlgmr.msra.gmra.mxu1 %vm152_vm2, %v10050_v9  ;;  %7509 = vmatmul.mubr.msk.bf16.vlgmr.msra.gmra.mxu0 %vm152_vm2, %v10050_v9 }
 0x549   :  { %8672 = vmatpush3.bf16.msra.mxu1 %v9310_v18  ;;  %8694 = vmatpush3.bf16.msra.mxu0 %v9312_v19 }
 0x54a   :  { %8673 = vmatprep.subr.bf16.mxu1 %v9313_v20  ;;  %8695 = vmatprep.subr.bf16.mxu0 %v9315_v21 }
 0x54d   :  { %8674 = vmatpush3.bf16.msra.mxu1 %v9314_v22  ;;  %8696 = vmatpush3.bf16.msra.mxu0 %v9316_v23 }
 0x54e   :  { %8675 = vmatprep.subr.bf16.mxu1 %v9317_v24  ;;  %8697 = vmatprep.subr.bf16.mxu0 %v9319_v25 }
 0x551   :  { %8676 = vmatpush3.bf16.msra.mxu1 %v9318_v12  ;;  %8698 = vmatpush3.bf16.msra.mxu0 %v9320_v26 }
 0x552   :  { %8677 = vmatprep.subr.bf16.mxu1 %v9321_v27  ;;  %8699 = vmatprep.subr.bf16.mxu0 %v9323_v13  ;;  %v611_v27 = vld [vmem:[%s12069_s8 + $0x4] sm:$0xf] }
 0x555   :  { %8678 = vmatpush3.bf16.msra.mxu1 %v9322_v28  ;;  %8700 = vmatpush3.bf16.msra.mxu0 %v9324_v29 }
 0x556   :  { %8679 = vmatprep.subr.bf16.mxu1 %v9325_v30  ;;  %8701 = vmatprep.subr.bf16.mxu0 %v9327_v31  ;;  %v620_v31 = vrot.slane %v611_v27, %v10193_v60 }
 0x559   :  { %8680 = vmatpush3.bf16.msra.mxu1 %v9326_v32  ;;  %8702 = vmatpush3.bf16.msra.mxu0 %v9328_v33  ;;  %v628_v32 = vrot.slane %v611_v27, %v10195_v61 }
 0x55a   :  { %8681 = vmatprep.subr.bf16.mxu1 %v9329_v34  ;;  %8703 = vmatprep.subr.bf16.mxu0 %v9331_v35 }
 0x55d   :  { %8682 = vmatpush3.bf16.msra.mxu1 %v9330_v36  ;;  %8704 = vmatpush3.bf16.msra.mxu0 %v9332_v37  ;;  %v616_v37 = vrot.slane %v611_v27, %v10186_v57 }
 0x55e   :  { %8683 = vmatprep.subr.bf16.mxu1 %v9333_v38  ;;  %8705 = vmatprep.subr.bf16.mxu0 %v9335_v39  ;;  %v624_v38 = vrot.slane %v611_v27, %v10188_v58  ;;  %v1346_v27 = vld [vmem:[%s12068_s7 + $0xb8] sm:$0xff] }
 0x561   :  { %8684 = vmatpush3.bf16.msra.mxu1 %v9334_v40  ;;  %8706 = vmatpush3.bf16.msra.mxu0 %v9336_v41 }
 0x562   :  { %8685 = vmatprep.subr.bf16.mxu1 %v9337_v42  ;;  %8707 = vmatprep.subr.bf16.mxu0 %v9339_v43 }
 0x565   :  { %8686 = vmatpush3.bf16.msra.mxu1 %v9338_v44  ;;  %8708 = vmatpush3.bf16.msra.mxu0 %v9340_v45 }
 0x566   :  { %1191 = vmatprep.subr.bf16.mxu1 %v7547_v51  ;;  %1234 = vmatprep.subr.bf16.mxu0 %v7549_v54 }
 0x600   :  { %v475_v0 = vpop.f32.mrf.mxu1  ;;  %v518_v2 = vpop.f32.mrf.mxu0 }
 0x601   :  { %v476_v5 = vadd.f32 %v475_v0, %v381_v62  ;;  %v519_v6 = vadd.f32 %v518_v2, %v389_v63 }
 0x602   :  { %v477_v10 = vpop.f32.mrf.mxu1  ;;  %v520_v11 = vpop.f32.mrf.mxu0 }
 0x603   :  { %v478_v14 = vadd.f32 %v477_v10, %v385_v3  ;;  %v521_v15 = vadd.f32 %v520_v11, %v393_v4  ;;  %v527_v20 = vmax.f32 %v476_v5, 0.0  ;;  %v529_v21 = vmax.f32 %v519_v6, 0.0  ;;  %v1109_v5 = vld [vmem:[%s12068_s7 + $0x20] sm:$0xff] }
 0x604   :  { %v479_v16 = vpop.f32.mrf.mxu1  ;;  %v522_v17 = vpop.f32.mrf.mxu0  ;;  %v1111_v6 = vld [vmem:[%s12068_s7 + $0x60] sm:$0xff] }
 0x605   :  { %v480_v18 = vadd.f32 %v479_v16, %v381_v62  ;;  %v523_v19 = vadd.f32 %v522_v17, %v389_v63  ;;  %v528_v13 = vmax.f32 %v478_v14, 0.0  ;;  %v530_v28 = vmax.f32 %v521_v15, 0.0  ;;  %v1110_v16 = vld [vmem:[%s12068_s7 + $0x28] sm:$0xff] }
 0x606   :  { %v481_v22 = vpop.f32.mrf.mxu1  ;;  %v524_v23 = vpop.f32.mrf.mxu0  ;;  %v1112_v17 = vld [vmem:[%s12068_s7 + $0x68] sm:$0xff] }
 0x607   :  { %v531_v24 = vmax.f32 %v480_v18, 0.0  ;;  %v533_v25 = vmax.f32 %v523_v19, 0.0  ;;  %v482_v12 = vadd.f32 %v481_v22, %v385_v3  ;;  %v525_v26 = vadd.f32 %v524_v23, %v393_v4 }
 0x608   :  { %v707_v29 = vpop.f32.mrf.mxu1  ;;  %v750_v30 = vpop.f32.mrf.mxu0 }
 0x609   :  { %v10206_v33 = vpack.c.bf16 %v531_v24, %v527_v20  ;;  %v10208_v34 = vpack.c.bf16 %v533_v25, %v529_v21  ;;  %v532_v35 = vmax.f32 %v482_v12, 0.0  ;;  %v534_v36 = vmax.f32 %v525_v26, 0.0  ;;  %v1345_v12 = vld [vmem:[%s12068_s7 + $0xb0] sm:$0xff] }
 0x60a   :  { %v709_v39 = vpop.f32.mrf.mxu1  ;;  %v752_v40 = vpop.f32.mrf.mxu0  ;;  %v708_v56 = vadd.f32 %v707_v29, %v616_v37  ;;  %v751_v59 = vadd.f32 %v750_v30, %v624_v38  ;;  %v7543_v24 = vcombine.high %v1109_v5, %v1111_v6  ;;  %v7545_v25 = vcombine.high %v1110_v16, %v1112_v17  ;;  %v1347_v26 = vld [vmem:[%s12068_s7 + $0xf0] sm:$0xff] }
 0x60b   :  { %v10212_v41 = vpack.c.bf16 %v532_v35, %v528_v13  ;;  %v10214_v42 = vpack.c.bf16 %v534_v36, %v530_v28  ;;  %v710_v45 = vadd.f32 %v709_v39, %v620_v31  ;;  %v753_v51 = vadd.f32 %v752_v40, %v628_v32  ;;  %v1348_v13 = vld [vmem:[%s12068_s7 + $0xf8] sm:$0xff] }
 0x60c   :  { %v711_v43 = vpop.f32.mrf.mxu1  ;;  %v754_v44 = vpop.f32.mrf.mxu0  ;;  %v759_v18 = vmax.f32 %v708_v56, 0.0  ;;  %v761_v19 = vmax.f32 %v751_v59, 0.0  ;;  %v7542_v28 = vcombine.low %v1109_v5, %v1111_v6  ;;  %v7544_v29 = vcombine.low %v1110_v16, %v1112_v17  ;;  %v9342_v39 = vld [vmem:[%s12070_s9 + $0x3f8] sm:$0xff]   ;;  %v9351_v56 = vld [vmem:[%s12070_s9 + $0x328] sm:$0xff]  }
 0x60d   :  { %v712_v54 = vadd.f32 %v711_v43, %v616_v37  ;;  %v755_v55 = vadd.f32 %v754_v44, %v624_v38  ;;  %v760_v10 = vmax.f32 %v710_v45, 0.0  ;;  %v762_v11 = vmax.f32 %v753_v51, 0.0  ;;  %v9341_v38 = vld [vmem:[%s12070_s9 + $0x378] sm:$0xff]   ;;  %v9345_v44 = vld [vmem:[%s12070_s9 + $0x370] sm:$0xff]   ;;  %v9352_v59 = vld [vmem:[%s12070_s9 + $0x3a8] sm:$0xff]  }
 0x60e   :  { %v713_v62 = vpop.f32.mrf.mxu1  ;;  %v756_v63 = vpop.f32.mrf.mxu0  ;;  %v7557_v30 = vcombine.high %v1345_v12, %v1347_v26  ;;  %v7558_v52 = vcombine.low %v1346_v27, %v1348_v13  ;;  %v7555_v35 = vcombine.high %v1342_v47, %v1344_v48  ;;  %v7554_v37 = vcombine.low %v1342_v47, %v1344_v48  ;;  %v9343_v40 = vld [vmem:[%s12070_s9 + $0x338] sm:$0xff]   ;;  %v9346_v45 = vld [vmem:[%s12070_s9 + $0x3f0] sm:$0xff]   ;;  %v9365_v16 = vld [vmem:[%s12070_s9 + $0x348] sm:$0xff]  }
 0x60f   :  { %v714_v0 = vadd.f32 %v713_v62, %v620_v31  ;;  %v757_v2 = vadd.f32 %v756_v63, %v628_v32  ;;  %v763_v3 = vmax.f32 %v712_v54, 0.0  ;;  %v765_v4 = vmax.f32 %v755_v55, 0.0  ;;  %v1341_v32 = vld [vmem:[%s12068_s7 + $0x30] sm:$0xff]  ;;  %v9344_v43 = vld [vmem:[%s12070_s9 + $0x3b8] sm:$0xff]   ;;  %v9350_v55 = vld [vmem:[%s12070_s9 + $0x3e8] sm:$0xff]  }
 0x610   :  { %v7559_v31 = vcombine.high %v1346_v27, %v1348_v13  ;;  %v7552_v36 = vcombine.low %v1341_v32, %v1343_v46  ;;  %v9347_v51 = vld [vmem:[%s12070_s9 + $0x330] sm:$0xff]   ;;  %v9353_v62 = vld [vmem:[%s12070_s9 + $0x360] sm:$0xff]   ;;  %v9359_v5 = vld [vmem:[%s12070_s9 + $0x318] sm:$0xff]  }
 0x611   :  { %v764_v14 = vmax.f32 %v714_v0, 0.0  ;;  %v766_v15 = vmax.f32 %v757_v2, 0.0  ;;  %v767_v22 = vpack.c.bf16 %v763_v3, %v759_v18  ;;  %v769_v23 = vpack.c.bf16 %v765_v4, %v761_v19  ;;  %v9348_v54 = vld [vmem:[%s12070_s9 + $0x3b0] sm:$0xff]   ;;  %v9354_v63 = vld [vmem:[%s12070_s9 + $0x3e0] sm:$0xff]   ;;  %v9357_v3 = vld [vmem:[%s12070_s9 + $0x358] sm:$0xff]  }
 0x612   :  { %v9355_v0 = vld [vmem:[%s12070_s9 + $0x320] sm:$0xff]   ;;  %v9358_v4 = vld [vmem:[%s12070_s9 + $0x3d8] sm:$0xff]   ;;  %v9366_v17 = vld [vmem:[%s12070_s9 + $0x3c8] sm:$0xff]  }
 0x613   :  { %v768_v20 = vpack.c.bf16 %v764_v14, %v760_v10  ;;  %v770_v21 = vpack.c.bf16 %v766_v15, %v762_v11  ;;  %v9356_v2 = vld [vmem:[%s12070_s9 + $0x3a0] sm:$0xff]   ;;  %v9360_v6 = vld [vmem:[%s12070_s9 + $0x398] sm:$0xff]   ;;  %v9361_v10 = vld [vmem:[%s12070_s9 + $0x350] sm:$0xff]  }
 0x614   :  { %v9362_v11 = vld [vmem:[%s12070_s9 + $0x3d0] sm:$0xff]   ;;  %v9367_v18 = vld [vmem:[%s12070_s9 + $0x308] sm:$0xff]  }
 0x615   :  { %1059 = vmatprep.mubr.bf16.mxu1 %v768_v20  ;;  %1100 = vmatprep.mubr.bf16.mxu0 %v770_v21  ;;  %v9363_v14 = vld [vmem:[%s12070_s9 + $0x310] sm:$0xff]   ;;  %v9368_v19 = vld [vmem:[%s12070_s9 + $0x388] sm:$0xff]   ;;  %v9369_v20 = vld [vmem:[%s12070_s9 + $0x340] sm:$0xff]  }
 0x616   :  { %1060 = vmatmul.mubr.bf16.vlgmr.msra.gmra.mxu1 %v767_v22  ;;  %1101 = vmatmul.mubr.bf16.vlgmr.msra.gmra.mxu0 %v769_v23  ;;  %v9364_v15 = vld [vmem:[%s12070_s9 + $0x390] sm:$0xff]   ;;  %v9370_v21 = vld [vmem:[%s12070_s9 + $0x3c0] sm:$0xff]  }
 0x617   :  { %1192 = vmatpush1.bf16.msra.mxu1 %v7546_v50  ;;  %1235 = vmatpush1.bf16.msra.mxu0 %v7548_v53  ;;  %v7556_v50 = vcombine.low %v1345_v12, %v1347_v26  ;;  %v7553_v53 = vcombine.high %v1341_v32, %v1343_v46  ;;  %v9371_v22 = vld [vmem:[%s12070_s9 + $0x300] sm:$0xff]   ;;  %v10375_v32 = vld [vmem:[%s12069_s8 + $0x8] sm:$0xf] }
 0x618   :  { %1193 = vmatprep.subr.bf16.mxu1 %v7543_v24  ;;  %1236 = vmatprep.subr.bf16.mxu0 %v7545_v25  ;;  %v9372_v23 = vld [vmem:[%s12070_s9 + $0x380] sm:$0xff]   ;;  %v9373_v24 = vld [vmem:[%s12070_s9 + $0x78] sm:$0xff]  }
 0x619   :  { %1211 = vmatprep.mubr.bf16.mxu1 %v9811_v49  ;;  %1254 = vmatprep.mubr.bf16.mxu0 %v9811_v49  ;;  %v9374_v25 = vld [vmem:[%s12070_s9 + $0xf8] sm:$0xff]  }
 0x61b   :  { %1194 = vmatpush1.bf16.msra.mxu1 %v7542_v28  ;;  %1237 = vmatpush1.bf16.msra.mxu0 %v7544_v29 }
 0x61c   :  { %1423 = vmatprep.subr.bf16.mxu1 %v7557_v30  ;;  %1466 = vmatprep.subr.bf16.mxu0 %v7559_v31 }
 0x61e   :  { %7550 = vmatmul.mubr.msk.bf16.vlgmr.msra.gmra.mxu1 %vm152_vm2, %v10050_v9  ;;  %7551 = vmatmul.mubr.msk.bf16.vlgmr.msra.gmra.mxu0 %vm152_vm2, %v10050_v9 }
 0x61f   :  { %1424 = vmatpush1.bf16.msra.mxu1 %v7556_v50  ;;  %1467 = vmatpush1.bf16.msra.mxu0 %v7558_v52 }
 0x620   :  { %1425 = vmatprep.subr.bf16.mxu1 %v7553_v53  ;;  %1468 = vmatprep.subr.bf16.mxu0 %v7555_v35  ;;  %v1122_v53 = vrot.slane %v10375_v32, %v10186_v57  ;;  %v1130_v35 = vrot.slane %v10375_v32, %v10188_v58 }
 0x621   :  { %1443 = vmatprep.mubr.bf16.mxu1 %v9811_v49  ;;  %1486 = vmatprep.mubr.bf16.mxu0 %v9811_v49 }
 0x623   :  { %1426 = vmatpush1.bf16.msra.mxu1 %v7552_v36  ;;  %1469 = vmatpush1.bf16.msra.mxu0 %v7554_v37 }
 0x624   :  { %8715 = vmatprep.subr.bf16.mxu1 %v9341_v38  ;;  %8737 = vmatprep.subr.bf16.mxu0 %v9342_v39 }
 0x626   :  { %7560 = vmatmul.mubr.msk.bf16.vlgmr.msra.gmra.mxu1 %vm152_vm2, %v10050_v9  ;;  %7561 = vmatmul.mubr.msk.bf16.vlgmr.msra.gmra.mxu0 %vm152_vm2, %v10050_v9  ;;  %v9349_v9 = vld [vmem:[%s12070_s9 + $0x368] sm:$0xff]  }
 0x627   :  { %8716 = vmatpush3.bf16.msra.mxu1 %v9343_v40  ;;  %8738 = vmatpush3.bf16.msra.mxu0 %v9344_v43 }
 0x628   :  { %8717 = vmatprep.subr.bf16.mxu1 %v9345_v44  ;;  %8739 = vmatprep.subr.bf16.mxu0 %v9346_v45 }
 0x62b   :  { %8718 = vmatpush3.bf16.msra.mxu1 %v9347_v51  ;;  %8740 = vmatpush3.bf16.msra.mxu0 %v9348_v54 }
 0x62c   :  { %8719 = vmatprep.subr.bf16.mxu1 %v9349_v9  ;;  %8741 = vmatprep.subr.bf16.mxu0 %v9350_v55 }
 0x62f   :  { %8720 = vmatpush3.bf16.msra.mxu1 %v9351_v56  ;;  %8742 = vmatpush3.bf16.msra.mxu0 %v9352_v59 }
 0x630   :  { %8721 = vmatprep.subr.bf16.mxu1 %v9353_v62  ;;  %8743 = vmatprep.subr.bf16.mxu0 %v9354_v63 }
 0x633   :  { %8722 = vmatpush3.bf16.msra.mxu1 %v9355_v0  ;;  %8744 = vmatpush3.bf16.msra.mxu0 %v9356_v2  ;;  %v1349_v2 = vld [vmem:[%s12069_s8 + $0xc] sm:$0xf] }
 0x634   :  { %8723 = vmatprep.subr.bf16.mxu1 %v9357_v3  ;;  %8745 = vmatprep.subr.bf16.mxu0 %v9358_v4 }
 0x637   :  { %8724 = vmatpush3.bf16.msra.mxu1 %v9359_v5  ;;  %8746 = vmatpush3.bf16.msra.mxu0 %v9360_v6 }
 0x638   :  { %8725 = vmatprep.subr.bf16.mxu1 %v9361_v10  ;;  %8747 = vmatprep.subr.bf16.mxu0 %v9362_v11  ;;  %v1358_v10 = vrot.slane %v1349_v2, %v10193_v60  ;;  %v1366_v11 = vrot.slane %v1349_v2, %v10195_v61 }
 0x63b   :  { %8726 = vmatpush3.bf16.msra.mxu1 %v9363_v14  ;;  %8748 = vmatpush3.bf16.msra.mxu0 %v9364_v15  ;;  %v1354_v14 = vrot.slane %v1349_v2, %v10186_v57  ;;  %v1362_v15 = vrot.slane %v1349_v2, %v10188_v58  ;;  %v9387_v2 = vld [vmem:[%s12070_s9 + $0x20] sm:$0xff]  }
 0x63c   :  { %8727 = vmatprep.subr.bf16.mxu1 %v9365_v16  ;;  %8749 = vmatprep.subr.bf16.mxu0 %v9366_v17 }
 0x63f   :  { %8728 = vmatpush3.bf16.msra.mxu1 %v9367_v18  ;;  %8750 = vmatpush3.bf16.msra.mxu0 %v9368_v19 }
 0x640   :  { %8729 = vmatprep.subr.bf16.mxu1 %v9369_v20  ;;  %8751 = vmatprep.subr.bf16.mxu0 %v9370_v21 }
 0x643   :  { %8730 = vmatpush3.bf16.msra.mxu1 %v9371_v22  ;;  %8752 = vmatpush3.bf16.msra.mxu0 %v9372_v23 }
 0x644   :  { %8759 = vmatprep.subr.bf16.mxu1 %v9373_v24  ;;  %8781 = vmatprep.subr.bf16.mxu0 %v9374_v25 }
 0x6d6   :  { %v8687_v12 = vpop.f32.mrf.mxu1  ;;  %v8709_v26 = vpop.f32.mrf.mxu0 }
 0x6d8   :  { %v8688_v27 = vpop.f32.mrf.mxu1  ;;  %v8710_v13 = vpop.f32.mrf.mxu0 }
 0x6d9   :  { %v8689_v28 = vadd.f32 %v8688_v27, %v8687_v12  ;;  %v8711_v29 = vadd.f32 %v8710_v13, %v8709_v26 }
 0x6da   :  { %v8690_v30 = vpop.f32.mrf.mxu1  ;;  %v8712_v31 = vpop.f32.mrf.mxu0 }
 0x6db   :  { %v10377_v46 = vadd.f32 %v8711_v29, %v8689_v28 }
 0x6dc   :  { %v8691_v47 = vpop.f32.mrf.mxu1  ;;  %v8713_v48 = vpop.f32.mrf.mxu0 }
 0x6dd   :  { %v8692_v50 = vadd.f32 %v8691_v47, %v8690_v30  ;;  %v8714_v52 = vadd.f32 %v8713_v48, %v8712_v31 }
 0x6de   :  { %v1213_v36 = vpop.f32.mrf.mxu1  ;;  %v1256_v37 = vpop.f32.mrf.mxu0 }
 0x6df   :  { %v10383_v38 = vadd.f32 %v8714_v52, %v8692_v50  ;;  %v1214_v43 = vadd.f32 %v1213_v36, %v1122_v53  ;;  %v1257_v44 = vadd.f32 %v1256_v37, %v1130_v35  ;;  %v9375_v36 = vld [vmem:[%s12070_s9 + $0x38] sm:$0xff]  }
 0x6e0   :  { %v10385_v39 = vpop.f32.mrf.mxu1  ;;  %v10387_v40 = vpop.f32.mrf.mxu0  ;;  %v9376_v37 = vld [vmem:[%s12070_s9 + $0xb8] sm:$0xff]  }
 0x6e1   :  { %v1265_v59 = vmax.f32 %v1214_v43, 0.0  ;;  %v1267_v62 = vmax.f32 %v1257_v44, 0.0 }
 0x6e2   :  { %v1217_v45 = vpop.f32.mrf.mxu1  ;;  %v1260_v51 = vpop.f32.mrf.mxu0 }
 0x6e3   :  { %v1218_v54 = vadd.f32 %v1217_v45, %v1122_v53  ;;  %v1261_v9 = vadd.f32 %v1260_v51, %v1130_v35  ;;  %v9377_v45 = vld [vmem:[%s12070_s9 + $0x70] sm:$0xff]  }
 0x6e4   :  { %v10389_v55 = vpop.f32.mrf.mxu1  ;;  %v10391_v56 = vpop.f32.mrf.mxu0  ;;  %v9378_v51 = vld [vmem:[%s12070_s9 + $0xf0] sm:$0xff]  }
 0x6e5   :  { %v1269_v63 = vmax.f32 %v1218_v54, 0.0  ;;  %v1271_v0 = vmax.f32 %v1261_v9, 0.0  ;;  %v9379_v54 = vld [vmem:[%s12070_s9 + $0x30] sm:$0xff]  }
 0x6e6   :  { %v1445_v3 = vpop.f32.mrf.mxu1  ;;  %v1488_v4 = vpop.f32.mrf.mxu0  ;;  %v9380_v9 = vld [vmem:[%s12070_s9 + $0xb0] sm:$0xff]  }
 0x6e7   :  { %v10396_v5 = vpack.c.bf16 %v1269_v63, %v1265_v59  ;;  %v10398_v6 = vpack.c.bf16 %v1271_v0, %v1267_v62  ;;  %v1446_v24 = vadd.f32 %v1445_v3, %v1354_v14  ;;  %v1489_v25 = vadd.f32 %v1488_v4, %v1362_v15  ;;  %v9381_v59 = vld [vmem:[%s12070_s9 + $0x68] sm:$0xff]   ;;  %v9386_v0 = vld [vmem:[%s12070_s9 + $0xe0] sm:$0xff]   ;;  %v9389_v4 = vld [vmem:[%s12070_s9 + $0x58] sm:$0xff]  }
 0x6e8   :  { %v1447_v16 = vpop.f32.mrf.mxu1  ;;  %v1490_v17 = vpop.f32.mrf.mxu0  ;;  %v9382_v62 = vld [vmem:[%s12070_s9 + $0xe8] sm:$0xff]   ;;  %v9388_v3 = vld [vmem:[%s12070_s9 + $0xa0] sm:$0xff]  }
 0x6e9   :  { %v1448_v20 = vadd.f32 %v1447_v16, %v1358_v10  ;;  %v1491_v21 = vadd.f32 %v1490_v17, %v1366_v11  ;;  %v1497_v50 = vmax.f32 %v1446_v24, 0.0  ;;  %v1499_v52 = vmax.f32 %v1489_v25, 0.0  ;;  %v9383_v63 = vld [vmem:[%s12070_s9 + $0x28] sm:$0xff]   ;;  %v9394_v16 = vld [vmem:[%s12070_s9 + $0xd0] sm:$0xff]   ;;  %v9401_v25 = vld [vmem:[%s12070_s9 + $0x40] sm:$0xff]  }
 0x6ea   :  { %v1449_v18 = vpop.f32.mrf.mxu1  ;;  %v1492_v19 = vpop.f32.mrf.mxu0  ;;  %v9395_v17 = vld [vmem:[%s12070_s9 + $0x10] sm:$0xff]   ;;  %v1134_v24 = vrot.slane %v10375_v32, %v10195_v61 }
 0x6eb   :  { %v1450_v22 = vadd.f32 %v1449_v18, %v1354_v14  ;;  %v1493_v23 = vadd.f32 %v1492_v19, %v1362_v15  ;;  %v1498_v30 = vmax.f32 %v1448_v20, 0.0  ;;  %v1500_v31 = vmax.f32 %v1491_v21, 0.0  ;;  %v9392_v14 = vld [vmem:[%s12070_s9 + $0x98] sm:$0xff]   ;;  %v9393_v15 = vld [vmem:[%s12070_s9 + $0x50] sm:$0xff]   ;;  %v9397_v19 = vld [vmem:[%s12070_s9 + $0x48] sm:$0xff]  }
 0x6ec   :  { %v1451_v12 = vpop.f32.mrf.mxu1  ;;  %v1494_v26 = vpop.f32.mrf.mxu0  ;;  %v9396_v18 = vld [vmem:[%s12070_s9 + $0x90] sm:$0xff]   ;;  %v9398_v20 = vld [vmem:[%s12070_s9 + $0xc8] sm:$0xff]   ;;  %v1126_v21 = vrot.slane %v10375_v32, %v10193_v60  ;;  %v9403_v32 = vld [vmem:[%s12070_s9] sm:$0xff]  }
 0x6ed   :  { %v1452_v27 = vadd.f32 %v1451_v12, %v1358_v10  ;;  %v1495_v13 = vadd.f32 %v1494_v26, %v1366_v11  ;;  %v1501_v28 = vmax.f32 %v1450_v22, 0.0  ;;  %v1503_v29 = vmax.f32 %v1493_v23, 0.0  ;;  %v9390_v10 = vld [vmem:[%s12070_s9 + $0xd8] sm:$0xff]   ;;  %v9399_v22 = vld [vmem:[%s12070_s9 + $0x8] sm:$0xff]   ;;  %v9402_v12 = vld [vmem:[%s12070_s9 + $0xc0] sm:$0xff]  }
 0x6ee   :  { %v9391_v11 = vld [vmem:[%s12070_s9 + $0x18] sm:$0xff]   ;;  %v9400_v23 = vld [vmem:[%s12070_s9 + $0x88] sm:$0xff]   ;;  %v1220_v26 = vadd.f32 %v10389_v55, %v1126_v21 }
 0x6ef   :  { %v1502_v47 = vmax.f32 %v1452_v27, 0.0  ;;  %v1504_v48 = vmax.f32 %v1495_v13, 0.0  ;;  %v1505_v43 = vpack.c.bf16 %v1501_v28, %v1497_v50  ;;  %v1507_v44 = vpack.c.bf16 %v1503_v29, %v1499_v52  ;;  %v9404_v28 = vld [vmem:[%s12070_s9 + $0x80] sm:$0xff]   ;;  %v9405_v55 = vld [vmem:[%s12070_s9 + $0x278] sm:$0xff]   ;;  %v9409_v52 = vld [vmem:[%s12070_s9 + $0x270] sm:$0xff]  }
 0x6f0   :  { %v1263_v27 = vadd.f32 %v10391_v56, %v1134_v24  ;;  %v1216_v13 = vadd.f32 %v10385_v39, %v1126_v21  ;;  %v1259_v29 = vadd.f32 %v10387_v40, %v1134_v24  ;;  %v9406_v39 = vld [vmem:[%s12070_s9 + $0x2f8] sm:$0xff]   ;;  %v1270_v56 = vmax.f32 %v1220_v26, 0.0 }
 0x6f1   :  { %v1506_v53 = vpack.c.bf16 %v1502_v47, %v1498_v30  ;;  %v1508_v35 = vpack.c.bf16 %v1504_v48, %v1500_v31  ;;  %v9407_v47 = vld [vmem:[%s12070_s9 + $0x238] sm:$0xff]  }
 0x6f2   :  { %v1272_v30 = vmax.f32 %v1263_v27, 0.0  ;;  %v1266_v31 = vmax.f32 %v1216_v13, 0.0  ;;  %v1268_v40 = vmax.f32 %v1259_v29, 0.0  ;;  %v9408_v48 = vld [vmem:[%s12070_s9 + $0x2b8] sm:$0xff]  }
 0x6f3   :  { %1797 = vmatprep.mubr.bf16.mxu1 %v1506_v53  ;;  %1838 = vmatprep.mubr.bf16.mxu0 %v1508_v35  ;;  %v9410_v53 = vld [vmem:[%s12070_s9 + $0x2f0] sm:$0xff]  }
 0x6f4   :  { %1798 = vmatmul.mubr.bf16.vlgmr.msra.gmra.mxu1 %v1505_v43  ;;  %1839 = vmatmul.mubr.bf16.vlgmr.msra.gmra.mxu0 %v1507_v44  ;;  %v1274_v50 = vpack.c.bf16 %v1270_v56, %v1266_v31  ;;  %v1276_v35 = vpack.c.bf16 %v1272_v30, %v1268_v40  ;;  %v9413_v43 = vld [vmem:[%s12070_s9 + $0x268] sm:$0xff]  }
 0x6f5   :  { %8760 = vmatpush3.bf16.msra.mxu1 %v9375_v36  ;;  %8782 = vmatpush3.bf16.msra.mxu0 %v9376_v37  ;;  %v9411_v36 = vld [vmem:[%s12070_s9 + $0x230] sm:$0xff]   ;;  %v9416_v44 = vld [vmem:[%s12070_s9 + $0x2a8] sm:$0xff]  }
 0x6f6   :  { %2071 = vmatprep.mubr.bf16.mxu1 %v10212_v41  ;;  %2112 = vmatprep.mubr.bf16.mxu0 %v10214_v42  ;;  %v9384_v41 = vld [vmem:[%s12070_s9 + $0xa8] sm:$0xff]   ;;  %v9385_v42 = vld [vmem:[%s12070_s9 + $0x60] sm:$0xff]   ;;  %v9412_v37 = vld [vmem:[%s12070_s9 + $0x2b0] sm:$0xff]  }
 0x6f7   :  { %8761 = vmatprep.subr.bf16.mxu1 %v9377_v45  ;;  %8783 = vmatprep.subr.bf16.mxu0 %v9378_v51  ;;  %v9417_v45 = vld [vmem:[%s12070_s9 + $0x260] sm:$0xff]  }
 0x6f8   :  { %v9418_v51 = vld [vmem:[%s12070_s9 + $0x2e0] sm:$0xff]  }
 0x6f9   :  { %8762 = vmatpush3.bf16.msra.mxu1 %v9379_v54  ;;  %8784 = vmatpush3.bf16.msra.mxu0 %v9380_v9  ;;  %v9419_v54 = vld [vmem:[%s12070_s9 + $0x220] sm:$0xff]  }
 0x6fa   :  { %8763 = vmatprep.subr.bf16.mxu1 %v9381_v59  ;;  %8785 = vmatprep.subr.bf16.mxu0 %v9382_v62  ;;  %v9420_v9 = vld [vmem:[%s12070_s9 + $0x2a0] sm:$0xff]   ;;  %v9421_v59 = vld [vmem:[%s12070_s9 + $0x258] sm:$0xff]  }
 0x6fb   :  { %v9422_v62 = vld [vmem:[%s12070_s9 + $0x2d8] sm:$0xff]  }
 0x6fd   :  { %8764 = vmatpush3.bf16.msra.mxu1 %v9383_v63  ;;  %8786 = vmatpush3.bf16.msra.mxu0 %v9384_v41  ;;  %v9423_v63 = vld [vmem:[%s12070_s9 + $0x218] sm:$0xff]  }
 0x6fe   :  { %8765 = vmatprep.subr.bf16.mxu1 %v9385_v42  ;;  %8787 = vmatprep.subr.bf16.mxu0 %v9386_v0  ;;  %v9424_v41 = vld [vmem:[%s12070_s9 + $0x298] sm:$0xff]   ;;  %v9425_v42 = vld [vmem:[%s12070_s9 + $0x250] sm:$0xff]  }
 0x6ff   :  { %v9426_v0 = vld [vmem:[%s12070_s9 + $0x2d0] sm:$0xff]  }
 0x701   :  { %8766 = vmatpush3.bf16.msra.mxu1 %v9387_v2  ;;  %8788 = vmatpush3.bf16.msra.mxu0 %v9388_v3  ;;  %v9427_v2 = vld [vmem:[%s12070_s9 + $0x210] sm:$0xff]  }
 0x702   :  { %8767 = vmatprep.subr.bf16.mxu1 %v9389_v4  ;;  %8789 = vmatprep.subr.bf16.mxu0 %v9390_v10  ;;  %v9428_v3 = vld [vmem:[%s12070_s9 + $0x290] sm:$0xff]   ;;  %v9429_v4 = vld [vmem:[%s12070_s9 + $0x248] sm:$0xff]  }
 0x703   :  { %v9430_v10 = vld [vmem:[%s12070_s9 + $0x2c8] sm:$0xff]  }
 0x705   :  { %8768 = vmatpush3.bf16.msra.mxu1 %v9391_v11  ;;  %8790 = vmatpush3.bf16.msra.mxu0 %v9392_v14  ;;  %v9431_v11 = vld [vmem:[%s12070_s9 + $0x208] sm:$0xff]  }
 0x706   :  { %8769 = vmatprep.subr.bf16.mxu1 %v9393_v15  ;;  %8791 = vmatprep.subr.bf16.mxu0 %v9394_v16  ;;  %v9432_v14 = vld [vmem:[%s12070_s9 + $0x288] sm:$0xff]   ;;  %v9433_v15 = vld [vmem:[%s12070_s9 + $0x240] sm:$0xff]  }
 0x707   :  { %v9434_v16 = vld [vmem:[%s12070_s9 + $0x2c0] sm:$0xff]  }
 0x709   :  { %8770 = vmatpush3.bf16.msra.mxu1 %v9395_v17  ;;  %8792 = vmatpush3.bf16.msra.mxu0 %v9396_v18  ;;  %v9435_v17 = vld [vmem:[%s12070_s9 + $0x200] sm:$0xff]  }
 0x70a   :  { %8771 = vmatprep.subr.bf16.mxu1 %v9397_v19  ;;  %8793 = vmatprep.subr.bf16.mxu0 %v9398_v20  ;;  %v9436_v18 = vld [vmem:[%s12070_s9 + $0x280] sm:$0xff]  }
 0x70d   :  { %8772 = vmatpush3.bf16.msra.mxu1 %v9399_v22  ;;  %8794 = vmatpush3.bf16.msra.mxu0 %v9400_v23 }
 0x70e   :  { %8773 = vmatprep.subr.bf16.mxu1 %v9401_v25  ;;  %8795 = vmatprep.subr.bf16.mxu0 %v9402_v12 }
 0x711   :  { %8774 = vmatpush3.bf16.msra.mxu1 %v9403_v32  ;;  %8796 = vmatpush3.bf16.msra.mxu0 %v9404_v28 }
 0x712   :  { %8803 = vmatprep.subr.bf16.mxu1 %v9405_v55  ;;  %8825 = vmatprep.subr.bf16.mxu0 %v9406_v39 }
 0x714   :  { %2072 = vmatmul.mubr.bf16.vlgmr.msra.gmra.mxu1 %v10206_v33  ;;  %2113 = vmatmul.mubr.bf16.vlgmr.msra.gmra.mxu0 %v10208_v34  ;;  %v9414_v33 = vld [vmem:[%s12070_s9 + $0x2e8] sm:$0xff]  }
 0x715   :  { %8804 = vmatpush3.bf16.msra.mxu1 %v9407_v47  ;;  %2345 = vmatprep.mubr.bf16.mxu1 %v1274_v50  ;;  %v9415_v34 = vld [vmem:[%s12070_s9 + $0x228] sm:$0xff]  }
 0x716   :  { %8826 = vmatpush3.bf16.msra.mxu0 %v9408_v48  ;;  %2386 = vmatprep.mubr.bf16.mxu0 %v1276_v35 }
 0x717   :  { %8805 = vmatprep.subr.bf16.mxu1 %v9409_v52  ;;  %8827 = vmatprep.subr.bf16.mxu0 %v9410_v53 }
 0x719   :  { %8806 = vmatpush3.bf16.msra.mxu1 %v9411_v36 }
 0x71a   :  { %8828 = vmatpush3.bf16.msra.mxu0 %v9412_v37  ;;  %8807 = vmatprep.subr.bf16.mxu1 %v9413_v43 }
 0x71b   :  { %8829 = vmatprep.subr.bf16.mxu0 %v9414_v33 }
 0x71d   :  { %8808 = vmatpush3.bf16.msra.mxu1 %v9415_v34 }
 0x71e   :  { %8830 = vmatpush3.bf16.msra.mxu0 %v9416_v44  ;;  %8809 = vmatprep.subr.bf16.mxu1 %v9417_v45 }
 0x71f   :  { %8831 = vmatprep.subr.bf16.mxu0 %v9418_v51 }
 0x721   :  { %8810 = vmatpush3.bf16.msra.mxu1 %v9419_v54 }
 0x722   :  { %8832 = vmatpush3.bf16.msra.mxu0 %v9420_v9  ;;  %8811 = vmatprep.subr.bf16.mxu1 %v9421_v59 }
 0x723   :  { %8833 = vmatprep.subr.bf16.mxu0 %v9422_v62 }
 0x725   :  { %8812 = vmatpush3.bf16.msra.mxu1 %v9423_v63 }
 0x726   :  { %8834 = vmatpush3.bf16.msra.mxu0 %v9424_v41  ;;  %8813 = vmatprep.subr.bf16.mxu1 %v9425_v42 }
 0x727   :  { %8835 = vmatprep.subr.bf16.mxu0 %v9426_v0 }
 0x729   :  { %8814 = vmatpush3.bf16.msra.mxu1 %v9427_v2 }
 0x72a   :  { %8836 = vmatpush3.bf16.msra.mxu0 %v9428_v3  ;;  %8815 = vmatprep.subr.bf16.mxu1 %v9429_v4 }
 0x72b   :  { %8837 = vmatprep.subr.bf16.mxu0 %v9430_v10 }
 0x72d   :  { %8816 = vmatpush3.bf16.msra.mxu1 %v9431_v11 }
 0x72e   :  { %8838 = vmatpush3.bf16.msra.mxu0 %v9432_v14  ;;  %8817 = vmatprep.subr.bf16.mxu1 %v9433_v15 }
 0x72f   :  { %8839 = vmatprep.subr.bf16.mxu0 %v9434_v16 }
 0x731   :  { %8818 = vmatpush3.bf16.msra.mxu1 %v9435_v17 }
 0x732   :  { %8840 = vmatpush3.bf16.msra.mxu0 %v9436_v18  ;;  %9258 = vmatprep.subr.bf16.mxu1 %v9807_v1 }
 0x733   :  { %9266 = vmatprep.subr.bf16.mxu0 %v9807_v1 }
 0x734   :  { %2346 = vmatmul.mubr.bf16.vlgmr.msra.gmra.mxu1 %v10396_v5 }
 0x735   :  { %2387 = vmatmul.mubr.bf16.vlgmr.msra.gmra.mxu0 %v10398_v6  ;;  %9262 = vmatprep.mubr.msk.bf16.mxu1 %vm9808_vm1, %v9807_v1 }
 0x736   :  { %9270 = vmatprep.mubr.msk.bf16.mxu0 %vm9808_vm1, %v9807_v1 }
 0x7b4   :  { %v8731_v19 = vpop.f32.mrf.mxu1  ;;  %v8753_v20 = vpop.f32.mrf.mxu0 }
 0x7b6   :  { %v8732_v21 = vpop.f32.mrf.mxu1  ;;  %v8754_v22 = vpop.f32.mrf.mxu0 }
 0x7b7   :  { %v8733_v29 = vadd.f32 %v8732_v21, %v8731_v19  ;;  %v8755_v55 = vadd.f32 %v8754_v22, %v8753_v20 }
 0x7b8   :  { %v8734_v23 = vpop.f32.mrf.mxu1  ;;  %v8756_v24 = vpop.f32.mrf.mxu0 }
 0x7b9   :  { %v1841_v50 = vadd.f32 %v8755_v55, %v8733_v29 }
 0x7ba   :  { %v8735_v25 = vpop.f32.mrf.mxu1  ;;  %v8757_v12 = vpop.f32.mrf.mxu0 }
 0x7bb   :  { %v8736_v47 = vadd.f32 %v8735_v25, %v8734_v23  ;;  %v8758_v40 = vadd.f32 %v8757_v12, %v8756_v24 }
 0x7bd   :  { %v1844_v45 = vadd.f32 %v8758_v40, %v8736_v47  ;;  %v7660_v47 = vld [vmem:[%s12075_s14] ss:$0 sm:$0xff] }
 0x7d4   :  { %v8775_v26 = vpop.f32.mrf.mxu1  ;;  %v8797_v27 = vpop.f32.mrf.mxu0 }
 0x7d6   :  { %v8776_v13 = vpop.f32.mrf.mxu1  ;;  %v8798_v5 = vpop.f32.mrf.mxu0 }
 0x7d7   :  { %v8777_v39 = vadd.f32 %v8776_v13, %v8775_v26  ;;  %v8799_v43 = vadd.f32 %v8798_v5, %v8797_v27  ;;  %v9438_v26 = vld [vmem:[%s12096_s5 + $0x10] sm:$0xff]  }
 0x7d8   :  { %v8778_v32 = vpop.f32.mrf.mxu1  ;;  %v8800_v6 = vpop.f32.mrf.mxu0 }
 0x7d9   :  { %v2074_v52 = vadd.f32 %v8777_v39, %v10377_v46  ;;  %v7658_v46 = vld [vmem:[%s12071_s10] ss:$0 sm:$0xff] }
 0x7da   :  { %v8779_v28 = vpop.f32.mrf.mxu1  ;;  %v8801_v56 = vpop.f32.mrf.mxu0  ;;  %v7659_v39 = vld [vmem:[%s12074_s13] ss:$0 sm:$0xff] }
 0x7db   :  { %v8780_v53 = vadd.f32 %v8779_v28, %v8778_v32  ;;  %v2115_v54 = vadd.f32 %v8799_v43, %v2074_v52  ;;  %v8802_v41 = vadd.f32 %v8801_v56, %v8800_v6 }
 0x7dd   :  { %v2077_v9 = vadd.f32 %v8780_v53, %v10383_v38  ;;  %v7666_v53 = vld [vmem:[%s12098_s28 + $0x1] ss:$0 sm:$0xff] }
 0x7df   :  { %v2118_v3 = vadd.f32 %v8802_v41, %v2077_v9 }
 0x7f4   :  { %v8819_v30 = vpop.f32.mrf.mxu1 }
 0x7f5   :  { %v8841_v31 = vpop.f32.mrf.mxu0 }
 0x7f6   :  { %v8820_v48 = vpop.f32.mrf.mxu1 }
 0x7f7   :  { %v8821_v35 = vadd.f32 %v8820_v48, %v8819_v30  ;;  %v8842_v36 = vpop.f32.mrf.mxu0 }
 0x7f8   :  { %v8822_v37 = vpop.f32.mrf.mxu1  ;;  %v8843_v34 = vadd.f32 %v8842_v36, %v8841_v31 }
 0x7f9   :  { %v2348_v33 = vadd.f32 %v8821_v35, %v1841_v50  ;;  %v8844_v44 = vpop.f32.mrf.mxu0 }
 0x7fa   :  { %v8823_v51 = vpop.f32.mrf.mxu1 }
 0x7fb   :  { %v2389_v59 = vadd.f32 %v8843_v34, %v2348_v33  ;;  %v8824_v62 = vadd.f32 %v8823_v51, %v8822_v37  ;;  %v8845_v63 = vpop.f32.mrf.mxu0 }
 0x7fc   :  { %v8846_v2 = vadd.f32 %v8845_v63, %v8844_v44 }
 0x7fd   :  { %v2395_v42 = vadd.f32 %v2389_v59, %v2115_v54  ;;  %v2351_v0 = vadd.f32 %v8824_v62, %v1844_v45 }
 0x7ff   :  { %v2392_v4 = vadd.f32 %v8846_v2, %v2351_v0  ;;  %v2404_v10 = vadd.f32 %v7658_v46, %v2395_v42  ;;  %v9439_v2 = vld [vmem:[%s12099_s30 + $0x18] sm:$0xff]  }
 0x800   :  { %9267 = vmatpush3.bf16.msra.mxu0 %v9439_v2 }
 0x801   :  { %v2396_v11 = vadd.f32 %v2392_v4, %v2118_v3  ;;  %v2406_v14 = vadd.f32 %v2404_v10, %v10044_v7  ;;  %v9440_v3 = vld [vmem:[%s12099_s30 + $0x10] sm:$0xff]   ;;  %9268 = vmatprep.subr.bf16.mxu0 %v9807_v1 }
 0x803   :  { %v2410_v15 = vsel %vm152_vm2, %v2406_v14, 0.0  ;;  %v2405_v38 = vadd.f32 %v7658_v46, %v2396_v11 }
 0x804   :  { %2411 = vadd.xlane.f32.xlu0 %v2410_v15  ;;  %9269 = vmatpush3.bf16.msra.mxu0 %v9440_v3  ;;  %v7690_v3 = vld [vmem:[%s12068_s7 + $0x1c8] sm:$0xff] }
 0x805   :  { %v2407_v16 = vadd.f32 %v2405_v38, %v10046_v8  ;;  %v9437_v8 = vld [vmem:[%s12096_s5 + $0x18] sm:$0xff]  }
 0x806   :  { %9259 = vmatpush3.bf16.msra.mxu1 %v9437_v8 }
 0x807   :  { %v2413_v17 = vsel %vm152_vm2, %v2407_v16, 0.0  ;;  %9260 = vmatprep.subr.bf16.mxu1 %v9807_v1 }
 0x808   :  { %2414 = vadd.xlane.f32.xlu0 %v2413_v17 }
 0x80a   :  { %9261 = vmatpush3.bf16.msra.mxu1 %v9438_v26 }
 0x88d   :  { %v2412_v18 = vpop.xlane.xlu0 %2411 }
 0x88e   :  { %v2416_v19 = vmul.f32 0.03125, %v2412_v18 }
 0x890   :  { %v2418_v20 = vsub.f32 %v2406_v14, %v2416_v19 }
 0x891   :  { %v2415_v21 = vpop.xlane.xlu0 %2414 }
 0x892   :  { %v2417_v22 = vmul.f32 0.03125, %v2415_v21  ;;  %v2420_v23 = vmul.f32 %v2418_v20, %v2418_v20 }
 0x894   :  { %v2419_v24 = vsub.f32 %v2407_v16, %v2417_v22  ;;  %v2422_v25 = vsel %vm152_vm2, %v2420_v23, 0.0 }
 0x895   :  { %2423 = vadd.xlane.f32.xlu0 %v2422_v25 }
 0x896   :  { %v2421_v7 = vmul.f32 %v2419_v24, %v2419_v24 }
 0x898   :  { %v2425_v12 = vsel %vm152_vm2, %v2421_v7, 0.0 }
 0x899   :  { %2426 = vadd.xlane.f32.xlu0 %v2425_v12 }
 0x91e   :  { %v2424_v27 = vpop.xlane.xlu0 %2423 }
 0x91f   :  { %v2428_v13 = vmul.f32 0.03125, %v2424_v27 }
 0x921   :  { %v2430_v5 = vadd.f32 1e-05, %v2428_v13 }
 0x922   :  { %v2427_v32 = vpop.xlane.xlu0 %2426 }
 0x923   :  { %9741 = vrsqrt.f32 %v2430_v5  ;;  %v2429_v6 = vmul.f32 0.03125, %v2427_v32 }
 0x925   :  { %v2431_v28 = vadd.f32 1e-05, %v2429_v6 }
 0x927   :  { %9743 = vrsqrt.f32 %v2431_v28 }
 0x930   :  { %v9742_v29 = vpop.eup %9741 }
 0x931   :  { %v2434_v55 = vmul.f32 %v9742_v29, %v2418_v20 }
 0x933   :  { %v2442_v31 = vmul.f32 %v7659_v39, %v2434_v55 }
 0x934   :  { %v9744_v56 = vpop.eup %9743 }
 0x935   :  { %v2435_v30 = vmul.f32 %v9744_v56, %v2419_v24  ;;  %v10634_v48 = vadd.f32 %v7660_v47, %v2442_v31 }
 0x937   :  { %v2443_v40 = vmul.f32 %v7659_v39, %v2435_v30 }
 0x939   :  { %v10636_v50 = vadd.f32 %v7660_v47, %v2443_v40  ;;  %v7675_v47 = vld [vmem:[%s12067_s6 + $0x1] ss:$0 sm:$0xff] }
 0x93b   :  { %v2452_v52 = vpack.c.bf16 %v10636_v50, %v10634_v48 }
 0x93d   :  { %9263 = vmatmul.mubr.msk.bf16.vlgmr.msra.gmra.mxu1 %vm152_vm2, %v2452_v52 }
 0x93e   :  { %2803 = vmatprep.mubr.bf16.mxu1 %v9811_v49 }
 0x9fd   :  { %v2515_v35 = vpop.f32.mrf.mxu1 }
 0x9fe   :  { %v2516_v36 = vadd.f32 %v7666_v53, %v2515_v35 }
 0x9ff   :  { %v9264_v37 = vpop.f32.mrf.mxu1 }
 0xa00   :  { %2526 = vrot.lane.b32.xlu1 %v2516_v36, %s9809_s29  ;;  %v2522_v44 = vmul.f32 0.17677669, %v2516_v36 }
 0xa01   :  { %v2518_v43 = vpop.f32.mrf.mxu1 }
 0xa02   :  { %v2519_v33 = vadd.f32 %v7666_v53, %v2518_v43 }
 0xa03   :  { %v9265_v34 = vpop.f32.mrf.mxu1 }
 0xa04   :  { %2528 = vrot.lane.b32.xlu0 %v2519_v33, %s9809_s29  ;;  %v2523_v54 = vmul.f32 0.17677669, %v2519_v33 }
 0xa72   :  { %v2527_v45 = vpop.permute.xlu1 %2526 }
 0xa73   :  { %v2532_v51 = vmul.f32 %v2527_v45, %v2522_v44  ;;  %v2541_v46 = vmul.f32 %v2527_v45, %v2523_v54 }
 0xa75   :  { %v2534_v9 = vsel %vm152_vm2, %v2532_v51, 0.0  ;;  %v2545_v0 = vsel %vm152_vm2, %v2541_v46, 0.0 }
 0xa76   :  { %2535 = vadd.xlane.f32.xlu1 %v2534_v9  ;;  %v2529_v59 = vpop.permute.xlu0 %2528 }
 0xa77   :  { %v2533_v62 = vmul.f32 %v2529_v59, %v2523_v54  ;;  %v2540_v63 = vmul.f32 %v2529_v59, %v2522_v44 }
 0xa79   :  { %v2542_v41 = vsel %vm152_vm2, %v2540_v63, 0.0  ;;  %v2537_v42 = vsel %vm152_vm2, %v2533_v62, 0.0 }
 0xa7a   :  { %2543 = vadd.xlane.f32.xlu1 %v2542_v41  ;;  %2538 = vadd.xlane.f32.xlu0 %v2537_v42  ;;  %v7689_v42 = vld [vmem:[%s12068_s7 + $0x1c0] sm:$0xff] }
 0xa7e   :  { %2546 = vadd.xlane.f32.xlu0 %v2545_v0  ;;  %v7688_v0 = vld [vmem:[%s12068_s7 + $0x188] sm:$0xff] }
 0xaff   :  { %v2536_v4 = vpop.xlane.xlu1 %2535 }
 0xb03   :  { %v2544_v10 = vpop.xlane.xlu1 %2543  ;;  %v2539_v11 = vpop.xlane.xlu0 %2538 }
 0xb04   :  { %v2548_v14 = vmax.f32 %v2536_v4, %v2544_v10 }
 0xb06   :  { %v2550_v15 = vsub.f32 %v2536_v4, %v2548_v14  ;;  %v2556_v38 = vsub.f32 %v2544_v10, %v2548_v14  ;;  %v7698_v10 = vcombine.low %v7688_v0, %v7690_v3  ;;  %v7683_v14 = vld [vmem:[%s12068_s7 + $0x100] sm:$0xff] }
 0xb07   :  { %v2547_v16 = vpop.xlane.xlu0 %2546 }
 0xb08   :  { %v2552_v17 = vmul.f32 1.442695, %v2550_v15  ;;  %v2558_v18 = vmul.f32 1.442695, %v2556_v38  ;;  %v2549_v19 = vmax.f32 %v2539_v11, %v2547_v16  ;;  %v7685_v15 = vld [vmem:[%s12068_s7 + $0x140] sm:$0xff]  ;;  %v7684_v38 = vld [vmem:[%s12068_s7 + $0x108] sm:$0xff] }
 0xb0a   :  { %9745 = vpow2.f32 %v2552_v17  ;;  %v2551_v20 = vsub.f32 %v2539_v11, %v2549_v19  ;;  %v2557_v21 = vsub.f32 %v2547_v16, %v2549_v19  ;;  %v7699_v11 = vcombine.high %v7688_v0, %v7690_v3  ;;  %v7686_v17 = vld [vmem:[%s12068_s7 + $0x148] sm:$0xff]  ;;  %v9455_v3 = vld [vmem:[%s12070_s9 + $0x5e0] sm:$0xff]  }
 0xb0b   :  { %9747 = vpow2.f32 %v2558_v18  ;;  %v7693_v16 = vcombine.high %v7683_v14, %v7685_v15  ;;  %v7692_v18 = vcombine.low %v7683_v14, %v7685_v15  ;;  %v7694_v19 = vcombine.low %v7684_v38, %v7686_v17  ;;  %v9452_v0 = vld [vmem:[%s12070_s9 + $0x5a8] sm:$0xff]   ;;  %v9459_v14 = vld [vmem:[%s12070_s9 + $0x5d8] sm:$0xff]  }
 0xb0c   :  { %v2554_v22 = vmul.f32 1.442695, %v2551_v20  ;;  %v2560_v23 = vmul.f32 1.442695, %v2557_v21  ;;  %2826 = vmatprep.subr.bf16.mxu0 %v7699_v11  ;;  %v7695_v20 = vcombine.high %v7684_v38, %v7686_v17  ;;  %v7770_v21 = vld [vmem:[%s12068_s7 + $0x190] sm:$0xff]  ;;  %v9457_v11 = vld [vmem:[%s12070_s9 + $0x558] sm:$0xff]  }
 0xb0d   :  { %v9458_v15 = vld [vmem:[%s12070_s9 + $0x518] sm:$0xff]   ;;  %v9463_v17 = vld [vmem:[%s12070_s9 + $0x5d0] sm:$0xff]  }
 0xb0e   :  { %9749 = vpow2.f32 %v2554_v22  ;;  %v7772_v22 = vld [vmem:[%s12068_s7 + $0x1d0] sm:$0xff]  ;;  %v9460_v38 = vld [vmem:[%s12070_s9 + $0x598] sm:$0xff]  }
 0xb0f   :  { %9751 = vpow2.f32 %v2560_v23  ;;  %v7771_v23 = vld [vmem:[%s12068_s7 + $0x198] sm:$0xff] }
 0xb17   :  { %v9746_v24 = vpop.eup %9745 }
 0xb18   :  { %v9748_v25 = vpop.eup %9747  ;;  %v2566_v27 = vmul.f32 %v9746_v24, %v2516_v36 }
 0xb19   :  { %v2562_v7 = vadd.f32 %v9748_v25, %v9746_v24  ;;  %v2568_v5 = vmul.f32 %v9748_v25, %v2519_v33  ;;  %v7779_v24 = vcombine.low %v7770_v21, %v7772_v22  ;;  %v7780_v25 = vcombine.high %v7770_v21, %v7772_v22  ;;  %v9467_v21 = vld [vmem:[%s12070_s9 + $0x5c8] sm:$0xff]  }
 0xb1a   :  { %v9466_v22 = vld [vmem:[%s12070_s9 + $0x508] sm:$0xff]  }
 0xb1b   :  { %v9750_v12 = vpop.eup %9749  ;;  %9753 = vrcp.f32 %v2562_v7  ;;  %v2570_v28 = vadd.f32 %v2568_v5, %v2566_v27  ;;  %v7773_v7 = vld [vmem:[%s12068_s7 + $0x1d8] sm:$0xff] }
 0xb1c   :  { %v9752_v8 = vpop.eup %9751  ;;  %v2567_v13 = vmul.f32 %v9750_v12, %v2519_v33 }
 0xb1d   :  { %v2563_v26 = vadd.f32 %v9752_v8, %v9750_v12  ;;  %v2569_v32 = vmul.f32 %v9752_v8, %v2516_v36  ;;  %v7781_v12 = vcombine.low %v7771_v23, %v7773_v7  ;;  %v7782_v8 = vcombine.high %v7771_v23, %v7773_v7  ;;  %v9468_v23 = vld [vmem:[%s12070_s9 + $0x588] sm:$0xff]   ;;  %v9470_v7 = vld [vmem:[%s12070_s9 + $0x500] sm:$0xff]  }
 0xb1f   :  { %9755 = vrcp.f32 %v2563_v26  ;;  %v2571_v29 = vadd.f32 %v2569_v32, %v2567_v13 }
 0xb28   :  { %v9754_v6 = vpop.eup %9753 }
 0xb29   :  { %v2572_v39 = vmul.f32 %v9754_v6, %v2570_v28 }
 0xb2c   :  { %v9756_v55 = vpop.eup %9755 }
 0xb2d   :  { %v2573_v56 = vmul.f32 %v9756_v55, %v2571_v29  ;;  %v7681_v55 = vld [vmem:[%s12072_s11 + $0x1] ss:$0 sm:$0xff] }
 0xb2f   :  { %v2574_v30 = vpack.c.bf16 %v2573_v56, %v2572_v39 }
 0xb31   :  { %2589 = vrot.lane.b32.xlu1 %v2574_v30, %s9810_s1 }
 0xba3   :  { %v2590_v31 = vpop.permute.xlu1 %2589 }
 0xba4   :  { %9271 = vmatmul.mubr.msk.bf16.vlgmr.msra.gmra.mxu0 %vm152_vm2, %v2590_v31  ;;  %v7682_v31 = vld [vmem:[%s12073_s12 + $0x1] ss:$0 sm:$0xff] }
 0xba5   :  { %2846 = vmatprep.mubr.bf16.mxu0 %v9811_v49  ;;  %2827 = vmatpush1.bf16.msra.mxu0 %v7698_v10  ;;  %v9456_v10 = vld [vmem:[%s12070_s9 + $0x5a0] sm:$0xff]  }
 0xba6   :  { %2828 = vmatprep.subr.bf16.mxu0 %v7695_v20  ;;  %v9465_v20 = vld [vmem:[%s12070_s9 + $0x548] sm:$0xff]  }
 0xba9   :  { %2829 = vmatpush1.bf16.msra.mxu0 %v7694_v19  ;;  %v9464_v19 = vld [vmem:[%s12070_s9 + $0x590] sm:$0xff]  }
 0xbaa   :  { %3059 = vmatprep.subr.bf16.mxu0 %v7782_v8  ;;  %v10841_v8 = vld [vmem:[%s12068_s7 + $0x1a0] sm:$0xff] }
 0xc64   :  { %v2640_v40 = vpop.f32.mrf.mxu0 }
 0xc65   :  { %v2641_v52 = vadd.f32 %v7675_v47, %v2640_v40  ;;  %v7766_v40 = vld [vmem:[%s12068_s7 + $0x110] sm:$0xff] }
 0xc66   :  { %v9272_v53 = vpop.f32.mrf.mxu0 }
 0xc67   :  { %v2647_v35 = vadd.f32 %v2641_v52, %v10634_v48  ;;  %v7768_v52 = vld [vmem:[%s12068_s7 + $0x150] sm:$0xff]  ;;  %v7767_v53 = vld [vmem:[%s12068_s7 + $0x118] sm:$0xff] }
 0xc68   :  { %v2643_v36 = vpop.f32.mrf.mxu0 }
 0xc69   :  { %v2644_v37 = vadd.f32 %v7675_v47, %v2643_v36  ;;  %v2653_v43 = vsel %vm152_vm2, %v2647_v35, 0.0 }
 0xc6a   :  { %2654 = vadd.xlane.f32.xlu0 %v2653_v43  ;;  %v9273_v33 = vpop.f32.mrf.mxu0 }
 0xc6b   :  { %v2648_v34 = vadd.f32 %v2644_v37, %v10636_v50  ;;  %v7687_v50 = vld [vmem:[%s12068_s7 + $0x180] sm:$0xff]  ;;  %v7776_v33 = vcombine.high %v7766_v40, %v7768_v52 }
 0xc6c   :  { %v7697_v2 = vcombine.high %v7687_v50, %v7689_v42  ;;  %v7696_v4 = vcombine.low %v7687_v50, %v7689_v42  ;;  %v9451_v50 = vld [vmem:[%s12070_s9 + $0x5e8] sm:$0xff]  }
 0xc6d   :  { %v2656_v44 = vsel %vm152_vm2, %v2648_v34, 0.0  ;;  %v9450_v42 = vld [vmem:[%s12070_s9 + $0x528] sm:$0xff]  }
 0xc6e   :  { %2657 = vadd.xlane.f32.xlu0 %v2656_v44  ;;  %2783 = vmatprep.subr.bf16.mxu1 %v7697_v2  ;;  %v7775_v44 = vcombine.low %v7766_v40, %v7768_v52  ;;  %v9453_v2 = vld [vmem:[%s12070_s9 + $0x560] sm:$0xff]  }
 0xc6f   :  { %2784 = vmatpush1.bf16.msra.mxu1 %v7696_v4  ;;  %v9454_v4 = vld [vmem:[%s12070_s9 + $0x520] sm:$0xff]  }
 0xc70   :  { %2785 = vmatprep.subr.bf16.mxu1 %v7693_v16  ;;  %v9461_v16 = vld [vmem:[%s12070_s9 + $0x550] sm:$0xff]  }
 0xc73   :  { %2786 = vmatpush1.bf16.msra.mxu1 %v7692_v18  ;;  %v9462_v18 = vld [vmem:[%s12070_s9 + $0x510] sm:$0xff]  }
 0xc74   :  { %3016 = vmatprep.subr.bf16.mxu1 %v7780_v25  ;;  %v9471_v25 = vld [vmem:[%s12070_s9 + $0x5c0] sm:$0xff]  }
 0xcf3   :  { %v2655_v45 = vpop.xlane.xlu0 %2654 }
 0xcf4   :  { %v2659_v51 = vmul.f32 0.03125, %v2655_v45 }
 0xcf6   :  { %v2661_v54 = vsub.f32 %v2647_v35, %v2659_v51  ;;  %v7769_v35 = vld [vmem:[%s12068_s7 + $0x158] sm:$0xff] }
 0xcf7   :  { %v2658_v9 = vpop.xlane.xlu0 %2657  ;;  %v7777_v45 = vcombine.low %v7767_v53, %v7769_v35  ;;  %v9441_v51 = vld [vmem:[%s12070_s9 + $0x578] sm:$0xff]  }
 0xcf8   :  { %v2660_v59 = vmul.f32 0.03125, %v2658_v9  ;;  %v2663_v62 = vmul.f32 %v2661_v54, %v2661_v54  ;;  %v9442_v9 = vld [vmem:[%s12070_s9 + $0x538] sm:$0xff]  }
 0xcfa   :  { %v2662_v63 = vsub.f32 %v2648_v34, %v2660_v59  ;;  %v2665_v48 = vsel %vm152_vm2, %v2663_v62, 0.0  ;;  %v7778_v34 = vcombine.high %v7767_v53, %v7769_v35  ;;  %v9444_v59 = vld [vmem:[%s12070_s9 + $0x5b8] sm:$0xff]   ;;  %v9445_v62 = vld [vmem:[%s12070_s9 + $0x570] sm:$0xff]  }
 0xcfb   :  { %2666 = vadd.xlane.f32.xlu0 %v2665_v48  ;;  %v9446_v48 = vld [vmem:[%s12070_s9 + $0x530] sm:$0xff]  }
 0xcfc   :  { %v2664_v46 = vmul.f32 %v2662_v63, %v2662_v63 }
 0xcfe   :  { %v2668_v41 = vsel %vm152_vm2, %v2664_v46, 0.0  ;;  %v9448_v46 = vld [vmem:[%s12070_s9 + $0x5b0] sm:$0xff]  }
 0xcff   :  { %2669 = vadd.xlane.f32.xlu0 %v2668_v41  ;;  %v9449_v41 = vld [vmem:[%s12070_s9 + $0x568] sm:$0xff]  }
 0xd84   :  { %v2667_v26 = vpop.xlane.xlu0 %2666 }
 0xd85   :  { %v2671_v27 = vmul.f32 0.03125, %v2667_v26  ;;  %v10846_v26 = vld [vmem:[%s12068_s7 + $0x1e0] sm:$0xff] }
 0xd87   :  { %v2673_v13 = vadd.f32 1e-05, %v2671_v27  ;;  %v10851_v27 = vld [vmem:[%s12068_s7 + $0x1a8] sm:$0xff] }
 0xd88   :  { %v2670_v5 = vpop.xlane.xlu0 %2669 }
 0xd89   :  { %9757 = vrsqrt.f32 %v2673_v13  ;;  %v2672_v32 = vmul.f32 0.03125, %v2670_v5  ;;  %v7894_v13 = vcombine.low %v10841_v8, %v10846_v26  ;;  %v7895_v5 = vcombine.high %v10841_v8, %v10846_v26  ;;  %v7966_v8 = vld [vmem:[%s12068_s7 + $0x170] sm:$0xff]  ;;  %v7965_v26 = vld [vmem:[%s12068_s7 + $0x138] sm:$0xff] }
 0xd8b   :  { %v2674_v6 = vadd.f32 1e-05, %v2672_v32  ;;  %v10860_v32 = vld [vmem:[%s12068_s7 + $0x1e8] sm:$0xff] }
 0xd8d   :  { %9759 = vrsqrt.f32 %v2674_v6  ;;  %v7896_v6 = vcombine.low %v10851_v27, %v10860_v32 }
 0xd96   :  { %v9758_v28 = vpop.eup %9757 }
 0xd97   :  { %v2677_v29 = vmul.f32 %v9758_v28, %v2661_v54  ;;  %v9443_v54 = vld [vmem:[%s12070_s9 + $0x5f8] sm:$0xff]   ;;  %v7897_v28 = vcombine.high %v10851_v27, %v10860_v32 }
 0xd98   :  { %v7967_v27 = vld [vmem:[%s12068_s7 + $0x178] sm:$0xff] }
 0xd99   :  { %v2685_v56 = vmul.f32 %v7681_v55, %v2677_v29  ;;  %v7691_v29 = vld [vmem:[%s12069_s8 + $0x10] sm:$0xf] }
 0xd9a   :  { %v9760_v39 = vpop.eup %9759 }
 0xd9b   :  { %v2678_v30 = vmul.f32 %v9760_v39, %v2662_v63  ;;  %v10724_v36 = vadd.f32 %v7682_v31, %v2685_v56  ;;  %v9447_v63 = vld [vmem:[%s12070_s9 + $0x5f0] sm:$0xff]   ;;  %v2719_v39 = vrot.slane %v7691_v29, %v10188_v58 }
 0xd9d   :  { %v2686_v47 = vmul.f32 %v7681_v55, %v2678_v30  ;;  %v2711_v55 = vrot.slane %v7691_v29, %v10186_v57 }
 0xd9f   :  { %v10726_v37 = vadd.f32 %v7682_v31, %v2686_v47  ;;  %v2715_v31 = vrot.slane %v7691_v29, %v10193_v60  ;;  %v2723_v47 = vrot.slane %v7691_v29, %v10195_v61 }
 0xda1   :  { %v10730_v43 = vpack.c.bf16 %v10726_v37, %v10724_v36 }
 0xda3   :  { %7700 = vmatmul.mubr.msk.bf16.vlgmr.msra.gmra.mxu1 %vm152_vm2, %v10730_v43  ;;  %7701 = vmatmul.mubr.msk.bf16.vlgmr.msra.gmra.mxu0 %vm152_vm2, %v10730_v43 }
 0xda4   :  { %3017 = vmatpush1.bf16.msra.mxu1 %v7779_v24  ;;  %3060 = vmatpush1.bf16.msra.mxu0 %v7781_v12  ;;  %v9469_v24 = vld [vmem:[%s12070_s9 + $0x540] sm:$0xff]  }
 0xda5   :  { %3018 = vmatprep.subr.bf16.mxu1 %v7776_v33  ;;  %3061 = vmatprep.subr.bf16.mxu0 %v7778_v34  ;;  %v9472_v12 = vld [vmem:[%s12070_s9 + $0x580] sm:$0xff]  }
 0xda6   :  { %3036 = vmatprep.mubr.bf16.mxu1 %v9811_v49  ;;  %3079 = vmatprep.mubr.bf16.mxu0 %v9811_v49 }
 0xda8   :  { %3019 = vmatpush1.bf16.msra.mxu1 %v7775_v44  ;;  %3062 = vmatpush1.bf16.msra.mxu0 %v7777_v45 }
 0xda9   :  { %8853 = vmatprep.subr.bf16.mxu1 %v9441_v51  ;;  %8875 = vmatprep.subr.bf16.mxu0 %v9443_v54 }
 0xdab   :  { %7783 = vmatmul.mubr.msk.bf16.vlgmr.msra.gmra.mxu1 %vm152_vm2, %v10730_v43  ;;  %7784 = vmatmul.mubr.msk.bf16.vlgmr.msra.gmra.mxu0 %vm152_vm2, %v10730_v43 }
 0xdac   :  { %8854 = vmatpush3.bf16.msra.mxu1 %v9442_v9  ;;  %8876 = vmatpush3.bf16.msra.mxu0 %v9444_v59 }
 0xdad   :  { %8855 = vmatprep.subr.bf16.mxu1 %v9445_v62  ;;  %8877 = vmatprep.subr.bf16.mxu0 %v9447_v63 }
 0xdb0   :  { %8856 = vmatpush3.bf16.msra.mxu1 %v9446_v48  ;;  %8878 = vmatpush3.bf16.msra.mxu0 %v9448_v46 }
 0xdb1   :  { %8857 = vmatprep.subr.bf16.mxu1 %v9449_v41  ;;  %8879 = vmatprep.subr.bf16.mxu0 %v9451_v50 }
 0xdb4   :  { %8858 = vmatpush3.bf16.msra.mxu1 %v9450_v42  ;;  %8880 = vmatpush3.bf16.msra.mxu0 %v9452_v0  ;;  %v7774_v42 = vld [vmem:[%s12069_s8 + $0x14] sm:$0xf] }
 0xdb5   :  { %8859 = vmatprep.subr.bf16.mxu1 %v9453_v2  ;;  %8881 = vmatprep.subr.bf16.mxu0 %v9455_v3 }
 0xdb8   :  { %8860 = vmatpush3.bf16.msra.mxu1 %v9454_v4  ;;  %8882 = vmatpush3.bf16.msra.mxu0 %v9456_v10  ;;  %v2951_v10 = vrot.slane %v7774_v42, %v10193_v60 }
 0xdb9   :  { %8861 = vmatprep.subr.bf16.mxu1 %v9457_v11  ;;  %8883 = vmatprep.subr.bf16.mxu0 %v9459_v14  ;;  %v2959_v11 = vrot.slane %v7774_v42, %v10195_v61 }
 0xdbc   :  { %8862 = vmatpush3.bf16.msra.mxu1 %v9458_v15  ;;  %8884 = vmatpush3.bf16.msra.mxu0 %v9460_v38 }
 0xdbd   :  { %8863 = vmatprep.subr.bf16.mxu1 %v9461_v16  ;;  %8885 = vmatprep.subr.bf16.mxu0 %v9463_v17  ;;  %v2947_v17 = vrot.slane %v7774_v42, %v10186_v57 }
 0xdc0   :  { %8864 = vmatpush3.bf16.msra.mxu1 %v9462_v18  ;;  %8886 = vmatpush3.bf16.msra.mxu0 %v9464_v19  ;;  %v2955_v18 = vrot.slane %v7774_v42, %v10188_v58  ;;  %v7969_v42 = vld [vmem:[%s12068_s7 + $0x1b8] sm:$0xff] }
 0xdc1   :  { %8865 = vmatprep.subr.bf16.mxu1 %v9465_v20  ;;  %8887 = vmatprep.subr.bf16.mxu0 %v9467_v21 }
 0xdc4   :  { %8866 = vmatpush3.bf16.msra.mxu1 %v9466_v22  ;;  %8888 = vmatpush3.bf16.msra.mxu0 %v9468_v23 }
 0xdc5   :  { %8867 = vmatprep.subr.bf16.mxu1 %v9469_v24  ;;  %8889 = vmatprep.subr.bf16.mxu0 %v9471_v25 }
 0xdc8   :  { %8868 = vmatpush3.bf16.msra.mxu1 %v9470_v7  ;;  %8890 = vmatpush3.bf16.msra.mxu0 %v9472_v12 }
 0xdc9   :  { %3522 = vmatprep.subr.bf16.mxu1 %v7895_v5  ;;  %3565 = vmatprep.subr.bf16.mxu0 %v7897_v28 }
 0xe63   :  { %v2805_v56 = vpop.f32.mrf.mxu1  ;;  %v2848_v30 = vpop.f32.mrf.mxu0 }
 0xe64   :  { %v2806_v40 = vadd.f32 %v2805_v56, %v2711_v55  ;;  %v2849_v52 = vadd.f32 %v2848_v30, %v2719_v39 }
 0xe65   :  { %v2807_v53 = vpop.f32.mrf.mxu1  ;;  %v2850_v35 = vpop.f32.mrf.mxu0 }
 0xe66   :  { %v2808_v33 = vadd.f32 %v2807_v53, %v2715_v31  ;;  %v2851_v34 = vadd.f32 %v2850_v35, %v2723_v47  ;;  %v2857_v9 = vmax.f32 %v2806_v40, 0.0  ;;  %v2859_v59 = vmax.f32 %v2849_v52, 0.0  ;;  %v7881_v40 = vld [vmem:[%s12068_s7 + $0x120] sm:$0xff] }
 0xe67   :  { %v2809_v44 = vpop.f32.mrf.mxu1  ;;  %v2852_v45 = vpop.f32.mrf.mxu0  ;;  %v7883_v52 = vld [vmem:[%s12068_s7 + $0x160] sm:$0xff] }
 0xe68   :  { %v2810_v51 = vadd.f32 %v2809_v44, %v2711_v55  ;;  %v2853_v54 = vadd.f32 %v2852_v45, %v2719_v39  ;;  %v2858_v0 = vmax.f32 %v2808_v33, 0.0  ;;  %v2860_v2 = vmax.f32 %v2851_v34, 0.0  ;;  %v7882_v44 = vld [vmem:[%s12068_s7 + $0x128] sm:$0xff] }
 0xe69   :  { %v2811_v62 = vpop.f32.mrf.mxu1  ;;  %v2854_v63 = vpop.f32.mrf.mxu0  ;;  %v7884_v45 = vld [vmem:[%s12068_s7 + $0x168] sm:$0xff] }
 0xe6a   :  { %v2861_v48 = vmax.f32 %v2810_v51, 0.0  ;;  %v2863_v46 = vmax.f32 %v2853_v54, 0.0  ;;  %v2812_v41 = vadd.f32 %v2811_v62, %v2715_v31  ;;  %v2855_v50 = vadd.f32 %v2854_v63, %v2723_v47 }
 0xe6b   :  { %v3038_v3 = vpop.f32.mrf.mxu1  ;;  %v3081_v4 = vpop.f32.mrf.mxu0 }
 0xe6c   :  { %v10878_v14 = vpack.c.bf16 %v2861_v48, %v2857_v9  ;;  %v10880_v15 = vpack.c.bf16 %v2863_v46, %v2859_v59  ;;  %v2862_v38 = vmax.f32 %v2812_v41, 0.0  ;;  %v2864_v16 = vmax.f32 %v2855_v50, 0.0  ;;  %v7968_v41 = vld [vmem:[%s12068_s7 + $0x1b0] sm:$0xff] }
 0xe6d   :  { %v3040_v19 = vpop.f32.mrf.mxu1  ;;  %v3083_v20 = vpop.f32.mrf.mxu0  ;;  %v3039_v28 = vadd.f32 %v3038_v3, %v2947_v17  ;;  %v3082_v29 = vadd.f32 %v3081_v4, %v2955_v18  ;;  %v7891_v48 = vcombine.high %v7881_v40, %v7883_v52  ;;  %v7893_v46 = vcombine.high %v7882_v44, %v7884_v45  ;;  %v7970_v50 = vld [vmem:[%s12068_s7 + $0x1f0] sm:$0xff] }
 0xe6e   :  { %v10884_v21 = vpack.c.bf16 %v2862_v38, %v2858_v0  ;;  %v10886_v22 = vpack.c.bf16 %v2864_v16, %v2860_v2  ;;  %v3041_v25 = vadd.f32 %v3040_v19, %v2951_v10  ;;  %v3084_v7 = vadd.f32 %v3083_v20, %v2959_v11  ;;  %v7971_v0 = vld [vmem:[%s12068_s7 + $0x1f8] sm:$0xff] }
 0xe6f   :  { %v3042_v23 = vpop.f32.mrf.mxu1  ;;  %v3085_v24 = vpop.f32.mrf.mxu0  ;;  %v3090_v51 = vmax.f32 %v3039_v28, 0.0  ;;  %v3092_v54 = vmax.f32 %v3082_v29, 0.0  ;;  %v7890_v2 = vcombine.low %v7881_v40, %v7883_v52  ;;  %v7892_v3 = vcombine.low %v7882_v44, %v7884_v45  ;;  %v9474_v19 = vld [vmem:[%s12070_s9 + $0x7f8] sm:$0xff]   ;;  %v9483_v28 = vld [vmem:[%s12070_s9 + $0x728] sm:$0xff]  }
 0xe70   :  { %v3043_v12 = vadd.f32 %v3042_v23, %v2947_v17  ;;  %v3086_v5 = vadd.f32 %v3085_v24, %v2955_v18  ;;  %v3091_v53 = vmax.f32 %v3041_v25, 0.0  ;;  %v3093_v35 = vmax.f32 %v3084_v7, 0.0  ;;  %v9473_v18 = vld [vmem:[%s12070_s9 + $0x778] sm:$0xff]   ;;  %v9477_v24 = vld [vmem:[%s12070_s9 + $0x770] sm:$0xff]   ;;  %v9484_v29 = vld [vmem:[%s12070_s9 + $0x7a8] sm:$0xff]  }
 0xe71   :  { %v3044_v55 = vpop.f32.mrf.mxu1  ;;  %v3087_v39 = vpop.f32.mrf.mxu0  ;;  %v7978_v4 = vcombine.high %v7968_v41, %v7970_v50  ;;  %v7979_v32 = vcombine.low %v7969_v42, %v7971_v0  ;;  %v7976_v38 = vcombine.high %v7965_v26, %v7967_v27  ;;  %v7975_v17 = vcombine.low %v7965_v26, %v7967_v27  ;;  %v9475_v20 = vld [vmem:[%s12070_s9 + $0x738] sm:$0xff]   ;;  %v9478_v25 = vld [vmem:[%s12070_s9 + $0x7f0] sm:$0xff]   ;;  %v9497_v44 = vld [vmem:[%s12070_s9 + $0x748] sm:$0xff]  }
 0xe72   :  { %v3045_v56 = vadd.f32 %v3044_v55, %v2951_v10  ;;  %v3088_v30 = vadd.f32 %v3087_v39, %v2959_v11  ;;  %v3094_v31 = vmax.f32 %v3043_v12, 0.0  ;;  %v3096_v47 = vmax.f32 %v3086_v5, 0.0  ;;  %v7964_v11 = vld [vmem:[%s12068_s7 + $0x130] sm:$0xff]  ;;  %v9476_v23 = vld [vmem:[%s12070_s9 + $0x7b8] sm:$0xff]   ;;  %v9482_v5 = vld [vmem:[%s12070_s9 + $0x7e8] sm:$0xff]  }
 0xe73   :  { %v7980_v10 = vcombine.high %v7969_v42, %v7971_v0  ;;  %v7973_v16 = vcombine.low %v7964_v11, %v7966_v8  ;;  %v9479_v7 = vld [vmem:[%s12070_s9 + $0x730] sm:$0xff]   ;;  %v9485_v55 = vld [vmem:[%s12070_s9 + $0x760] sm:$0xff]   ;;  %v9491_v40 = vld [vmem:[%s12070_s9 + $0x718] sm:$0xff]  }
 0xe74   :  { %v3095_v33 = vmax.f32 %v3045_v56, 0.0  ;;  %v3097_v34 = vmax.f32 %v3088_v30, 0.0  ;;  %v3098_v62 = vpack.c.bf16 %v3094_v31, %v3090_v51  ;;  %v3100_v63 = vpack.c.bf16 %v3096_v47, %v3092_v54  ;;  %v9480_v12 = vld [vmem:[%s12070_s9 + $0x7b0] sm:$0xff]   ;;  %v9486_v39 = vld [vmem:[%s12070_s9 + $0x7e0] sm:$0xff]   ;;  %v9489_v31 = vld [vmem:[%s12070_s9 + $0x758] sm:$0xff]  }
 0xe75   :  { %v9487_v56 = vld [vmem:[%s12070_s9 + $0x720] sm:$0xff]   ;;  %v9490_v47 = vld [vmem:[%s12070_s9 + $0x7d8] sm:$0xff]   ;;  %v9498_v45 = vld [vmem:[%s12070_s9 + $0x7c8] sm:$0xff]  }
 0xe76   :  { %v3099_v9 = vpack.c.bf16 %v3095_v33, %v3091_v53  ;;  %v3101_v59 = vpack.c.bf16 %v3097_v34, %v3093_v35  ;;  %v9488_v30 = vld [vmem:[%s12070_s9 + $0x7a0] sm:$0xff]   ;;  %v9492_v52 = vld [vmem:[%s12070_s9 + $0x798] sm:$0xff]   ;;  %v9493_v53 = vld [vmem:[%s12070_s9 + $0x750] sm:$0xff]  }
 0xe77   :  { %v9494_v35 = vld [vmem:[%s12070_s9 + $0x7d0] sm:$0xff]   ;;  %v9499_v51 = vld [vmem:[%s12070_s9 + $0x708] sm:$0xff]  }
 0xe78   :  { %3390 = vmatprep.mubr.bf16.mxu1 %v3099_v9  ;;  %3431 = vmatprep.mubr.bf16.mxu0 %v3101_v59  ;;  %v9495_v33 = vld [vmem:[%s12070_s9 + $0x710] sm:$0xff]   ;;  %v9500_v54 = vld [vmem:[%s12070_s9 + $0x788] sm:$0xff]   ;;  %v9501_v9 = vld [vmem:[%s12070_s9 + $0x740] sm:$0xff]  }
 0xe79   :  { %3391 = vmatmul.mubr.bf16.vlgmr.msra.gmra.mxu1 %v3098_v62  ;;  %3432 = vmatmul.mubr.bf16.vlgmr.msra.gmra.mxu0 %v3100_v63  ;;  %v9496_v34 = vld [vmem:[%s12070_s9 + $0x790] sm:$0xff]   ;;  %v9502_v59 = vld [vmem:[%s12070_s9 + $0x7c0] sm:$0xff]  }
 0xe7a   :  { %3523 = vmatpush1.bf16.msra.mxu1 %v7894_v13  ;;  %3566 = vmatpush1.bf16.msra.mxu0 %v7896_v6  ;;  %v7977_v13 = vcombine.low %v7968_v41, %v7970_v50  ;;  %v7974_v6 = vcombine.high %v7964_v11, %v7966_v8  ;;  %v9503_v62 = vld [vmem:[%s12070_s9 + $0x700] sm:$0xff]   ;;  %v11047_v11 = vld [vmem:[%s12069_s8 + $0x18] sm:$0xf] }
 0xe7b   :  { %3524 = vmatprep.subr.bf16.mxu1 %v7891_v48  ;;  %3567 = vmatprep.subr.bf16.mxu0 %v7893_v46  ;;  %v9504_v63 = vld [vmem:[%s12070_s9 + $0x780] sm:$0xff]   ;;  %v9505_v48 = vld [vmem:[%s12070_s9 + $0x478] sm:$0xff]  }
 0xe7c   :  { %3542 = vmatprep.mubr.bf16.mxu1 %v9811_v49  ;;  %3585 = vmatprep.mubr.bf16.mxu0 %v9811_v49  ;;  %v9506_v46 = vld [vmem:[%s12070_s9 + $0x4f8] sm:$0xff]  }
 0xe7e   :  { %3525 = vmatpush1.bf16.msra.mxu1 %v7890_v2  ;;  %3568 = vmatpush1.bf16.msra.mxu0 %v7892_v3 }
 0xe7f   :  { %3754 = vmatprep.subr.bf16.mxu1 %v7978_v4  ;;  %3797 = vmatprep.subr.bf16.mxu0 %v7980_v10 }
 0xe81   :  { %7898 = vmatmul.mubr.msk.bf16.vlgmr.msra.gmra.mxu1 %vm152_vm2, %v10730_v43  ;;  %7899 = vmatmul.mubr.msk.bf16.vlgmr.msra.gmra.mxu0 %vm152_vm2, %v10730_v43 }
 0xe82   :  { %3755 = vmatpush1.bf16.msra.mxu1 %v7977_v13  ;;  %3798 = vmatpush1.bf16.msra.mxu0 %v7979_v32 }
 0xe83   :  { %3756 = vmatprep.subr.bf16.mxu1 %v7974_v6  ;;  %3799 = vmatprep.subr.bf16.mxu0 %v7976_v38  ;;  %v3453_v6 = vrot.slane %v11047_v11, %v10186_v57  ;;  %v3461_v38 = vrot.slane %v11047_v11, %v10188_v58 }
 0xe84   :  { %3774 = vmatprep.mubr.bf16.mxu1 %v9811_v49  ;;  %3817 = vmatprep.mubr.bf16.mxu0 %v9811_v49 }
 0xe86   :  { %3757 = vmatpush1.bf16.msra.mxu1 %v7973_v16  ;;  %3800 = vmatpush1.bf16.msra.mxu0 %v7975_v17 }
 0xe87   :  { %8897 = vmatprep.subr.bf16.mxu1 %v9473_v18  ;;  %8919 = vmatprep.subr.bf16.mxu0 %v9474_v19 }
 0xe89   :  { %7981 = vmatmul.mubr.msk.bf16.vlgmr.msra.gmra.mxu1 %vm152_vm2, %v10730_v43  ;;  %7982 = vmatmul.mubr.msk.bf16.vlgmr.msra.gmra.mxu0 %vm152_vm2, %v10730_v43  ;;  %v9481_v43 = vld [vmem:[%s12070_s9 + $0x768] sm:$0xff]  }
 0xe8a   :  { %8898 = vmatpush3.bf16.msra.mxu1 %v9475_v20  ;;  %8920 = vmatpush3.bf16.msra.mxu0 %v9476_v23 }
 0xe8b   :  { %8899 = vmatprep.subr.bf16.mxu1 %v9477_v24  ;;  %8921 = vmatprep.subr.bf16.mxu0 %v9478_v25 }
 0xe8e   :  { %8900 = vmatpush3.bf16.msra.mxu1 %v9479_v7  ;;  %8922 = vmatpush3.bf16.msra.mxu0 %v9480_v12 }
 0xe8f   :  { %8901 = vmatprep.subr.bf16.mxu1 %v9481_v43  ;;  %8923 = vmatprep.subr.bf16.mxu0 %v9482_v5 }
 0xe92   :  { %8902 = vmatpush3.bf16.msra.mxu1 %v9483_v28  ;;  %8924 = vmatpush3.bf16.msra.mxu0 %v9484_v29 }
 0xe93   :  { %8903 = vmatprep.subr.bf16.mxu1 %v9485_v55  ;;  %8925 = vmatprep.subr.bf16.mxu0 %v9486_v39 }
 0xe96   :  { %8904 = vmatpush3.bf16.msra.mxu1 %v9487_v56  ;;  %8926 = vmatpush3.bf16.msra.mxu0 %v9488_v30  ;;  %v7972_v30 = vld [vmem:[%s12069_s8 + $0x1c] sm:$0xf] }
 0xe97   :  { %8905 = vmatprep.subr.bf16.mxu1 %v9489_v31  ;;  %8927 = vmatprep.subr.bf16.mxu0 %v9490_v47 }
 0xe9a   :  { %8906 = vmatpush3.bf16.msra.mxu1 %v9491_v40  ;;  %8928 = vmatpush3.bf16.msra.mxu0 %v9492_v52 }
 0xe9b   :  { %8907 = vmatprep.subr.bf16.mxu1 %v9493_v53  ;;  %8929 = vmatprep.subr.bf16.mxu0 %v9494_v35  ;;  %v3689_v53 = vrot.slane %v7972_v30, %v10193_v60  ;;  %v3697_v35 = vrot.slane %v7972_v30, %v10195_v61 }
 0xe9e   :  { %8908 = vmatpush3.bf16.msra.mxu1 %v9495_v33  ;;  %8930 = vmatpush3.bf16.msra.mxu0 %v9496_v34  ;;  %v3685_v33 = vrot.slane %v7972_v30, %v10186_v57  ;;  %v3693_v34 = vrot.slane %v7972_v30, %v10188_v58  ;;  %v9519_v30 = vld [vmem:[%s12070_s9 + $0x420] sm:$0xff]  }
 0xe9f   :  { %8909 = vmatprep.subr.bf16.mxu1 %v9497_v44  ;;  %8931 = vmatprep.subr.bf16.mxu0 %v9498_v45 }
 0xea2   :  { %8910 = vmatpush3.bf16.msra.mxu1 %v9499_v51  ;;  %8932 = vmatpush3.bf16.msra.mxu0 %v9500_v54 }
 0xea3   :  { %8911 = vmatprep.subr.bf16.mxu1 %v9501_v9  ;;  %8933 = vmatprep.subr.bf16.mxu0 %v9502_v59 }
 0xea6   :  { %8912 = vmatpush3.bf16.msra.mxu1 %v9503_v62  ;;  %8934 = vmatpush3.bf16.msra.mxu0 %v9504_v63 }
 0xea7   :  { %8941 = vmatprep.subr.bf16.mxu1 %v9505_v48  ;;  %8963 = vmatprep.subr.bf16.mxu0 %v9506_v46 }
 0xf39   :  { %v8869_v41 = vpop.f32.mrf.mxu1  ;;  %v8891_v50 = vpop.f32.mrf.mxu0 }
 0xf3b   :  { %v8870_v42 = vpop.f32.mrf.mxu1  ;;  %v8892_v0 = vpop.f32.mrf.mxu0 }
 0xf3c   :  { %v8871_v2 = vadd.f32 %v8870_v42, %v8869_v41  ;;  %v8893_v3 = vadd.f32 %v8892_v0, %v8891_v50 }
 0xf3d   :  { %v8872_v4 = vpop.f32.mrf.mxu1  ;;  %v8894_v10 = vpop.f32.mrf.mxu0 }
 0xf3e   :  { %v11049_v8 = vadd.f32 %v8893_v3, %v8871_v2 }
 0xf3f   :  { %v8873_v26 = vpop.f32.mrf.mxu1  ;;  %v8895_v27 = vpop.f32.mrf.mxu0 }
 0xf40   :  { %v8874_v13 = vadd.f32 %v8873_v26, %v8872_v4  ;;  %v8896_v32 = vadd.f32 %v8895_v27, %v8894_v10 }
 0xf41   :  { %v3544_v16 = vpop.f32.mrf.mxu1  ;;  %v3587_v17 = vpop.f32.mrf.mxu0 }
 0xf42   :  { %v11055_v18 = vadd.f32 %v8896_v32, %v8874_v13  ;;  %v3545_v23 = vadd.f32 %v3544_v16, %v3453_v6  ;;  %v3588_v24 = vadd.f32 %v3587_v17, %v3461_v38  ;;  %v9507_v16 = vld [vmem:[%s12070_s9 + $0x438] sm:$0xff]  }
 0xf43   :  { %v11057_v19 = vpop.f32.mrf.mxu1  ;;  %v11059_v20 = vpop.f32.mrf.mxu0  ;;  %v9508_v17 = vld [vmem:[%s12070_s9 + $0x4b8] sm:$0xff]  }
 0xf44   :  { %v3596_v29 = vmax.f32 %v3545_v23, 0.0  ;;  %v3598_v55 = vmax.f32 %v3588_v24, 0.0 }
 0xf45   :  { %v3548_v25 = vpop.f32.mrf.mxu1  ;;  %v3591_v7 = vpop.f32.mrf.mxu0 }
 0xf46   :  { %v3549_v12 = vadd.f32 %v3548_v25, %v3453_v6  ;;  %v3592_v43 = vadd.f32 %v3591_v7, %v3461_v38  ;;  %v9509_v25 = vld [vmem:[%s12070_s9 + $0x470] sm:$0xff]  }
 0xf47   :  { %v11061_v5 = vpop.f32.mrf.mxu1  ;;  %v11063_v28 = vpop.f32.mrf.mxu0  ;;  %v9510_v7 = vld [vmem:[%s12070_s9 + $0x4f0] sm:$0xff]  }
 0xf48   :  { %v3600_v39 = vmax.f32 %v3549_v12, 0.0  ;;  %v3602_v56 = vmax.f32 %v3592_v43, 0.0  ;;  %v9511_v12 = vld [vmem:[%s12070_s9 + $0x430] sm:$0xff]  }
 0xf49   :  { %v3776_v31 = vpop.f32.mrf.mxu1  ;;  %v3819_v47 = vpop.f32.mrf.mxu0  ;;  %v9512_v43 = vld [vmem:[%s12070_s9 + $0x4b0] sm:$0xff]  }
 0xf4a   :  { %v11068_v40 = vpack.c.bf16 %v3600_v39, %v3596_v29  ;;  %v11070_v52 = vpack.c.bf16 %v3602_v56, %v3598_v55  ;;  %v3777_v48 = vadd.f32 %v3776_v31, %v3685_v33  ;;  %v3820_v46 = vadd.f32 %v3819_v47, %v3693_v34  ;;  %v9513_v29 = vld [vmem:[%s12070_s9 + $0x468] sm:$0xff]   ;;  %v9518_v56 = vld [vmem:[%s12070_s9 + $0x4e0] sm:$0xff]   ;;  %v9521_v47 = vld [vmem:[%s12070_s9 + $0x458] sm:$0xff]  }
 0xf4b   :  { %v3778_v44 = vpop.f32.mrf.mxu1  ;;  %v3821_v45 = vpop.f32.mrf.mxu0  ;;  %v9514_v55 = vld [vmem:[%s12070_s9 + $0x4e8] sm:$0xff]   ;;  %v9520_v31 = vld [vmem:[%s12070_s9 + $0x4a0] sm:$0xff]  }
 0xf4c   :  { %v3779_v9 = vadd.f32 %v3778_v44, %v3689_v53  ;;  %v3822_v59 = vadd.f32 %v3821_v45, %v3697_v35  ;;  %v3828_v13 = vmax.f32 %v3777_v48, 0.0  ;;  %v3830_v32 = vmax.f32 %v3820_v46, 0.0  ;;  %v9515_v39 = vld [vmem:[%s12070_s9 + $0x428] sm:$0xff]   ;;  %v9526_v44 = vld [vmem:[%s12070_s9 + $0x4d0] sm:$0xff]   ;;  %v9533_v46 = vld [vmem:[%s12070_s9 + $0x440] sm:$0xff]  }
 0xf4d   :  { %v3780_v51 = vpop.f32.mrf.mxu1  ;;  %v3823_v54 = vpop.f32.mrf.mxu0  ;;  %v9527_v45 = vld [vmem:[%s12070_s9 + $0x410] sm:$0xff]   ;;  %v3465_v48 = vrot.slane %v11047_v11, %v10195_v61 }
 0xf4e   :  { %v3781_v62 = vadd.f32 %v3780_v51, %v3685_v33  ;;  %v3824_v63 = vadd.f32 %v3823_v54, %v3693_v34  ;;  %v3829_v4 = vmax.f32 %v3779_v9, 0.0  ;;  %v3831_v10 = vmax.f32 %v3822_v59, 0.0  ;;  %v9524_v33 = vld [vmem:[%s12070_s9 + $0x498] sm:$0xff]   ;;  %v9525_v34 = vld [vmem:[%s12070_s9 + $0x450] sm:$0xff]   ;;  %v9529_v54 = vld [vmem:[%s12070_s9 + $0x448] sm:$0xff]  }
 0xf4f   :  { %v3782_v41 = vpop.f32.mrf.mxu1  ;;  %v3825_v50 = vpop.f32.mrf.mxu0  ;;  %v9528_v51 = vld [vmem:[%s12070_s9 + $0x490] sm:$0xff]   ;;  %v9530_v9 = vld [vmem:[%s12070_s9 + $0x4c8] sm:$0xff]   ;;  %v3457_v59 = vrot.slane %v11047_v11, %v10193_v60  ;;  %v9535_v11 = vld [vmem:[%s12070_s9 + $0x400] sm:$0xff]  }
 0xf50   :  { %v3783_v42 = vadd.f32 %v3782_v41, %v3689_v53  ;;  %v3826_v0 = vadd.f32 %v3825_v50, %v3697_v35  ;;  %v3832_v2 = vmax.f32 %v3781_v62, 0.0  ;;  %v3834_v3 = vmax.f32 %v3824_v63, 0.0  ;;  %v9522_v53 = vld [vmem:[%s12070_s9 + $0x4d8] sm:$0xff]   ;;  %v9531_v62 = vld [vmem:[%s12070_s9 + $0x408] sm:$0xff]   ;;  %v9534_v41 = vld [vmem:[%s12070_s9 + $0x4c0] sm:$0xff]  }
 0xf51   :  { %v9523_v35 = vld [vmem:[%s12070_s9 + $0x418] sm:$0xff]   ;;  %v9532_v63 = vld [vmem:[%s12070_s9 + $0x488] sm:$0xff]   ;;  %v3551_v50 = vadd.f32 %v11061_v5, %v3457_v59 }
 0xf52   :  { %v3833_v26 = vmax.f32 %v3783_v42, 0.0  ;;  %v3835_v27 = vmax.f32 %v3826_v0, 0.0  ;;  %v3836_v23 = vpack.c.bf16 %v3832_v2, %v3828_v13  ;;  %v3838_v24 = vpack.c.bf16 %v3834_v3, %v3830_v32  ;;  %v9536_v2 = vld [vmem:[%s12070_s9 + $0x480] sm:$0xff]   ;;  %v9537_v5 = vld [vmem:[%s12070_s9 + $0x678] sm:$0xff]   ;;  %v9541_v32 = vld [vmem:[%s12070_s9 + $0x670] sm:$0xff]  }
 0xf53   :  { %v3594_v42 = vadd.f32 %v11063_v28, %v3465_v48  ;;  %v3547_v0 = vadd.f32 %v11057_v19, %v3457_v59  ;;  %v3590_v3 = vadd.f32 %v11059_v20, %v3465_v48  ;;  %v9538_v19 = vld [vmem:[%s12070_s9 + $0x6f8] sm:$0xff]   ;;  %v3601_v28 = vmax.f32 %v3551_v50, 0.0 }
 0xf54   :  { %v3837_v6 = vpack.c.bf16 %v3833_v26, %v3829_v4  ;;  %v3839_v38 = vpack.c.bf16 %v3835_v27, %v3831_v10  ;;  %v9539_v26 = vld [vmem:[%s12070_s9 + $0x638] sm:$0xff]  }
 0xf55   :  { %v3603_v4 = vmax.f32 %v3594_v42, 0.0  ;;  %v3597_v10 = vmax.f32 %v3547_v0, 0.0  ;;  %v3599_v20 = vmax.f32 %v3590_v3, 0.0  ;;  %v9540_v27 = vld [vmem:[%s12070_s9 + $0x6b8] sm:$0xff]  }
 0xf56   :  { %4128 = vmatprep.mubr.bf16.mxu1 %v3837_v6  ;;  %4169 = vmatprep.mubr.bf16.mxu0 %v3839_v38  ;;  %v9542_v6 = vld [vmem:[%s12070_s9 + $0x6f0] sm:$0xff]  }
 0xf57   :  { %4129 = vmatmul.mubr.bf16.vlgmr.msra.gmra.mxu1 %v3836_v23  ;;  %4170 = vmatmul.mubr.bf16.vlgmr.msra.gmra.mxu0 %v3838_v24  ;;  %v3605_v13 = vpack.c.bf16 %v3601_v28, %v3597_v10  ;;  %v3607_v38 = vpack.c.bf16 %v3603_v4, %v3599_v20  ;;  %v9545_v23 = vld [vmem:[%s12070_s9 + $0x668] sm:$0xff]  }
 0xf58   :  { %8942 = vmatpush3.bf16.msra.mxu1 %v9507_v16  ;;  %8964 = vmatpush3.bf16.msra.mxu0 %v9508_v17  ;;  %v9543_v16 = vld [vmem:[%s12070_s9 + $0x630] sm:$0xff]   ;;  %v9548_v24 = vld [vmem:[%s12070_s9 + $0x6a8] sm:$0xff]  }
 0xf59   :  { %4402 = vmatprep.mubr.bf16.mxu1 %v10884_v21  ;;  %4443 = vmatprep.mubr.bf16.mxu0 %v10886_v22  ;;  %v9516_v21 = vld [vmem:[%s12070_s9 + $0x4a8] sm:$0xff]   ;;  %v9517_v22 = vld [vmem:[%s12070_s9 + $0x460] sm:$0xff]   ;;  %v9544_v17 = vld [vmem:[%s12070_s9 + $0x6b0] sm:$0xff]  }
 0xf5a   :  { %8943 = vmatprep.subr.bf16.mxu1 %v9509_v25  ;;  %8965 = vmatprep.subr.bf16.mxu0 %v9510_v7  ;;  %v9549_v25 = vld [vmem:[%s12070_s9 + $0x660] sm:$0xff]  }
 0xf5b   :  { %v9550_v7 = vld [vmem:[%s12070_s9 + $0x6e0] sm:$0xff]  }
 0xf5c   :  { %8944 = vmatpush3.bf16.msra.mxu1 %v9511_v12  ;;  %8966 = vmatpush3.bf16.msra.mxu0 %v9512_v43  ;;  %v9551_v12 = vld [vmem:[%s12070_s9 + $0x620] sm:$0xff]  }
 0xf5d   :  { %8945 = vmatprep.subr.bf16.mxu1 %v9513_v29  ;;  %8967 = vmatprep.subr.bf16.mxu0 %v9514_v55  ;;  %v9552_v43 = vld [vmem:[%s12070_s9 + $0x6a0] sm:$0xff]   ;;  %v9553_v29 = vld [vmem:[%s12070_s9 + $0x658] sm:$0xff]  }
 0xf5e   :  { %v9554_v55 = vld [vmem:[%s12070_s9 + $0x6d8] sm:$0xff]  }
 0xf60   :  { %8946 = vmatpush3.bf16.msra.mxu1 %v9515_v39  ;;  %8968 = vmatpush3.bf16.msra.mxu0 %v9516_v21  ;;  %v9555_v39 = vld [vmem:[%s12070_s9 + $0x618] sm:$0xff]  }
 0xf61   :  { %8947 = vmatprep.subr.bf16.mxu1 %v9517_v22  ;;  %8969 = vmatprep.subr.bf16.mxu0 %v9518_v56  ;;  %v9556_v21 = vld [vmem:[%s12070_s9 + $0x698] sm:$0xff]   ;;  %v9557_v22 = vld [vmem:[%s12070_s9 + $0x650] sm:$0xff]  }
 0xf62   :  { %v9558_v56 = vld [vmem:[%s12070_s9 + $0x6d0] sm:$0xff]  }
 0xf64   :  { %8948 = vmatpush3.bf16.msra.mxu1 %v9519_v30  ;;  %8970 = vmatpush3.bf16.msra.mxu0 %v9520_v31  ;;  %v9559_v30 = vld [vmem:[%s12070_s9 + $0x610] sm:$0xff]  }
 0xf65   :  { %8949 = vmatprep.subr.bf16.mxu1 %v9521_v47  ;;  %8971 = vmatprep.subr.bf16.mxu0 %v9522_v53  ;;  %v9560_v31 = vld [vmem:[%s12070_s9 + $0x690] sm:$0xff]   ;;  %v9561_v47 = vld [vmem:[%s12070_s9 + $0x648] sm:$0xff]  }
 0xf66   :  { %v9562_v53 = vld [vmem:[%s12070_s9 + $0x6c8] sm:$0xff]  }
 0xf68   :  { %8950 = vmatpush3.bf16.msra.mxu1 %v9523_v35  ;;  %8972 = vmatpush3.bf16.msra.mxu0 %v9524_v33  ;;  %v9563_v35 = vld [vmem:[%s12070_s9 + $0x608] sm:$0xff]  }
 0xf69   :  { %8951 = vmatprep.subr.bf16.mxu1 %v9525_v34  ;;  %8973 = vmatprep.subr.bf16.mxu0 %v9526_v44  ;;  %v9564_v33 = vld [vmem:[%s12070_s9 + $0x688] sm:$0xff]   ;;  %v9565_v34 = vld [vmem:[%s12070_s9 + $0x640] sm:$0xff]  }
 0xf6a   :  { %v9566_v44 = vld [vmem:[%s12070_s9 + $0x6c0] sm:$0xff]  }
 0xf6c   :  { %8952 = vmatpush3.bf16.msra.mxu1 %v9527_v45  ;;  %8974 = vmatpush3.bf16.msra.mxu0 %v9528_v51  ;;  %v9567_v45 = vld [vmem:[%s12070_s9 + $0x600] sm:$0xff]  }
 0xf6d   :  { %8953 = vmatprep.subr.bf16.mxu1 %v9529_v54  ;;  %8975 = vmatprep.subr.bf16.mxu0 %v9530_v9  ;;  %v9568_v51 = vld [vmem:[%s12070_s9 + $0x680] sm:$0xff]  }
 0xf70   :  { %8954 = vmatpush3.bf16.msra.mxu1 %v9531_v62  ;;  %8976 = vmatpush3.bf16.msra.mxu0 %v9532_v63 }
 0xf71   :  { %8955 = vmatprep.subr.bf16.mxu1 %v9533_v46  ;;  %8977 = vmatprep.subr.bf16.mxu0 %v9534_v41 }
 0xf74   :  { %8956 = vmatpush3.bf16.msra.mxu1 %v9535_v11  ;;  %8978 = vmatpush3.bf16.msra.mxu0 %v9536_v2 }
 0xf75   :  { %8985 = vmatprep.subr.bf16.mxu1 %v9537_v5  ;;  %9007 = vmatprep.subr.bf16.mxu0 %v9538_v19 }
 0xf77   :  { %4403 = vmatmul.mubr.bf16.vlgmr.msra.gmra.mxu1 %v10878_v14  ;;  %4444 = vmatmul.mubr.bf16.vlgmr.msra.gmra.mxu0 %v10880_v15  ;;  %v9546_v14 = vld [vmem:[%s12070_s9 + $0x6e8] sm:$0xff]  }
 0xf78   :  { %8986 = vmatpush3.bf16.msra.mxu1 %v9539_v26  ;;  %4676 = vmatprep.mubr.bf16.mxu1 %v3605_v13  ;;  %v9547_v15 = vld [vmem:[%s12070_s9 + $0x628] sm:$0xff]  }
 0xf79   :  { %9008 = vmatpush3.bf16.msra.mxu0 %v9540_v27  ;;  %4717 = vmatprep.mubr.bf16.mxu0 %v3607_v38 }
 0xf7a   :  { %8987 = vmatprep.subr.bf16.mxu1 %v9541_v32  ;;  %9009 = vmatprep.subr.bf16.mxu0 %v9542_v6 }
 0xf7c   :  { %8988 = vmatpush3.bf16.msra.mxu1 %v9543_v16 }
 0xf7d   :  { %9010 = vmatpush3.bf16.msra.mxu0 %v9544_v17  ;;  %8989 = vmatprep.subr.bf16.mxu1 %v9545_v23 }
 0xf7e   :  { %9011 = vmatprep.subr.bf16.mxu0 %v9546_v14 }
 0xf80   :  { %8990 = vmatpush3.bf16.msra.mxu1 %v9547_v15 }
 0xf81   :  { %9012 = vmatpush3.bf16.msra.mxu0 %v9548_v24  ;;  %8991 = vmatprep.subr.bf16.mxu1 %v9549_v25 }
 0xf82   :  { %9013 = vmatprep.subr.bf16.mxu0 %v9550_v7 }
 0xf84   :  { %8992 = vmatpush3.bf16.msra.mxu1 %v9551_v12 }
 0xf85   :  { %9014 = vmatpush3.bf16.msra.mxu0 %v9552_v43  ;;  %8993 = vmatprep.subr.bf16.mxu1 %v9553_v29 }
 0xf86   :  { %9015 = vmatprep.subr.bf16.mxu0 %v9554_v55 }
 0xf88   :  { %8994 = vmatpush3.bf16.msra.mxu1 %v9555_v39 }
 0xf89   :  { %9016 = vmatpush3.bf16.msra.mxu0 %v9556_v21  ;;  %8995 = vmatprep.subr.bf16.mxu1 %v9557_v22 }
 0xf8a   :  { %9017 = vmatprep.subr.bf16.mxu0 %v9558_v56 }
 0xf8c   :  { %8996 = vmatpush3.bf16.msra.mxu1 %v9559_v30 }
 0xf8d   :  { %9018 = vmatpush3.bf16.msra.mxu0 %v9560_v31  ;;  %8997 = vmatprep.subr.bf16.mxu1 %v9561_v47 }
 0xf8e   :  { %9019 = vmatprep.subr.bf16.mxu0 %v9562_v53 }
 0xf90   :  { %8998 = vmatpush3.bf16.msra.mxu1 %v9563_v35 }
 0xf91   :  { %9020 = vmatpush3.bf16.msra.mxu0 %v9564_v33  ;;  %8999 = vmatprep.subr.bf16.mxu1 %v9565_v34 }
 0xf92   :  { %9021 = vmatprep.subr.bf16.mxu0 %v9566_v44 }
 0xf94   :  { %9000 = vmatpush3.bf16.msra.mxu1 %v9567_v45 }
 0xf95   :  { %9022 = vmatpush3.bf16.msra.mxu0 %v9568_v51  ;;  %9274 = vmatprep.subr.bf16.mxu1 %v9807_v1 }
 0xf96   :  { %9282 = vmatprep.subr.bf16.mxu0 %v9807_v1 }
 0xf97   :  { %4677 = vmatmul.mubr.bf16.vlgmr.msra.gmra.mxu1 %v11068_v40 }
 0xf98   :  { %4718 = vmatmul.mubr.bf16.vlgmr.msra.gmra.mxu0 %v11070_v52  ;;  %9278 = vmatprep.mubr.msk.bf16.mxu1 %vm9808_vm1, %v9807_v1 }
 0xf99   :  { %9286 = vmatprep.mubr.msk.bf16.mxu0 %vm9808_vm1, %v9807_v1 }
0x1017   :  { %v8913_v54 = vpop.f32.mrf.mxu1  ;;  %v8935_v9 = vpop.f32.mrf.mxu0 }
0x1019   :  { %v8914_v59 = vpop.f32.mrf.mxu1  ;;  %v8936_v62 = vpop.f32.mrf.mxu0 }
0x101a   :  { %v8915_v3 = vadd.f32 %v8914_v59, %v8913_v54  ;;  %v8937_v5 = vadd.f32 %v8936_v62, %v8935_v9 }
0x101b   :  { %v8916_v63 = vpop.f32.mrf.mxu1  ;;  %v8938_v48 = vpop.f32.mrf.mxu0 }
0x101c   :  { %v4172_v13 = vadd.f32 %v8937_v5, %v8915_v3 }
0x101d   :  { %v8917_v46 = vpop.f32.mrf.mxu1  ;;  %v8939_v41 = vpop.f32.mrf.mxu0 }
0x101e   :  { %v8918_v26 = vadd.f32 %v8917_v46, %v8916_v63  ;;  %v8940_v20 = vadd.f32 %v8939_v41, %v8938_v48 }
0x1020   :  { %v4175_v25 = vadd.f32 %v8940_v20, %v8918_v26  ;;  %v8148_v26 = vld [vmem:[%s12075_s14 + $0x1] ss:$0 sm:$0xff] }
0x1037   :  { %v8957_v50 = vpop.f32.mrf.mxu1  ;;  %v8979_v42 = vpop.f32.mrf.mxu0 }
0x1039   :  { %v8958_v0 = vpop.f32.mrf.mxu1  ;;  %v8980_v40 = vpop.f32.mrf.mxu0 }
0x103a   :  { %v8959_v19 = vadd.f32 %v8958_v0, %v8957_v50  ;;  %v8981_v23 = vadd.f32 %v8980_v40, %v8979_v42  ;;  %v9570_v50 = vld [vmem:[%s12096_s5 + $0x20] sm:$0xff]  }
0x103b   :  { %v8960_v11 = vpop.f32.mrf.mxu1  ;;  %v8982_v52 = vpop.f32.mrf.mxu0 }
0x103c   :  { %v4405_v32 = vadd.f32 %v8959_v19, %v11049_v8  ;;  %v8144_v8 = vld [vmem:[%s12071_s10 + $0x1] ss:$0 sm:$0xff] }
0x103d   :  { %v8961_v2 = vpop.f32.mrf.mxu1  ;;  %v8983_v28 = vpop.f32.mrf.mxu0  ;;  %v8147_v19 = vld [vmem:[%s12074_s13 + $0x1] ss:$0 sm:$0xff] }
0x103e   :  { %v8962_v6 = vadd.f32 %v8961_v2, %v8960_v11  ;;  %v4446_v12 = vadd.f32 %v8981_v23, %v4405_v32  ;;  %v8984_v21 = vadd.f32 %v8983_v28, %v8982_v52 }
0x1040   :  { %v4408_v43 = vadd.f32 %v8962_v6, %v11055_v18  ;;  %v8154_v6 = vld [vmem:[%s12098_s28 + $0x2] ss:$0 sm:$0xff] }
0x1042   :  { %v4449_v31 = vadd.f32 %v8984_v21, %v4408_v43 }
0x1057   :  { %v9001_v4 = vpop.f32.mrf.mxu1 }
0x1058   :  { %v9023_v10 = vpop.f32.mrf.mxu0 }
0x1059   :  { %v9002_v27 = vpop.f32.mrf.mxu1 }
0x105a   :  { %v9003_v38 = vadd.f32 %v9002_v27, %v9001_v4  ;;  %v9024_v16 = vpop.f32.mrf.mxu0 }
0x105b   :  { %v9004_v17 = vpop.f32.mrf.mxu1  ;;  %v9025_v15 = vadd.f32 %v9024_v16, %v9023_v10 }
0x105c   :  { %v4679_v14 = vadd.f32 %v9003_v38, %v4172_v13  ;;  %v9026_v24 = vpop.f32.mrf.mxu0 }
0x105d   :  { %v9005_v7 = vpop.f32.mrf.mxu1 }
0x105e   :  { %v4720_v29 = vadd.f32 %v9025_v15, %v4679_v14  ;;  %v9006_v55 = vadd.f32 %v9005_v7, %v9004_v17  ;;  %v9027_v39 = vpop.f32.mrf.mxu0 }
0x105f   :  { %v9028_v30 = vadd.f32 %v9027_v39, %v9026_v24 }
0x1060   :  { %v4726_v22 = vadd.f32 %v4720_v29, %v4446_v12  ;;  %v4682_v56 = vadd.f32 %v9006_v55, %v4175_v25 }
0x1062   :  { %v4723_v47 = vadd.f32 %v9028_v30, %v4682_v56  ;;  %v4736_v53 = vadd.f32 %v8144_v8, %v4726_v22  ;;  %v9571_v30 = vld [vmem:[%s12099_s30 + $0x28] sm:$0xff]  }
0x1063   :  { %9283 = vmatpush3.bf16.msra.mxu0 %v9571_v30 }
0x1064   :  { %v4727_v35 = vadd.f32 %v4723_v47, %v4449_v31  ;;  %v4738_v33 = vadd.f32 %v4736_v53, %v10724_v36  ;;  %v9572_v31 = vld [vmem:[%s12099_s30 + $0x20] sm:$0xff]   ;;  %9284 = vmatprep.subr.bf16.mxu0 %v9807_v1 }
0x1066   :  { %v4744_v34 = vsel %vm152_vm2, %v4738_v33, 0.0  ;;  %v4737_v18 = vadd.f32 %v8144_v8, %v4727_v35 }
0x1067   :  { %4745 = vadd.xlane.f32.xlu1 %v4744_v34  ;;  %9285 = vmatpush3.bf16.msra.mxu0 %v9572_v31  ;;  %v8178_v31 = vld [vmem:[%s12068_s7 + $0x2c8] sm:$0xff] }
0x1068   :  { %v4739_v44 = vadd.f32 %v4737_v18, %v10726_v37  ;;  %v9569_v37 = vld [vmem:[%s12096_s5 + $0x28] sm:$0xff]  }
0x1069   :  { %9275 = vmatpush3.bf16.msra.mxu1 %v9569_v37 }
0x106a   :  { %v4747_v45 = vsel %vm152_vm2, %v4739_v44, 0.0  ;;  %9276 = vmatprep.subr.bf16.mxu1 %v9807_v1 }
0x106b   :  { %4748 = vadd.xlane.f32.xlu0 %v4747_v45 }
0x106d   :  { %9277 = vmatpush3.bf16.msra.mxu1 %v9570_v50 }
0x10f0   :  { %v4746_v51 = vpop.xlane.xlu1 %4745 }
0x10f1   :  { %v4750_v54 = vmul.f32 0.03125, %v4746_v51 }
0x10f3   :  { %v4752_v9 = vsub.f32 %v4738_v33, %v4750_v54 }
0x10f4   :  { %v4749_v59 = vpop.xlane.xlu0 %4748 }
0x10f5   :  { %v4751_v62 = vmul.f32 0.03125, %v4749_v59  ;;  %v4754_v63 = vmul.f32 %v4752_v9, %v4752_v9 }
0x10f7   :  { %v4753_v48 = vsub.f32 %v4739_v44, %v4751_v62  ;;  %v4756_v46 = vsel %vm152_vm2, %v4754_v63, 0.0 }
0x10f8   :  { %4757 = vadd.xlane.f32.xlu0 %v4756_v46 }
0x10f9   :  { %v4755_v36 = vmul.f32 %v4753_v48, %v4753_v48 }
0x10fb   :  { %v4759_v41 = vsel %vm152_vm2, %v4755_v36, 0.0 }
0x10fc   :  { %4760 = vadd.xlane.f32.xlu0 %v4759_v41 }
0x1181   :  { %v4758_v42 = vpop.xlane.xlu0 %4757 }
0x1182   :  { %v4762_v0 = vmul.f32 0.03125, %v4758_v42 }
0x1184   :  { %v4764_v40 = vadd.f32 1e-05, %v4762_v0 }
0x1185   :  { %v4761_v11 = vpop.xlane.xlu0 %4760 }
0x1186   :  { %9761 = vrsqrt.f32 %v4764_v40  ;;  %v4763_v52 = vmul.f32 0.03125, %v4761_v11 }
0x1188   :  { %v4765_v2 = vadd.f32 1e-05, %v4763_v52 }
0x118a   :  { %9763 = vrsqrt.f32 %v4765_v2 }
0x1193   :  { %v9762_v3 = vpop.eup %9761 }
0x1194   :  { %v4768_v5 = vmul.f32 %v9762_v3, %v4752_v9 }
0x1196   :  { %v4776_v10 = vmul.f32 %v8147_v19, %v4768_v5 }
0x1197   :  { %v9764_v28 = vpop.eup %9763 }
0x1198   :  { %v4769_v4 = vmul.f32 %v9764_v28, %v4753_v48  ;;  %v11306_v27 = vadd.f32 %v8148_v26, %v4776_v10 }
0x119a   :  { %v4777_v20 = vmul.f32 %v8147_v19, %v4769_v4 }
0x119c   :  { %v11308_v13 = vadd.f32 %v8148_v26, %v4777_v20  ;;  %v8163_v26 = vld [vmem:[%s12067_s6 + $0x2] ss:$0 sm:$0xff] }
0x119e   :  { %v4786_v32 = vpack.c.bf16 %v11308_v13, %v11306_v27 }
0x11a0   :  { %9279 = vmatmul.mubr.msk.bf16.vlgmr.msra.gmra.mxu1 %vm152_vm2, %v4786_v32 }
0x11a1   :  { %5137 = vmatprep.mubr.bf16.mxu1 %v9811_v49 }
0x1260   :  { %v4849_v38 = vpop.f32.mrf.mxu1 }
0x1261   :  { %v4850_v16 = vadd.f32 %v8154_v6, %v4849_v38 }
0x1262   :  { %v9280_v17 = vpop.f32.mrf.mxu1 }
0x1263   :  { %4860 = vrot.lane.b32.xlu0 %v4850_v16, %s9809_s29  ;;  %v4856_v24 = vmul.f32 0.17677669, %v4850_v16 }
0x1264   :  { %v4852_v23 = vpop.f32.mrf.mxu1 }
0x1265   :  { %v4853_v14 = vadd.f32 %v8154_v6, %v4852_v23 }
0x1266   :  { %v9281_v15 = vpop.f32.mrf.mxu1 }
0x1267   :  { %4862 = vrot.lane.b32.xlu0 %v4853_v14, %s9809_s29  ;;  %v4857_v12 = vmul.f32 0.17677669, %v4853_v14 }
0x12d5   :  { %v4861_v25 = vpop.permute.xlu0 %4860 }
0x12d6   :  { %v4866_v7 = vmul.f32 %v4861_v25, %v4856_v24  ;;  %v4875_v8 = vmul.f32 %v4861_v25, %v4857_v12 }
0x12d8   :  { %v4868_v43 = vsel %vm152_vm2, %v4866_v7, 0.0  ;;  %v4879_v56 = vsel %vm152_vm2, %v4875_v8, 0.0 }
0x12d9   :  { %4869 = vadd.xlane.f32.xlu1 %v4868_v43  ;;  %v4863_v29 = vpop.permute.xlu0 %4862 }
0x12da   :  { %v4867_v55 = vmul.f32 %v4863_v29, %v4857_v12  ;;  %v4874_v39 = vmul.f32 %v4863_v29, %v4856_v24 }
0x12dc   :  { %v4876_v21 = vsel %vm152_vm2, %v4874_v39, 0.0  ;;  %v4871_v22 = vsel %vm152_vm2, %v4867_v55, 0.0 }
0x12dd   :  { %4877 = vadd.xlane.f32.xlu1 %v4876_v21  ;;  %4872 = vadd.xlane.f32.xlu0 %v4871_v22  ;;  %v8177_v22 = vld [vmem:[%s12068_s7 + $0x2c0] sm:$0xff] }
0x12e1   :  { %4880 = vadd.xlane.f32.xlu1 %v4879_v56  ;;  %v8176_v56 = vld [vmem:[%s12068_s7 + $0x288] sm:$0xff] }
0x1362   :  { %v4870_v47 = vpop.xlane.xlu1 %4869 }
0x1366   :  { %v4878_v53 = vpop.xlane.xlu1 %4877  ;;  %v4873_v18 = vpop.xlane.xlu0 %4872 }
0x1367   :  { %v4882_v35 = vmax.f32 %v4870_v47, %v4878_v53 }
0x1369   :  { %v4884_v33 = vsub.f32 %v4870_v47, %v4882_v35  ;;  %v4890_v34 = vsub.f32 %v4878_v53, %v4882_v35  ;;  %v8186_v53 = vcombine.low %v8176_v56, %v8178_v31  ;;  %v8187_v35 = vcombine.high %v8176_v56, %v8178_v31  ;;  %v9584_v56 = vld [vmem:[%s12070_s9 + $0x9a8] sm:$0xff]   ;;  %v9587_v31 = vld [vmem:[%s12070_s9 + $0x9e0] sm:$0xff]  }
0x136a   :  { %v4881_v44 = vpop.xlane.xlu1 %4880 }
0x136b   :  { %v4886_v45 = vmul.f32 1.442695, %v4884_v33  ;;  %v4892_v51 = vmul.f32 1.442695, %v4890_v34  ;;  %v4883_v54 = vmax.f32 %v4873_v18, %v4881_v44  ;;  %5160 = vmatprep.subr.bf16.mxu0 %v8187_v35  ;;  %v8171_v33 = vld [vmem:[%s12068_s7 + $0x200] sm:$0xff]  ;;  %v9589_v35 = vld [vmem:[%s12070_s9 + $0x958] sm:$0xff]  }
0x136c   :  { %v8173_v34 = vld [vmem:[%s12068_s7 + $0x240] sm:$0xff] }
0x136d   :  { %9765 = vpow2.f32 %v4886_v45  ;;  %v4885_v9 = vsub.f32 %v4873_v18, %v4883_v54  ;;  %v4891_v59 = vsub.f32 %v4881_v44, %v4883_v54  ;;  %v8172_v18 = vld [vmem:[%s12068_s7 + $0x208] sm:$0xff]  ;;  %v8181_v44 = vcombine.high %v8171_v33, %v8173_v34 }
0x136e   :  { %9767 = vpow2.f32 %v4892_v51  ;;  %v8174_v45 = vld [vmem:[%s12068_s7 + $0x248] sm:$0xff]  ;;  %v8180_v51 = vcombine.low %v8171_v33, %v8173_v34  ;;  %v9591_v33 = vld [vmem:[%s12070_s9 + $0x9d8] sm:$0xff]  }
0x136f   :  { %v4888_v62 = vmul.f32 1.442695, %v4885_v9  ;;  %v4894_v63 = vmul.f32 1.442695, %v4891_v59  ;;  %v8182_v54 = vcombine.low %v8172_v18, %v8174_v45  ;;  %v8183_v9 = vcombine.high %v8172_v18, %v8174_v45  ;;  %v8258_v59 = vld [vmem:[%s12068_s7 + $0x290] sm:$0xff]  ;;  %v9590_v34 = vld [vmem:[%s12070_s9 + $0x918] sm:$0xff]  }
0x1370   :  { %v9592_v18 = vld [vmem:[%s12070_s9 + $0x998] sm:$0xff]   ;;  %v9595_v45 = vld [vmem:[%s12070_s9 + $0x9d0] sm:$0xff]  }
0x1371   :  { %9769 = vpow2.f32 %v4888_v62  ;;  %v8260_v62 = vld [vmem:[%s12068_s7 + $0x2d0] sm:$0xff] }
0x1372   :  { %9771 = vpow2.f32 %v4894_v63  ;;  %v8259_v63 = vld [vmem:[%s12068_s7 + $0x298] sm:$0xff] }
0x137a   :  { %v9766_v48 = vpop.eup %9765 }
0x137b   :  { %v9768_v46 = vpop.eup %9767  ;;  %v4900_v42 = vmul.f32 %v9766_v48, %v4850_v16 }
0x137c   :  { %v4896_v36 = vadd.f32 %v9768_v46, %v9766_v48  ;;  %v4902_v40 = vmul.f32 %v9768_v46, %v4853_v14  ;;  %v8267_v48 = vcombine.low %v8258_v59, %v8260_v62  ;;  %v8268_v46 = vcombine.high %v8258_v59, %v8260_v62  ;;  %v9599_v59 = vld [vmem:[%s12070_s9 + $0x9c8] sm:$0xff]  }
0x137d   :  { %v9598_v62 = vld [vmem:[%s12070_s9 + $0x908] sm:$0xff]  }
0x137e   :  { %v9770_v41 = vpop.eup %9769  ;;  %9773 = vrcp.f32 %v4896_v36  ;;  %v4904_v2 = vadd.f32 %v4902_v40, %v4900_v42  ;;  %v8261_v36 = vld [vmem:[%s12068_s7 + $0x2d8] sm:$0xff] }
0x137f   :  { %v9772_v37 = vpop.eup %9771  ;;  %v4901_v0 = vmul.f32 %v9770_v41, %v4853_v14 }
0x1380   :  { %v4897_v50 = vadd.f32 %v9772_v37, %v9770_v41  ;;  %v4903_v11 = vmul.f32 %v9772_v37, %v4850_v16  ;;  %v8269_v41 = vcombine.low %v8259_v63, %v8261_v36  ;;  %v8270_v37 = vcombine.high %v8259_v63, %v8261_v36  ;;  %v9600_v63 = vld [vmem:[%s12070_s9 + $0x988] sm:$0xff]   ;;  %v9602_v36 = vld [vmem:[%s12070_s9 + $0x900] sm:$0xff]  }
0x1382   :  { %9775 = vrcp.f32 %v4897_v50  ;;  %v4905_v3 = vadd.f32 %v4903_v11, %v4901_v0 }
0x138b   :  { %v9774_v52 = vpop.eup %9773 }
0x138c   :  { %v4906_v19 = vmul.f32 %v9774_v52, %v4904_v2 }
0x138f   :  { %v9776_v5 = vpop.eup %9775 }
0x1390   :  { %v4907_v28 = vmul.f32 %v9776_v5, %v4905_v3  ;;  %v8169_v5 = vld [vmem:[%s12072_s11 + $0x2] ss:$0 sm:$0xff] }
0x1392   :  { %v4908_v4 = vpack.c.bf16 %v4907_v28, %v4906_v19 }
0x1394   :  { %4923 = vrot.lane.b32.xlu1 %v4908_v4, %s9810_s1 }
0x1406   :  { %v4924_v10 = vpop.permute.xlu1 %4923 }
0x1407   :  { %9287 = vmatmul.mubr.msk.bf16.vlgmr.msra.gmra.mxu0 %vm152_vm2, %v4924_v10  ;;  %v8170_v10 = vld [vmem:[%s12073_s12 + $0x2] ss:$0 sm:$0xff]  ;;  %s7470_s12 = sshll.u32 %s9812_s22, 4  ;;  %s7471_s12 = int_to_ptr.vmem [resolvable:$true] %s7470_s12 }
0x1408   :  { %5180 = vmatprep.mubr.bf16.mxu0 %v9811_v49  ;;  %5161 = vmatpush1.bf16.msra.mxu0 %v8186_v53  ;;  %v9588_v53 = vld [vmem:[%s12070_s9 + $0x9a0] sm:$0xff]   ;;  %p9790_p1 = scmp.lt.s32.totalorder %s7471_s12, %s7471_s12 }
0x1409   :  { %5162 = vmatprep.subr.bf16.mxu0 %v8183_v9  ;;  %v9597_v9 = vld [vmem:[%s12070_s9 + $0x948] sm:$0xff]  }
0x140c   :  { %5163 = vmatpush1.bf16.msra.mxu0 %v8182_v54  ;;  %v9596_v54 = vld [vmem:[%s12070_s9 + $0x990] sm:$0xff]  }
0x140d   :  { %5393 = vmatprep.subr.bf16.mxu0 %v8270_v37  ;;  %v11513_v37 = vld [vmem:[%s12068_s7 + $0x2a0] sm:$0xff] }
0x14c7   :  { %v4974_v20 = vpop.f32.mrf.mxu0 }
0x14c8   :  { %v4975_v32 = vadd.f32 %v8163_v26, %v4974_v20  ;;  %v8254_v20 = vld [vmem:[%s12068_s7 + $0x210] sm:$0xff] }
0x14c9   :  { %v9288_v6 = vpop.f32.mrf.mxu0 }
0x14ca   :  { %v4981_v38 = vadd.f32 %v4975_v32, %v11306_v27  ;;  %v8256_v32 = vld [vmem:[%s12068_s7 + $0x250] sm:$0xff]  ;;  %v8255_v6 = vld [vmem:[%s12068_s7 + $0x218] sm:$0xff] }
0x14cb   :  { %v4977_v16 = vpop.f32.mrf.mxu0 }
0x14cc   :  { %v4978_v17 = vadd.f32 %v8163_v26, %v4977_v16  ;;  %v4987_v23 = vsel %vm152_vm2, %v4981_v38, 0.0 }
0x14cd   :  { %4988 = vadd.xlane.f32.xlu1 %v4987_v23  ;;  %v9289_v14 = vpop.f32.mrf.mxu0 }
0x14ce   :  { %v4982_v15 = vadd.f32 %v4978_v17, %v11308_v13  ;;  %v8175_v13 = vld [vmem:[%s12068_s7 + $0x280] sm:$0xff]  ;;  %v8264_v14 = vcombine.high %v8254_v20, %v8256_v32 }
0x14cf   :  { %v8185_v30 = vcombine.high %v8175_v13, %v8177_v22  ;;  %v8184_v47 = vcombine.low %v8175_v13, %v8177_v22  ;;  %v9583_v13 = vld [vmem:[%s12070_s9 + $0x9e8] sm:$0xff]  }
0x14d0   :  { %v4990_v24 = vsel %vm152_vm2, %v4982_v15, 0.0  ;;  %v9582_v22 = vld [vmem:[%s12070_s9 + $0x928] sm:$0xff]  }
0x14d1   :  { %4991 = vadd.xlane.f32.xlu0 %v4990_v24  ;;  %5117 = vmatprep.subr.bf16.mxu1 %v8185_v30  ;;  %v8263_v24 = vcombine.low %v8254_v20, %v8256_v32  ;;  %v9585_v30 = vld [vmem:[%s12070_s9 + $0x960] sm:$0xff]  }
0x14d2   :  { %5118 = vmatpush1.bf16.msra.mxu1 %v8184_v47  ;;  %v9586_v47 = vld [vmem:[%s12070_s9 + $0x920] sm:$0xff]  }
0x14d3   :  { %5119 = vmatprep.subr.bf16.mxu1 %v8181_v44  ;;  %v9593_v44 = vld [vmem:[%s12070_s9 + $0x950] sm:$0xff]  }
0x14d6   :  { %5120 = vmatpush1.bf16.msra.mxu1 %v8180_v51  ;;  %v9594_v51 = vld [vmem:[%s12070_s9 + $0x910] sm:$0xff]  }
0x14d7   :  { %5350 = vmatprep.subr.bf16.mxu1 %v8268_v46  ;;  %v9603_v46 = vld [vmem:[%s12070_s9 + $0x9c0] sm:$0xff]  }
0x1556   :  { %v4989_v25 = vpop.xlane.xlu1 %4988 }
0x1557   :  { %v4993_v7 = vmul.f32 0.03125, %v4989_v25 }
0x1559   :  { %v4995_v12 = vsub.f32 %v4981_v38, %v4993_v7  ;;  %v8257_v38 = vld [vmem:[%s12068_s7 + $0x258] sm:$0xff] }
0x155a   :  { %v4992_v43 = vpop.xlane.xlu0 %4991  ;;  %v8265_v25 = vcombine.low %v8255_v6, %v8257_v38  ;;  %v9573_v7 = vld [vmem:[%s12070_s9 + $0x978] sm:$0xff]  }
0x155b   :  { %v4994_v29 = vmul.f32 0.03125, %v4992_v43  ;;  %v4997_v55 = vmul.f32 %v4995_v12, %v4995_v12  ;;  %v9574_v43 = vld [vmem:[%s12070_s9 + $0x938] sm:$0xff]  }
0x155d   :  { %v4996_v39 = vsub.f32 %v4982_v15, %v4994_v29  ;;  %v4999_v27 = vsel %vm152_vm2, %v4997_v55, 0.0  ;;  %v8266_v15 = vcombine.high %v8255_v6, %v8257_v38  ;;  %v9576_v29 = vld [vmem:[%s12070_s9 + $0x9b8] sm:$0xff]   ;;  %v9577_v55 = vld [vmem:[%s12070_s9 + $0x970] sm:$0xff]  }
0x155e   :  { %5000 = vadd.xlane.f32.xlu0 %v4999_v27  ;;  %v9578_v27 = vld [vmem:[%s12070_s9 + $0x930] sm:$0xff]  }
0x155f   :  { %v4998_v8 = vmul.f32 %v4996_v39, %v4996_v39 }
0x1561   :  { %v5002_v21 = vsel %vm152_vm2, %v4998_v8, 0.0  ;;  %v9580_v8 = vld [vmem:[%s12070_s9 + $0x9b0] sm:$0xff]  }
0x1562   :  { %5003 = vadd.xlane.f32.xlu0 %v5002_v21  ;;  %v9581_v21 = vld [vmem:[%s12070_s9 + $0x968] sm:$0xff]  }
0x15e7   :  { %v5001_v50 = vpop.xlane.xlu0 %5000 }
0x15e8   :  { %v5005_v42 = vmul.f32 0.03125, %v5001_v50  ;;  %v11518_v50 = vld [vmem:[%s12068_s7 + $0x2e0] sm:$0xff] }
0x15ea   :  { %v5007_v0 = vadd.f32 1e-05, %v5005_v42  ;;  %v11523_v42 = vld [vmem:[%s12068_s7 + $0x2a8] sm:$0xff] }
0x15eb   :  { %v5004_v40 = vpop.xlane.xlu0 %5003 }
0x15ec   :  { %9777 = vrsqrt.f32 %v5007_v0  ;;  %v5006_v11 = vmul.f32 0.03125, %v5004_v40  ;;  %v8382_v0 = vcombine.low %v11513_v37, %v11518_v50  ;;  %v8383_v40 = vcombine.high %v11513_v37, %v11518_v50  ;;  %v8454_v37 = vld [vmem:[%s12068_s7 + $0x270] sm:$0xff]  ;;  %v8453_v50 = vld [vmem:[%s12068_s7 + $0x238] sm:$0xff] }
0x15ee   :  { %v5008_v52 = vadd.f32 1e-05, %v5006_v11  ;;  %v11532_v11 = vld [vmem:[%s12068_s7 + $0x2e8] sm:$0xff] }
0x15f0   :  { %9779 = vrsqrt.f32 %v5008_v52  ;;  %v8384_v52 = vcombine.low %v11523_v42, %v11532_v11 }
0x15f9   :  { %v9778_v2 = vpop.eup %9777 }
0x15fa   :  { %v5011_v3 = vmul.f32 %v9778_v2, %v4995_v12  ;;  %v9575_v12 = vld [vmem:[%s12070_s9 + $0x9f8] sm:$0xff]   ;;  %v8385_v2 = vcombine.high %v11523_v42, %v11532_v11 }
0x15fb   :  { %v8455_v42 = vld [vmem:[%s12068_s7 + $0x278] sm:$0xff] }
0x15fc   :  { %v5019_v28 = vmul.f32 %v8169_v5, %v5011_v3  ;;  %v8179_v3 = vld [vmem:[%s12069_s8 + $0x20] sm:$0xf] }
0x15fd   :  { %v9780_v19 = vpop.eup %9779 }
0x15fe   :  { %v5012_v4 = vmul.f32 %v9780_v19, %v4996_v39  ;;  %v11396_v16 = vadd.f32 %v8170_v10, %v5019_v28  ;;  %v9579_v39 = vld [vmem:[%s12070_s9 + $0x9f0] sm:$0xff]   ;;  %v5053_v19 = vrot.slane %v8179_v3, %v10188_v58 }
0x1600   :  { %v5020_v26 = vmul.f32 %v8169_v5, %v5012_v4  ;;  %v5045_v5 = vrot.slane %v8179_v3, %v10186_v57 }
0x1602   :  { %v11398_v17 = vadd.f32 %v8170_v10, %v5020_v26  ;;  %v5049_v10 = vrot.slane %v8179_v3, %v10193_v60  ;;  %v5057_v26 = vrot.slane %v8179_v3, %v10195_v61 }
0x1604   :  { %v11402_v23 = vpack.c.bf16 %v11398_v17, %v11396_v16 }
0x1606   :  { %8188 = vmatmul.mubr.msk.bf16.vlgmr.msra.gmra.mxu1 %vm152_vm2, %v11402_v23  ;;  %8189 = vmatmul.mubr.msk.bf16.vlgmr.msra.gmra.mxu0 %vm152_vm2, %v11402_v23 }
0x1607   :  { %5351 = vmatpush1.bf16.msra.mxu1 %v8267_v48  ;;  %5394 = vmatpush1.bf16.msra.mxu0 %v8269_v41  ;;  %v9601_v48 = vld [vmem:[%s12070_s9 + $0x940] sm:$0xff]  }
0x1608   :  { %5352 = vmatprep.subr.bf16.mxu1 %v8264_v14  ;;  %5395 = vmatprep.subr.bf16.mxu0 %v8266_v15  ;;  %v9604_v41 = vld [vmem:[%s12070_s9 + $0x980] sm:$0xff]  }
0x1609   :  { %5370 = vmatprep.mubr.bf16.mxu1 %v9811_v49  ;;  %5413 = vmatprep.mubr.bf16.mxu0 %v9811_v49 }
0x160b   :  { %5353 = vmatpush1.bf16.msra.mxu1 %v8263_v24  ;;  %5396 = vmatpush1.bf16.msra.mxu0 %v8265_v25 }
0x160c   :  { %9035 = vmatprep.subr.bf16.mxu1 %v9573_v7  ;;  %9057 = vmatprep.subr.bf16.mxu0 %v9575_v12 }
0x160e   :  { %8271 = vmatmul.mubr.msk.bf16.vlgmr.msra.gmra.mxu1 %vm152_vm2, %v11402_v23  ;;  %8272 = vmatmul.mubr.msk.bf16.vlgmr.msra.gmra.mxu0 %vm152_vm2, %v11402_v23 }
0x160f   :  { %9036 = vmatpush3.bf16.msra.mxu1 %v9574_v43  ;;  %9058 = vmatpush3.bf16.msra.mxu0 %v9576_v29 }
0x1610   :  { %9037 = vmatprep.subr.bf16.mxu1 %v9577_v55  ;;  %9059 = vmatprep.subr.bf16.mxu0 %v9579_v39 }
0x1613   :  { %9038 = vmatpush3.bf16.msra.mxu1 %v9578_v27  ;;  %9060 = vmatpush3.bf16.msra.mxu0 %v9580_v8 }
0x1614   :  { %9039 = vmatprep.subr.bf16.mxu1 %v9581_v21  ;;  %9061 = vmatprep.subr.bf16.mxu0 %v9583_v13 }
0x1617   :  { %9040 = vmatpush3.bf16.msra.mxu1 %v9582_v22  ;;  %9062 = vmatpush3.bf16.msra.mxu0 %v9584_v56  ;;  %v8262_v22 = vld [vmem:[%s12069_s8 + $0x24] sm:$0xf] }
0x1618   :  { %9041 = vmatprep.subr.bf16.mxu1 %v9585_v30  ;;  %9063 = vmatprep.subr.bf16.mxu0 %v9587_v31 }
0x161b   :  { %9042 = vmatpush3.bf16.msra.mxu1 %v9586_v47  ;;  %9064 = vmatpush3.bf16.msra.mxu0 %v9588_v53  ;;  %v5285_v53 = vrot.slane %v8262_v22, %v10193_v60 }
0x161c   :  { %9043 = vmatprep.subr.bf16.mxu1 %v9589_v35  ;;  %9065 = vmatprep.subr.bf16.mxu0 %v9591_v33  ;;  %v5293_v35 = vrot.slane %v8262_v22, %v10195_v61 }
0x161f   :  { %9044 = vmatpush3.bf16.msra.mxu1 %v9590_v34  ;;  %9066 = vmatpush3.bf16.msra.mxu0 %v9592_v18 }
0x1620   :  { %9045 = vmatprep.subr.bf16.mxu1 %v9593_v44  ;;  %9067 = vmatprep.subr.bf16.mxu0 %v9595_v45  ;;  %v5281_v45 = vrot.slane %v8262_v22, %v10186_v57 }
0x1623   :  { %9046 = vmatpush3.bf16.msra.mxu1 %v9594_v51  ;;  %9068 = vmatpush3.bf16.msra.mxu0 %v9596_v54  ;;  %v5289_v51 = vrot.slane %v8262_v22, %v10188_v58  ;;  %v8457_v22 = vld [vmem:[%s12068_s7 + $0x2b8] sm:$0xff] }
0x1624   :  { %9047 = vmatprep.subr.bf16.mxu1 %v9597_v9  ;;  %9069 = vmatprep.subr.bf16.mxu0 %v9599_v59 }
0x1627   :  { %9048 = vmatpush3.bf16.msra.mxu1 %v9598_v62  ;;  %9070 = vmatpush3.bf16.msra.mxu0 %v9600_v63 }
0x1628   :  { %9049 = vmatprep.subr.bf16.mxu1 %v9601_v48  ;;  %9071 = vmatprep.subr.bf16.mxu0 %v9603_v46 }
0x162b   :  { %9050 = vmatpush3.bf16.msra.mxu1 %v9602_v36  ;;  %9072 = vmatpush3.bf16.msra.mxu0 %v9604_v41 }
0x162c   :  { %5856 = vmatprep.subr.bf16.mxu1 %v8383_v40  ;;  %5899 = vmatprep.subr.bf16.mxu0 %v8385_v2 }
0x16c6   :  { %v5139_v28 = vpop.f32.mrf.mxu1  ;;  %v5182_v4 = vpop.f32.mrf.mxu0 }
0x16c7   :  { %v5140_v20 = vadd.f32 %v5139_v28, %v5045_v5  ;;  %v5183_v32 = vadd.f32 %v5182_v4, %v5053_v19 }
0x16c8   :  { %v5141_v6 = vpop.f32.mrf.mxu1  ;;  %v5184_v38 = vpop.f32.mrf.mxu0 }
0x16c9   :  { %v5142_v14 = vadd.f32 %v5141_v6, %v5049_v10  ;;  %v5185_v15 = vadd.f32 %v5184_v38, %v5057_v26  ;;  %v5191_v43 = vmax.f32 %v5140_v20, 0.0  ;;  %v5193_v29 = vmax.f32 %v5183_v32, 0.0  ;;  %v8369_v20 = vld [vmem:[%s12068_s7 + $0x220] sm:$0xff] }
0x16ca   :  { %v5143_v24 = vpop.f32.mrf.mxu1  ;;  %v5186_v25 = vpop.f32.mrf.mxu0  ;;  %v8371_v32 = vld [vmem:[%s12068_s7 + $0x260] sm:$0xff] }
0x16cb   :  { %v5144_v7 = vadd.f32 %v5143_v24, %v5045_v5  ;;  %v5187_v12 = vadd.f32 %v5186_v25, %v5053_v19  ;;  %v5192_v56 = vmax.f32 %v5142_v14, 0.0  ;;  %v5194_v30 = vmax.f32 %v5185_v15, 0.0  ;;  %v8370_v24 = vld [vmem:[%s12068_s7 + $0x228] sm:$0xff] }
0x16cc   :  { %v5145_v55 = vpop.f32.mrf.mxu1  ;;  %v5188_v39 = vpop.f32.mrf.mxu0  ;;  %v8372_v25 = vld [vmem:[%s12068_s7 + $0x268] sm:$0xff] }
0x16cd   :  { %v5195_v27 = vmax.f32 %v5144_v7, 0.0  ;;  %v5197_v8 = vmax.f32 %v5187_v12, 0.0  ;;  %v5146_v21 = vadd.f32 %v5145_v55, %v5049_v10  ;;  %v5189_v13 = vadd.f32 %v5188_v39, %v5057_v26 }
0x16ce   :  { %v5372_v31 = vpop.f32.mrf.mxu1  ;;  %v5415_v47 = vpop.f32.mrf.mxu0 }
0x16cf   :  { %v11550_v33 = vpack.c.bf16 %v5195_v27, %v5191_v43  ;;  %v11552_v34 = vpack.c.bf16 %v5197_v8, %v5193_v29  ;;  %v5196_v18 = vmax.f32 %v5146_v21, 0.0  ;;  %v5198_v44 = vmax.f32 %v5189_v13, 0.0  ;;  %v8456_v21 = vld [vmem:[%s12068_s7 + $0x2b0] sm:$0xff] }
0x16d0   :  { %v5374_v54 = vpop.f32.mrf.mxu1  ;;  %v5417_v9 = vpop.f32.mrf.mxu0  ;;  %v5373_v2 = vadd.f32 %v5372_v31, %v5281_v45  ;;  %v5416_v3 = vadd.f32 %v5415_v47, %v5289_v51  ;;  %v8379_v27 = vcombine.high %v8369_v20, %v8371_v32  ;;  %v8381_v8 = vcombine.high %v8370_v24, %v8372_v25  ;;  %v8458_v13 = vld [vmem:[%s12068_s7 + $0x2f0] sm:$0xff] }
0x16d1   :  { %v11556_v59 = vpack.c.bf16 %v5196_v18, %v5192_v56  ;;  %v11558_v62 = vpack.c.bf16 %v5198_v44, %v5194_v30  ;;  %v5375_v46 = vadd.f32 %v5374_v54, %v5285_v53  ;;  %v5418_v36 = vadd.f32 %v5417_v9, %v5293_v35  ;;  %v8459_v56 = vld [vmem:[%s12068_s7 + $0x2f8] sm:$0xff] }
0x16d2   :  { %v5376_v63 = vpop.f32.mrf.mxu1  ;;  %v5419_v48 = vpop.f32.mrf.mxu0  ;;  %v5424_v7 = vmax.f32 %v5373_v2, 0.0  ;;  %v5426_v12 = vmax.f32 %v5416_v3, 0.0  ;;  %v8378_v30 = vcombine.low %v8369_v20, %v8371_v32  ;;  %v8380_v31 = vcombine.low %v8370_v24, %v8372_v25  ;;  %v9606_v54 = vld [vmem:[%s12070_s9 + $0xbf8] sm:$0xff]   ;;  %v9615_v2 = vld [vmem:[%s12070_s9 + $0xb28] sm:$0xff]  }
0x16d3   :  { %v5377_v41 = vadd.f32 %v5376_v63, %v5281_v45  ;;  %v5420_v40 = vadd.f32 %v5419_v48, %v5289_v51  ;;  %v5425_v6 = vmax.f32 %v5375_v46, 0.0  ;;  %v5427_v38 = vmax.f32 %v5418_v36, 0.0  ;;  %v9605_v51 = vld [vmem:[%s12070_s9 + $0xb78] sm:$0xff]   ;;  %v9609_v48 = vld [vmem:[%s12070_s9 + $0xb70] sm:$0xff]   ;;  %v9616_v3 = vld [vmem:[%s12070_s9 + $0xba8] sm:$0xff]  }
0x16d4   :  { %v5378_v5 = vpop.f32.mrf.mxu1  ;;  %v5421_v19 = vpop.f32.mrf.mxu0  ;;  %v8466_v47 = vcombine.high %v8456_v21, %v8458_v13  ;;  %v8467_v11 = vcombine.low %v8457_v22, %v8459_v56  ;;  %v8464_v18 = vcombine.high %v8453_v50, %v8455_v42  ;;  %v8463_v45 = vcombine.low %v8453_v50, %v8455_v42  ;;  %v9607_v9 = vld [vmem:[%s12070_s9 + $0xb38] sm:$0xff]   ;;  %v9610_v46 = vld [vmem:[%s12070_s9 + $0xbf0] sm:$0xff]   ;;  %v9629_v24 = vld [vmem:[%s12070_s9 + $0xb48] sm:$0xff]  }
0x16d5   :  { %v5379_v28 = vadd.f32 %v5378_v5, %v5285_v53  ;;  %v5422_v4 = vadd.f32 %v5421_v19, %v5293_v35  ;;  %v5428_v10 = vmax.f32 %v5377_v41, 0.0  ;;  %v5430_v26 = vmax.f32 %v5420_v40, 0.0  ;;  %v8452_v35 = vld [vmem:[%s12068_s7 + $0x230] sm:$0xff]  ;;  %v9608_v63 = vld [vmem:[%s12070_s9 + $0xbb8] sm:$0xff]   ;;  %v9614_v40 = vld [vmem:[%s12070_s9 + $0xbe8] sm:$0xff]  }
0x16d6   :  { %v8468_v53 = vcombine.high %v8457_v22, %v8459_v56  ;;  %v8461_v44 = vcombine.low %v8452_v35, %v8454_v37  ;;  %v9611_v36 = vld [vmem:[%s12070_s9 + $0xb30] sm:$0xff]   ;;  %v9617_v5 = vld [vmem:[%s12070_s9 + $0xb60] sm:$0xff]   ;;  %v9623_v20 = vld [vmem:[%s12070_s9 + $0xb18] sm:$0xff]  }
0x16d7   :  { %v5429_v14 = vmax.f32 %v5379_v28, 0.0  ;;  %v5431_v15 = vmax.f32 %v5422_v4, 0.0  ;;  %v5432_v55 = vpack.c.bf16 %v5428_v10, %v5424_v7  ;;  %v5434_v39 = vpack.c.bf16 %v5430_v26, %v5426_v12  ;;  %v9612_v41 = vld [vmem:[%s12070_s9 + $0xbb0] sm:$0xff]   ;;  %v9618_v19 = vld [vmem:[%s12070_s9 + $0xbe0] sm:$0xff]   ;;  %v9621_v10 = vld [vmem:[%s12070_s9 + $0xb58] sm:$0xff]  }
0x16d8   :  { %v9619_v28 = vld [vmem:[%s12070_s9 + $0xb20] sm:$0xff]   ;;  %v9622_v26 = vld [vmem:[%s12070_s9 + $0xbd8] sm:$0xff]   ;;  %v9630_v25 = vld [vmem:[%s12070_s9 + $0xbc8] sm:$0xff]  }
0x16d9   :  { %v5433_v43 = vpack.c.bf16 %v5429_v14, %v5425_v6  ;;  %v5435_v29 = vpack.c.bf16 %v5431_v15, %v5427_v38  ;;  %v9620_v4 = vld [vmem:[%s12070_s9 + $0xba0] sm:$0xff]   ;;  %v9624_v32 = vld [vmem:[%s12070_s9 + $0xb98] sm:$0xff]   ;;  %v9625_v6 = vld [vmem:[%s12070_s9 + $0xb50] sm:$0xff]  }
0x16da   :  { %v9626_v38 = vld [vmem:[%s12070_s9 + $0xbd0] sm:$0xff]   ;;  %v9631_v7 = vld [vmem:[%s12070_s9 + $0xb08] sm:$0xff]  }
0x16db   :  { %5724 = vmatprep.mubr.bf16.mxu1 %v5433_v43  ;;  %5765 = vmatprep.mubr.bf16.mxu0 %v5435_v29  ;;  %v9627_v14 = vld [vmem:[%s12070_s9 + $0xb10] sm:$0xff]   ;;  %v9632_v12 = vld [vmem:[%s12070_s9 + $0xb88] sm:$0xff]   ;;  %v9633_v43 = vld [vmem:[%s12070_s9 + $0xb40] sm:$0xff]  }
0x16dc   :  { %5725 = vmatmul.mubr.bf16.vlgmr.msra.gmra.mxu1 %v5432_v55  ;;  %5766 = vmatmul.mubr.bf16.vlgmr.msra.gmra.mxu0 %v5434_v39  ;;  %v9628_v15 = vld [vmem:[%s12070_s9 + $0xb90] sm:$0xff]   ;;  %v9634_v29 = vld [vmem:[%s12070_s9 + $0xbc0] sm:$0xff]  }
0x16dd   :  { %5857 = vmatpush1.bf16.msra.mxu1 %v8382_v0  ;;  %5900 = vmatpush1.bf16.msra.mxu0 %v8384_v52  ;;  %v8465_v0 = vcombine.low %v8456_v21, %v8458_v13  ;;  %v8462_v52 = vcombine.high %v8452_v35, %v8454_v37  ;;  %v9635_v55 = vld [vmem:[%s12070_s9 + $0xb00] sm:$0xff]   ;;  %v11719_v35 = vld [vmem:[%s12069_s8 + $0x28] sm:$0xf] }
0x16de   :  { %5858 = vmatprep.subr.bf16.mxu1 %v8379_v27  ;;  %5901 = vmatprep.subr.bf16.mxu0 %v8381_v8  ;;  %v9636_v39 = vld [vmem:[%s12070_s9 + $0xb80] sm:$0xff]   ;;  %v9637_v27 = vld [vmem:[%s12070_s9 + $0x878] sm:$0xff]  }
0x16df   :  { %5876 = vmatprep.mubr.bf16.mxu1 %v9811_v49  ;;  %5919 = vmatprep.mubr.bf16.mxu0 %v9811_v49  ;;  %v9638_v8 = vld [vmem:[%s12070_s9 + $0x8f8] sm:$0xff]  }
0x16e1   :  { %5859 = vmatpush1.bf16.msra.mxu1 %v8378_v30  ;;  %5902 = vmatpush1.bf16.msra.mxu0 %v8380_v31 }
0x16e2   :  { %6088 = vmatprep.subr.bf16.mxu1 %v8466_v47  ;;  %6131 = vmatprep.subr.bf16.mxu0 %v8468_v53 }
0x16e4   :  { %8386 = vmatmul.mubr.msk.bf16.vlgmr.msra.gmra.mxu1 %vm152_vm2, %v11402_v23  ;;  %8387 = vmatmul.mubr.msk.bf16.vlgmr.msra.gmra.mxu0 %vm152_vm2, %v11402_v23 }
0x16e5   :  { %6089 = vmatpush1.bf16.msra.mxu1 %v8465_v0  ;;  %6132 = vmatpush1.bf16.msra.mxu0 %v8467_v11 }
0x16e6   :  { %6090 = vmatprep.subr.bf16.mxu1 %v8462_v52  ;;  %6133 = vmatprep.subr.bf16.mxu0 %v8464_v18  ;;  %v5787_v52 = vrot.slane %v11719_v35, %v10186_v57  ;;  %v5795_v18 = vrot.slane %v11719_v35, %v10188_v58 }
0x16e7   :  { %6108 = vmatprep.mubr.bf16.mxu1 %v9811_v49  ;;  %6151 = vmatprep.mubr.bf16.mxu0 %v9811_v49 }
0x16e9   :  { %6091 = vmatpush1.bf16.msra.mxu1 %v8461_v44  ;;  %6134 = vmatpush1.bf16.msra.mxu0 %v8463_v45 }
0x16ea   :  { %9079 = vmatprep.subr.bf16.mxu1 %v9605_v51  ;;  %9101 = vmatprep.subr.bf16.mxu0 %v9606_v54 }
0x16ec   :  { %8469 = vmatmul.mubr.msk.bf16.vlgmr.msra.gmra.mxu1 %vm152_vm2, %v11402_v23  ;;  %8470 = vmatmul.mubr.msk.bf16.vlgmr.msra.gmra.mxu0 %vm152_vm2, %v11402_v23  ;;  %v9613_v23 = vld [vmem:[%s12070_s9 + $0xb68] sm:$0xff]  }
0x16ed   :  { %9080 = vmatpush3.bf16.msra.mxu1 %v9607_v9  ;;  %9102 = vmatpush3.bf16.msra.mxu0 %v9608_v63 }
0x16ee   :  { %9081 = vmatprep.subr.bf16.mxu1 %v9609_v48  ;;  %9103 = vmatprep.subr.bf16.mxu0 %v9610_v46 }
0x16f1   :  { %9082 = vmatpush3.bf16.msra.mxu1 %v9611_v36  ;;  %9104 = vmatpush3.bf16.msra.mxu0 %v9612_v41 }
0x16f2   :  { %9083 = vmatprep.subr.bf16.mxu1 %v9613_v23  ;;  %9105 = vmatprep.subr.bf16.mxu0 %v9614_v40 }
0x16f5   :  { %9084 = vmatpush3.bf16.msra.mxu1 %v9615_v2  ;;  %9106 = vmatpush3.bf16.msra.mxu0 %v9616_v3 }
0x16f6   :  { %9085 = vmatprep.subr.bf16.mxu1 %v9617_v5  ;;  %9107 = vmatprep.subr.bf16.mxu0 %v9618_v19 }
0x16f9   :  { %9086 = vmatpush3.bf16.msra.mxu1 %v9619_v28  ;;  %9108 = vmatpush3.bf16.msra.mxu0 %v9620_v4  ;;  %v8460_v4 = vld [vmem:[%s12069_s8 + $0x2c] sm:$0xf] }
0x16fa   :  { %9087 = vmatprep.subr.bf16.mxu1 %v9621_v10  ;;  %9109 = vmatprep.subr.bf16.mxu0 %v9622_v26 }
0x16fd   :  { %9088 = vmatpush3.bf16.msra.mxu1 %v9623_v20  ;;  %9110 = vmatpush3.bf16.msra.mxu0 %v9624_v32 }
0x16fe   :  { %9089 = vmatprep.subr.bf16.mxu1 %v9625_v6  ;;  %9111 = vmatprep.subr.bf16.mxu0 %v9626_v38  ;;  %v6023_v6 = vrot.slane %v8460_v4, %v10193_v60  ;;  %v6031_v38 = vrot.slane %v8460_v4, %v10195_v61 }
0x1701   :  { %9090 = vmatpush3.bf16.msra.mxu1 %v9627_v14  ;;  %9112 = vmatpush3.bf16.msra.mxu0 %v9628_v15  ;;  %v6019_v14 = vrot.slane %v8460_v4, %v10186_v57  ;;  %v6027_v15 = vrot.slane %v8460_v4, %v10188_v58  ;;  %v9653_v4 = vld [vmem:[%s12070_s9 + $0x858] sm:$0xff]  }
0x1702   :  { %9091 = vmatprep.subr.bf16.mxu1 %v9629_v24  ;;  %9113 = vmatprep.subr.bf16.mxu0 %v9630_v25 }
0x1705   :  { %9092 = vmatpush3.bf16.msra.mxu1 %v9631_v7  ;;  %9114 = vmatpush3.bf16.msra.mxu0 %v9632_v12 }
0x1706   :  { %9093 = vmatprep.subr.bf16.mxu1 %v9633_v43  ;;  %9115 = vmatprep.subr.bf16.mxu0 %v9634_v29 }
0x1709   :  { %9094 = vmatpush3.bf16.msra.mxu1 %v9635_v55  ;;  %9116 = vmatpush3.bf16.msra.mxu0 %v9636_v39 }
0x170a   :  { %9123 = vmatprep.subr.bf16.mxu1 %v9637_v27  ;;  %9145 = vmatprep.subr.bf16.mxu0 %v9638_v8 }
0x179c   :  { %v9051_v21 = vpop.f32.mrf.mxu1  ;;  %v9073_v13 = vpop.f32.mrf.mxu0 }
0x179e   :  { %v9052_v22 = vpop.f32.mrf.mxu1  ;;  %v9074_v56 = vpop.f32.mrf.mxu0 }
0x179f   :  { %v9053_v30 = vadd.f32 %v9052_v22, %v9051_v21  ;;  %v9075_v31 = vadd.f32 %v9074_v56, %v9073_v13 }
0x17a0   :  { %v9054_v47 = vpop.f32.mrf.mxu1  ;;  %v9076_v53 = vpop.f32.mrf.mxu0 }
0x17a1   :  { %v11721_v37 = vadd.f32 %v9075_v31, %v9053_v30 }
0x17a2   :  { %v9055_v50 = vpop.f32.mrf.mxu1  ;;  %v9077_v42 = vpop.f32.mrf.mxu0 }
0x17a3   :  { %v9056_v0 = vadd.f32 %v9055_v50, %v9054_v47  ;;  %v9078_v11 = vadd.f32 %v9077_v42, %v9076_v53 }
0x17a4   :  { %v5878_v44 = vpop.f32.mrf.mxu1  ;;  %v5921_v45 = vpop.f32.mrf.mxu0 }
0x17a5   :  { %v11727_v51 = vadd.f32 %v9078_v11, %v9056_v0  ;;  %v5879_v63 = vadd.f32 %v5878_v44, %v5787_v52  ;;  %v5922_v48 = vadd.f32 %v5921_v45, %v5795_v18 }
0x17a6   :  { %v11729_v54 = vpop.f32.mrf.mxu1  ;;  %v11731_v9 = vpop.f32.mrf.mxu0 }
0x17a7   :  { %v5930_v3 = vmax.f32 %v5879_v63, 0.0  ;;  %v5932_v5 = vmax.f32 %v5922_v48, 0.0  ;;  %v9641_v63 = vld [vmem:[%s12070_s9 + $0x870] sm:$0xff]  }
0x17a8   :  { %v5882_v46 = vpop.f32.mrf.mxu1  ;;  %v5925_v36 = vpop.f32.mrf.mxu0  ;;  %v9642_v48 = vld [vmem:[%s12070_s9 + $0x8f0] sm:$0xff]  }
0x17a9   :  { %v5883_v41 = vadd.f32 %v5882_v46, %v5787_v52  ;;  %v5926_v23 = vadd.f32 %v5925_v36, %v5795_v18  ;;  %v9639_v52 = vld [vmem:[%s12070_s9 + $0x838] sm:$0xff]   ;;  %v9643_v46 = vld [vmem:[%s12070_s9 + $0x830] sm:$0xff]  }
0x17aa   :  { %v11733_v40 = vpop.f32.mrf.mxu1  ;;  %v11735_v2 = vpop.f32.mrf.mxu0  ;;  %v9640_v18 = vld [vmem:[%s12070_s9 + $0x8b8] sm:$0xff]   ;;  %v9644_v36 = vld [vmem:[%s12070_s9 + $0x8b0] sm:$0xff]  }
0x17ab   :  { %v5934_v19 = vmax.f32 %v5883_v41, 0.0  ;;  %v5936_v28 = vmax.f32 %v5926_v23, 0.0  ;;  %v9645_v41 = vld [vmem:[%s12070_s9 + $0x868] sm:$0xff]  }
0x17ac   :  { %v6110_v10 = vpop.f32.mrf.mxu1  ;;  %v6153_v26 = vpop.f32.mrf.mxu0  ;;  %v9646_v23 = vld [vmem:[%s12070_s9 + $0x8e8] sm:$0xff]  }
0x17ad   :  { %v11740_v20 = vpack.c.bf16 %v5934_v19, %v5930_v3  ;;  %v11742_v32 = vpack.c.bf16 %v5936_v28, %v5932_v5  ;;  %v6111_v27 = vadd.f32 %v6110_v10, %v6019_v14  ;;  %v6154_v8 = vadd.f32 %v6153_v26, %v6027_v15  ;;  %v9647_v3 = vld [vmem:[%s12070_s9 + $0x828] sm:$0xff]   ;;  %v9650_v5 = vld [vmem:[%s12070_s9 + $0x8e0] sm:$0xff]   ;;  %v9654_v10 = vld [vmem:[%s12070_s9 + $0x8d8] sm:$0xff]  }
0x17ae   :  { %v6112_v24 = vpop.f32.mrf.mxu1  ;;  %v6155_v25 = vpop.f32.mrf.mxu0  ;;  %v9651_v19 = vld [vmem:[%s12070_s9 + $0x820] sm:$0xff]   ;;  %v9655_v26 = vld [vmem:[%s12070_s9 + $0x818] sm:$0xff]  }
0x17af   :  { %v6113_v43 = vadd.f32 %v6112_v24, %v6023_v6  ;;  %v6156_v29 = vadd.f32 %v6155_v25, %v6031_v38  ;;  %v6162_v50 = vmax.f32 %v6111_v27, 0.0  ;;  %v6164_v42 = vmax.f32 %v6154_v8, 0.0  ;;  %v9652_v28 = vld [vmem:[%s12070_s9 + $0x8a0] sm:$0xff]   ;;  %v9660_v24 = vld [vmem:[%s12070_s9 + $0x890] sm:$0xff]   ;;  %v9661_v25 = vld [vmem:[%s12070_s9 + $0x848] sm:$0xff]  }
0x17b0   :  { %v6114_v7 = vpop.f32.mrf.mxu1  ;;  %v6157_v12 = vpop.f32.mrf.mxu0 }
0x17b1   :  { %v6115_v55 = vadd.f32 %v6114_v7, %v6019_v14  ;;  %v6158_v39 = vadd.f32 %v6157_v12, %v6027_v15  ;;  %v6163_v47 = vmax.f32 %v6113_v43, 0.0  ;;  %v6165_v57 = vmax.f32 %v6156_v29, 0.0  ;;  %v9658_v14 = vld [vmem:[%s12070_s9 + $0x8d0] sm:$0xff]   ;;  %v9662_v7 = vld [vmem:[%s12070_s9 + $0x8c8] sm:$0xff]  }
0x17b2   :  { %v6116_v21 = vpop.f32.mrf.mxu1  ;;  %v6159_v13 = vpop.f32.mrf.mxu0  ;;  %v9659_v15 = vld [vmem:[%s12070_s9 + $0x810] sm:$0xff]   ;;  %v5791_v12 = vrot.slane %v11719_v35, %v10193_v60  ;;  %v9663_v43 = vld [vmem:[%s12070_s9 + $0x808] sm:$0xff]   ;;  %v9666_v60 = vld [vmem:[%s12070_s9 + $0x8c0] sm:$0xff]  }
0x17b3   :  { %v6117_v22 = vadd.f32 %v6116_v21, %v6023_v6  ;;  %v6160_v56 = vadd.f32 %v6159_v13, %v6031_v38  ;;  %v6166_v30 = vmax.f32 %v6115_v55, 0.0  ;;  %v6168_v31 = vmax.f32 %v6158_v39, 0.0  ;;  %v9656_v6 = vld [vmem:[%s12070_s9 + $0x898] sm:$0xff]   ;;  %v9657_v38 = vld [vmem:[%s12070_s9 + $0x850] sm:$0xff]   ;;  %v9664_v29 = vld [vmem:[%s12070_s9 + $0x888] sm:$0xff]  }
0x17b4   :  { %v5799_v55 = vrot.slane %v11719_v35, %v10195_v61  ;;  %v9665_v39 = vld [vmem:[%s12070_s9 + $0x840] sm:$0xff]   ;;  %v5885_v27 = vadd.f32 %v11733_v40, %v5791_v12  ;;  %v5881_v21 = vadd.f32 %v11729_v54, %v5791_v12  ;;  %v9669_v40 = vld [vmem:[%s12070_s9 + $0xa78] sm:$0xff]  }
0x17b5   :  { %v6167_v53 = vmax.f32 %v6117_v22, 0.0  ;;  %v6169_v58 = vmax.f32 %v6160_v56, 0.0  ;;  %v6170_v44 = vpack.c.bf16 %v6166_v30, %v6162_v50  ;;  %v6172_v45 = vpack.c.bf16 %v6168_v31, %v6164_v42  ;;  %v9667_v61 = vld [vmem:[%s12070_s9 + $0x800] sm:$0xff]   ;;  %v9670_v54 = vld [vmem:[%s12070_s9 + $0xaf8] sm:$0xff]   ;;  %v9675_v50 = vld [vmem:[%s12070_s9 + $0xa30] sm:$0xff]  }
0x17b6   :  { %v5928_v8 = vadd.f32 %v11735_v2, %v5799_v55  ;;  %v9668_v35 = vld [vmem:[%s12070_s9 + $0x880] sm:$0xff]   ;;  %v5924_v13 = vadd.f32 %v11731_v9, %v5799_v55  ;;  %v5935_v2 = vmax.f32 %v5885_v27, 0.0  ;;  %v5931_v56 = vmax.f32 %v5881_v21, 0.0  ;;  %v9671_v30 = vld [vmem:[%s12070_s9 + $0xa38] sm:$0xff]   ;;  %v9676_v42 = vld [vmem:[%s12070_s9 + $0xab0] sm:$0xff]  }
0x17b7   :  { %v6171_v0 = vpack.c.bf16 %v6167_v53, %v6163_v47  ;;  %v6173_v11 = vpack.c.bf16 %v6169_v58, %v6165_v57  ;;  %v9672_v31 = vld [vmem:[%s12070_s9 + $0xab8] sm:$0xff]   ;;  %v9673_v57 = vld [vmem:[%s12070_s9 + $0xa70] sm:$0xff]  }
0x17b8   :  { %v5937_v22 = vmax.f32 %v5928_v8, 0.0  ;;  %v5933_v9 = vmax.f32 %v5924_v13, 0.0  ;;  %v5939_v47 = vpack.c.bf16 %v5935_v2, %v5931_v56  ;;  %v9674_v53 = vld [vmem:[%s12070_s9 + $0xaf0] sm:$0xff]  }
0x17b9   :  { %6462 = vmatprep.mubr.bf16.mxu1 %v6171_v0  ;;  %6503 = vmatprep.mubr.bf16.mxu0 %v6173_v11  ;;  %v9677_v0 = vld [vmem:[%s12070_s9 + $0xa68] sm:$0xff]  }
0x17ba   :  { %6463 = vmatmul.mubr.bf16.vlgmr.msra.gmra.mxu1 %v6170_v44  ;;  %6504 = vmatmul.mubr.bf16.vlgmr.msra.gmra.mxu0 %v6172_v45  ;;  %v5941_v58 = vpack.c.bf16 %v5937_v22, %v5933_v9  ;;  %v9680_v11 = vld [vmem:[%s12070_s9 + $0xaa8] sm:$0xff]   ;;  %v9683_v44 = vld [vmem:[%s12070_s9 + $0xa20] sm:$0xff]  }
0x17bb   :  { %9124 = vmatpush3.bf16.msra.mxu1 %v9639_v52  ;;  %9146 = vmatpush3.bf16.msra.mxu0 %v9640_v18  ;;  %v9681_v52 = vld [vmem:[%s12070_s9 + $0xa60] sm:$0xff]  }
0x17bc   :  { %6736 = vmatprep.mubr.bf16.mxu1 %v11556_v59  ;;  %6777 = vmatprep.mubr.bf16.mxu0 %v11558_v62  ;;  %v9648_v59 = vld [vmem:[%s12070_s9 + $0x8a8] sm:$0xff]   ;;  %v9649_v62 = vld [vmem:[%s12070_s9 + $0x860] sm:$0xff]  }
0x17bd   :  { %9125 = vmatprep.subr.bf16.mxu1 %v9641_v63  ;;  %9147 = vmatprep.subr.bf16.mxu0 %v9642_v48  ;;  %v9682_v18 = vld [vmem:[%s12070_s9 + $0xae0] sm:$0xff]   ;;  %v9685_v63 = vld [vmem:[%s12070_s9 + $0xa58] sm:$0xff]  }
0x17be   :  { %v9684_v45 = vld [vmem:[%s12070_s9 + $0xaa0] sm:$0xff]   ;;  %v9686_v48 = vld [vmem:[%s12070_s9 + $0xad8] sm:$0xff]  }
0x17bf   :  { %9126 = vmatpush3.bf16.msra.mxu1 %v9643_v46  ;;  %9148 = vmatpush3.bf16.msra.mxu0 %v9644_v36  ;;  %v9687_v46 = vld [vmem:[%s12070_s9 + $0xa18] sm:$0xff]  }
0x17c0   :  { %9127 = vmatprep.subr.bf16.mxu1 %v9645_v41  ;;  %9149 = vmatprep.subr.bf16.mxu0 %v9646_v23  ;;  %v9688_v36 = vld [vmem:[%s12070_s9 + $0xa98] sm:$0xff]   ;;  %v9689_v41 = vld [vmem:[%s12070_s9 + $0xa50] sm:$0xff]  }
0x17c1   :  { %v9690_v23 = vld [vmem:[%s12070_s9 + $0xad0] sm:$0xff]  }
0x17c3   :  { %9128 = vmatpush3.bf16.msra.mxu1 %v9647_v3  ;;  %9150 = vmatpush3.bf16.msra.mxu0 %v9648_v59  ;;  %v9691_v3 = vld [vmem:[%s12070_s9 + $0xa10] sm:$0xff]  }
0x17c4   :  { %9129 = vmatprep.subr.bf16.mxu1 %v9649_v62  ;;  %9151 = vmatprep.subr.bf16.mxu0 %v9650_v5  ;;  %v9692_v59 = vld [vmem:[%s12070_s9 + $0xa90] sm:$0xff]   ;;  %v9693_v62 = vld [vmem:[%s12070_s9 + $0xa48] sm:$0xff]  }
0x17c5   :  { %v9694_v5 = vld [vmem:[%s12070_s9 + $0xac8] sm:$0xff]  }
0x17c7   :  { %9130 = vmatpush3.bf16.msra.mxu1 %v9651_v19  ;;  %9152 = vmatpush3.bf16.msra.mxu0 %v9652_v28  ;;  %v9695_v19 = vld [vmem:[%s12070_s9 + $0xa08] sm:$0xff]  }
0x17c8   :  { %9131 = vmatprep.subr.bf16.mxu1 %v9653_v4  ;;  %9153 = vmatprep.subr.bf16.mxu0 %v9654_v10  ;;  %v9696_v28 = vld [vmem:[%s12070_s9 + $0xa88] sm:$0xff]   ;;  %v9697_v4 = vld [vmem:[%s12070_s9 + $0xa40] sm:$0xff]  }
0x17c9   :  { %v9698_v10 = vld [vmem:[%s12070_s9 + $0xac0] sm:$0xff]  }
0x17cb   :  { %9132 = vmatpush3.bf16.msra.mxu1 %v9655_v26  ;;  %9154 = vmatpush3.bf16.msra.mxu0 %v9656_v6  ;;  %v9699_v26 = vld [vmem:[%s12070_s9 + $0xa00] sm:$0xff]  }
0x17cc   :  { %9133 = vmatprep.subr.bf16.mxu1 %v9657_v38  ;;  %9155 = vmatprep.subr.bf16.mxu0 %v9658_v14  ;;  %v9700_v6 = vld [vmem:[%s12070_s9 + $0xa80] sm:$0xff]  }
0x17cf   :  { %9134 = vmatpush3.bf16.msra.mxu1 %v9659_v15  ;;  %9156 = vmatpush3.bf16.msra.mxu0 %v9660_v24 }
0x17d0   :  { %9135 = vmatprep.subr.bf16.mxu1 %v9661_v25  ;;  %9157 = vmatprep.subr.bf16.mxu0 %v9662_v7 }
0x17d3   :  { %9136 = vmatpush3.bf16.msra.mxu1 %v9663_v43  ;;  %9158 = vmatpush3.bf16.msra.mxu0 %v9664_v29 }
0x17d4   :  { %9137 = vmatprep.subr.bf16.mxu1 %v9665_v39  ;;  %9159 = vmatprep.subr.bf16.mxu0 %v9666_v60 }
0x17d7   :  { %9138 = vmatpush3.bf16.msra.mxu1 %v9667_v61  ;;  %9160 = vmatpush3.bf16.msra.mxu0 %v9668_v35 }
0x17d8   :  { %9167 = vmatprep.subr.bf16.mxu1 %v9669_v40  ;;  %9189 = vmatprep.subr.bf16.mxu0 %v9670_v54 }
0x17da   :  { %6737 = vmatmul.mubr.bf16.vlgmr.msra.gmra.mxu1 %v11550_v33  ;;  %6778 = vmatmul.mubr.bf16.vlgmr.msra.gmra.mxu0 %v11552_v34  ;;  %v9678_v33 = vld [vmem:[%s12070_s9 + $0xae8] sm:$0xff]  }
0x17db   :  { %9168 = vmatpush3.bf16.msra.mxu1 %v9671_v30  ;;  %7010 = vmatprep.mubr.bf16.mxu1 %v5939_v47  ;;  %v9679_v34 = vld [vmem:[%s12070_s9 + $0xa28] sm:$0xff]  }
0x17dc   :  { %9190 = vmatpush3.bf16.msra.mxu0 %v9672_v31  ;;  %7051 = vmatprep.mubr.bf16.mxu0 %v5941_v58 }
0x17dd   :  { %9169 = vmatprep.subr.bf16.mxu1 %v9673_v57  ;;  %9191 = vmatprep.subr.bf16.mxu0 %v9674_v53 }
0x17df   :  { %9170 = vmatpush3.bf16.msra.mxu1 %v9675_v50 }
0x17e0   :  { %9192 = vmatpush3.bf16.msra.mxu0 %v9676_v42  ;;  %9171 = vmatprep.subr.bf16.mxu1 %v9677_v0 }
0x17e1   :  { %9193 = vmatprep.subr.bf16.mxu0 %v9678_v33 }
0x17e3   :  { %9172 = vmatpush3.bf16.msra.mxu1 %v9679_v34 }
0x17e4   :  { %9194 = vmatpush3.bf16.msra.mxu0 %v9680_v11  ;;  %9173 = vmatprep.subr.bf16.mxu1 %v9681_v52 }
0x17e5   :  { %9195 = vmatprep.subr.bf16.mxu0 %v9682_v18 }
0x17e7   :  { %9174 = vmatpush3.bf16.msra.mxu1 %v9683_v44 }
0x17e8   :  { %9196 = vmatpush3.bf16.msra.mxu0 %v9684_v45  ;;  %9175 = vmatprep.subr.bf16.mxu1 %v9685_v63 }
0x17e9   :  { %9197 = vmatprep.subr.bf16.mxu0 %v9686_v48 }
0x17eb   :  { %9176 = vmatpush3.bf16.msra.mxu1 %v9687_v46 }
0x17ec   :  { %9198 = vmatpush3.bf16.msra.mxu0 %v9688_v36  ;;  %9177 = vmatprep.subr.bf16.mxu1 %v9689_v41 }
0x17ed   :  { %9199 = vmatprep.subr.bf16.mxu0 %v9690_v23 }
0x17ef   :  { %9178 = vmatpush3.bf16.msra.mxu1 %v9691_v3 }
0x17f0   :  { %9200 = vmatpush3.bf16.msra.mxu0 %v9692_v59  ;;  %9179 = vmatprep.subr.bf16.mxu1 %v9693_v62 }
0x17f1   :  { %9201 = vmatprep.subr.bf16.mxu0 %v9694_v5 }
0x17f3   :  { %9180 = vmatpush3.bf16.msra.mxu1 %v9695_v19 }
0x17f4   :  { %9202 = vmatpush3.bf16.msra.mxu0 %v9696_v28  ;;  %9181 = vmatprep.subr.bf16.mxu1 %v9697_v4 }
0x17f5   :  { %9203 = vmatprep.subr.bf16.mxu0 %v9698_v10 }
0x17f7   :  { %9182 = vmatpush3.bf16.msra.mxu1 %v9699_v26 }
0x17f8   :  { %9204 = vmatpush3.bf16.msra.mxu0 %v9700_v6 }
0x17fa   :  { %7011 = vmatmul.mubr.bf16.vlgmr.msra.gmra.mxu1 %v11740_v20 }
0x17fb   :  { %7052 = vmatmul.mubr.bf16.vlgmr.msra.gmra.mxu0 %v11742_v32  ;;  %7180 = vmatprep.mubr.bf16.mxu1 %v9811_v49 }
0x187a   :  { %v9095_v38 = vpop.f32.mrf.mxu1  ;;  %v9117_v14 = vpop.f32.mrf.mxu0 }
0x187c   :  { %v9096_v15 = vpop.f32.mrf.mxu1  ;;  %v9118_v24 = vpop.f32.mrf.mxu0 }
0x187d   :  { %v9097_v20 = vadd.f32 %v9096_v15, %v9095_v38  ;;  %v9119_v61 = vadd.f32 %v9118_v24, %v9117_v14  ;;  %v9701_v24 = vld [vmem:[%s12076_s15 + $0x10] ss:$8 sps:$4 sm:$0xff]  }
0x187e   :  { %v9098_v25 = vpop.f32.mrf.mxu1  ;;  %v9120_v7 = vpop.f32.mrf.mxu0 }
0x187f   :  { %v6506_v22 = vadd.f32 %v9119_v61, %v9097_v20  ;;  %v9716_v20 = vld [vmem:[%s12078_s17 + $0x18] sm:$0xff]  }
0x1880   :  { %v9099_v12 = vpop.f32.mrf.mxu1  ;;  %v9121_v43 = vpop.f32.mrf.mxu0 }
0x1881   :  { %v9100_v40 = vadd.f32 %v9099_v12, %v9098_v25  ;;  %v9122_v54 = vadd.f32 %v9121_v43, %v9120_v7  ;;  %v9706_v25 = vld [vmem:[%s12076_s15 + $0x4] ss:$8 sps:$4 sm:$0xff]   ;;  %v9704_v7 = vld [vmem:[%s12076_s15] ss:$8 sps:$4 sm:$0xff]   ;;  %v9707_v12 = vld [vmem:[%s12078_s17 + $0x78] sm:$0xff]  }
0x1882   :  { %v9708_v43 = vld [vmem:[%s12078_s17 + $0x38] sm:$0xff]   ;;  %9211 = vmatprep.subr.bf16.mxu0 %v9707_v12 }
0x1883   :  { %v6509_v42 = vadd.f32 %v9122_v54, %v9100_v40  ;;  %9212 = vmatpush3.bf16.msra.mxu0 %v9708_v43 }
0x189a   :  { %v9139_v29 = vpop.f32.mrf.mxu1  ;;  %v9161_v55 = vpop.f32.mrf.mxu0 }
0x189c   :  { %v9140_v39 = vpop.f32.mrf.mxu1  ;;  %v9162_v60 = vpop.f32.mrf.mxu0 }
0x189d   :  { %v9141_v32 = vadd.f32 %v9140_v39, %v9139_v29  ;;  %v9163_v57 = vadd.f32 %v9162_v60, %v9161_v55  ;;  %v9709_v29 = vld [vmem:[%s12078_s17 + $0x70] sm:$0xff]   ;;  %v9711_v39 = vld [vmem:[%s12078_s17 + $0x68] sm:$0xff]  }
0x189e   :  { %v9142_v27 = vpop.f32.mrf.mxu1  ;;  %v9164_v8 = vpop.f32.mrf.mxu0  ;;  %v9710_v55 = vld [vmem:[%s12078_s17 + $0x30] sm:$0xff]   ;;  %9213 = vmatprep.subr.bf16.mxu0 %v9709_v29  ;;  %v9712_v60 = vld [vmem:[%s12078_s17 + $0x28] sm:$0xff]  }
0x189f   :  { %v6739_v56 = vadd.f32 %v9141_v32, %v11721_v37  ;;  %v8632_v37 = vld [vmem:[%s12071_s10 + $0x2] ss:$0 sm:$0xff]  ;;  %9214 = vmatpush3.bf16.msra.mxu0 %v9710_v55 }
0x18a0   :  { %v9143_v21 = vpop.f32.mrf.mxu1  ;;  %v9165_v35 = vpop.f32.mrf.mxu0  ;;  %9215 = vmatprep.subr.bf16.mxu0 %v9711_v39 }
0x18a1   :  { %v9144_v30 = vadd.f32 %v9143_v21, %v9142_v27  ;;  %v6780_v33 = vadd.f32 %v9163_v57, %v6739_v56  ;;  %v9166_v44 = vadd.f32 %v9165_v35, %v9164_v8  ;;  %v9713_v27 = vld [vmem:[%s12078_s17 + $0x60] sm:$0xff]   ;;  %v9715_v21 = vld [vmem:[%s12078_s17 + $0x58] sm:$0xff]  }
0x18a2   :  { %v9714_v8 = vld [vmem:[%s12078_s17 + $0x20] sm:$0xff]  }
0x18a3   :  { %v6742_v34 = vadd.f32 %v9144_v30, %v11727_v51  ;;  %9216 = vmatpush3.bf16.msra.mxu0 %v9712_v60  ;;  %v8658_v60 = vld [vmem:[%s12079_s18] ss:$0 sm:$0xff]  ;;  %s9785_s18 = scalar_lea.vmem %s7471_s12, 32 }
0x18a4   :  { %9217 = vmatprep.subr.bf16.mxu0 %v9713_v27  ;;  %p9786_p0 = scmp.ne.s32.totalorder %s7471_s12, %s9785_s18  ;;  %p9791_p2 = scmp.lt.s32.totalorder %s9785_s18, %s9785_s18 }
0x18a5   :  { %v6783_v46 = vadd.f32 %v9166_v44, %v6742_v34  ;;  %v9721_v34 = vld [vmem:[%s12078_s17 + $0x40] sm:$0xff]   ;;  %v7192_v44 = vld [vmem:[%s12077_s16 + $0x8] sm:$0xff] }
0x18a6   :  { %p9792_p3 = por %p9791_p2, %p9790_p1 }
0x18a7   :  { %9218 = vmatpush3.bf16.msra.mxu0 %v9714_v8 }
0x18a8   :  { %9219 = vmatprep.subr.bf16.mxu0 %v9715_v21  ;;  %p9793_p4 = pnand %p9792_p3, %p9786_p0 }
0x18ab   :  { %9220 = vmatpush3.bf16.msra.mxu0 %v9716_v20 }
0x18ba   :  { %v9183_v49 = vpop.f32.mrf.mxu1 }
0x18bb   :  { %v9205_v13 = vpop.f32.mrf.mxu0 }
0x18bc   :  { %v9184_v2 = vpop.f32.mrf.mxu1 }
0x18bd   :  { %v9185_v9 = vadd.f32 %v9184_v2, %v9183_v49  ;;  %v9206_v31 = vpop.f32.mrf.mxu0 }
0x18be   :  { %v9186_v47 = vpop.f32.mrf.mxu1  ;;  %v9207_v58 = vadd.f32 %v9206_v31, %v9205_v13  ;;  %v8636_v31 = vld [vmem:[%s12075_s14 + $0x2] ss:$0 sm:$0xff] }
0x18bf   :  { %v7013_v53 = vadd.f32 %v9185_v9, %v6506_v22  ;;  %v9208_v50 = vpop.f32.mrf.mxu0  ;;  %v8635_v22 = vld [vmem:[%s12074_s13 + $0x2] ss:$0 sm:$0xff] }
0x18c0   :  { %v9187_v0 = vpop.f32.mrf.mxu1 }
0x18c1   :  { %v7054_v11 = vadd.f32 %v9207_v58, %v7013_v53  ;;  %v9188_v52 = vadd.f32 %v9187_v0, %v9186_v47  ;;  %v9209_v18 = vpop.f32.mrf.mxu0  ;;  %v9719_v0 = vld [vmem:[%s12078_s17 + $0x48] sm:$0xff]  }
0x18c2   :  { %v9210_v48 = vadd.f32 %v9209_v18, %v9208_v50  ;;  %v9717_v50 = vld [vmem:[%s12078_s17 + $0x50] sm:$0xff]  }
0x18c3   :  { %v7060_v45 = vadd.f32 %v7054_v11, %v6780_v33  ;;  %v7016_v63 = vadd.f32 %v9188_v52, %v6509_v42  ;;  %v9718_v42 = vld [vmem:[%s12078_s17 + $0x10] sm:$0xff]   ;;  %9221 = vmatprep.subr.bf16.mxu0 %v9717_v50  ;;  %v9720_v33 = vld [vmem:[%s12078_s17 + $0x8] sm:$0xff]   ;;  %v9722_v11 = vld [vmem:[%s12078_s17] sm:$0xff]  }
0x18c4   :  { %9222 = vmatpush3.bf16.msra.mxu0 %v9718_v42 }
0x18c5   :  { %v7057_v36 = vadd.f32 %v9210_v48, %v7016_v63  ;;  %v7070_v41 = vadd.f32 %v8632_v37, %v7060_v45  ;;  %9223 = vmatprep.subr.bf16.mxu0 %v9719_v0  ;;  %v7194_v63 = vld [vmem:[%s12077_s16 + $0x18] sm:$0xff]  ;;  %v7191_v48 = vld [vmem:[%s12077_s16] sm:$0xff] }
0x18c7   :  { %v7061_v23 = vadd.f32 %v7057_v36, %v6783_v46  ;;  %v7072_v3 = vadd.f32 %v7070_v41, %v11396_v16 }
0x18c8   :  { %9224 = vmatpush3.bf16.msra.mxu0 %v9720_v33 }
0x18c9   :  { %v7078_v59 = vsel %vm152_vm2, %v7072_v3, 0.0  ;;  %v7071_v51 = vadd.f32 %v8632_v37, %v7061_v23  ;;  %9225 = vmatprep.subr.bf16.mxu0 %v9721_v34  ;;  %v7193_v37 = vld [vmem:[%s12077_s16 + $0x10] sm:$0xff] }
0x18ca   :  { %7079 = vadd.xlane.f32.xlu0 %v7078_v59 }
0x18cb   :  { %v7073_v62 = vadd.f32 %v7071_v51, %v11398_v17  ;;  %v9703_v17 = vld [vmem:[%s12076_s15 + $0x14] ss:$8 sps:$4 sm:$0xff]  }
0x18cc   :  { %7160 = vmatprep.subr.bf16.mxu1 %v9703_v17  ;;  %9226 = vmatpush3.bf16.msra.mxu0 %v9722_v11 }
0x18cd   :  { %v7081_v5 = vsel %vm152_vm2, %v7073_v62, 0.0  ;;  %7161 = vmatpush1.bf16.msra.mxu1 %v9701_v24 }
0x18ce   :  { %7082 = vadd.xlane.f32.xlu0 %v7081_v5  ;;  %7162 = vmatprep.subr.bf16.mxu1 %v9706_v25  ;;  %v9724_v5 = vld [vmem:[%s12080_s19] sm:$0xff]  }
0x18d1   :  { %7163 = vmatpush1.bf16.msra.mxu1 %v9704_v7 }
0x18d2   :  { %9290 = vmatprep.subr.bf16.mxu1 %v9807_v1 }
0x1953   :  { %v7080_v19 = vpop.xlane.xlu0 %7079 }
0x1954   :  { %v7084_v28 = vmul.f32 0.03125, %v7080_v19 }
0x1956   :  { %v7086_v4 = vsub.f32 %v7072_v3, %v7084_v28 }
0x1957   :  { %v7083_v10 = vpop.xlane.xlu0 %7082 }
0x1958   :  { %v7085_v26 = vmul.f32 0.03125, %v7083_v10  ;;  %v7088_v6 = vmul.f32 %v7086_v4, %v7086_v4 }
0x195a   :  { %v7087_v38 = vsub.f32 %v7073_v62, %v7085_v26  ;;  %v7090_v14 = vsel %vm152_vm2, %v7088_v6, 0.0  ;;  %v9723_v62 = vld [vmem:[%s12080_s19 + $0x8] sm:$0xff]  }
0x195b   :  { %7091 = vadd.xlane.f32.xlu0 %v7090_v14 }
0x195c   :  { %v7089_v16 = vmul.f32 %v7087_v38, %v7087_v38 }
0x195e   :  { %v7093_v15 = vsel %vm152_vm2, %v7089_v16, 0.0 }
0x195f   :  { %7094 = vadd.xlane.f32.xlu0 %v7093_v15 }
0x19e4   :  { %v7092_v61 = vpop.xlane.xlu0 %7091 }
0x19e5   :  { %v7096_v32 = vmul.f32 0.03125, %v7092_v61  ;;  %v8659_v61 = vld [vmem:[%s12081_s20] ss:$0 sm:$0xff] }
0x19e7   :  { %v7098_v35 = vadd.f32 1e-05, %v7096_v32 }
0x19e8   :  { %v7095_v49 = vpop.xlane.xlu0 %7094 }
0x19e9   :  { %9781 = vrsqrt.f32 %v7098_v35  ;;  %v7097_v13 = vmul.f32 0.03125, %v7095_v49 }
0x19eb   :  { %v7099_v40 = vadd.f32 1e-05, %v7097_v13 }
0x19ed   :  { %9783 = vrsqrt.f32 %v7099_v40 }
0x19f6   :  { %v9782_v54 = vpop.eup %9781 }
0x19f7   :  { %v7102_v2 = vmul.f32 %v9782_v54, %v7086_v4 }
0x19f9   :  { %v7110_v30 = vmul.f32 %v8635_v22, %v7102_v2 }
0x19fa   :  { %v9784_v56 = vpop.eup %9783 }
0x19fb   :  { %v7103_v9 = vmul.f32 %v9784_v56, %v7087_v38  ;;  %v7118_v53 = vadd.f32 %v8636_v31, %v7110_v30 }
0x19fd   :  { %v7111_v47 = vmul.f32 %v8635_v22, %v7103_v9 }
0x19ff   :  { %v7119_v57 = vadd.f32 %v8636_v31, %v7111_v47 }
0x1a01   :  { %v7120_v58 = vpack.c.bf16 %v7119_v57, %v7118_v53 }
0x1a03   :  { %8641 = vmatmul.mubr.msk.bf16.vlgmr.msra.gmra.mxu1 %vm152_vm2, %v7120_v58 }
0x1a04   :  { %9294 = vmatprep.mubr.msk.bf16.mxu1 %vm9808_vm1, %v9807_v1  ;;  %9291 = vmatpush3.bf16.msra.mxu1 %v9723_v62 }
0x1a05   :  { %9292 = vmatprep.subr.bf16.mxu1 %v9807_v1 }
0x1a08   :  { %9293 = vmatpush3.bf16.msra.mxu1 %v9724_v5 }
0x1ac3   :  { %v7182_v52 = vpop.f32.mrf.mxu1 }
0x1ac4   :  { %v7195_v3 = vmul.f32 %v7191_v48, %v7182_v52 }
0x1ac5   :  { %v7184_v18 = vpop.f32.mrf.mxu1 }
0x1ac6   :  { %v7196_v41 = vmul.f32 %v7192_v44, %v7184_v18 }
0x1ac7   :  { %v7186_v45 = vpop.f32.mrf.mxu1 }
0x1ac8   :  { %v7197_v46 = vmul.f32 %v7193_v37, %v7186_v45 }
0x1ac9   :  { %v7188_v36 = vpop.f32.mrf.mxu1 }
0x1aca   :  { %v7198_v23 = vmul.f32 %v7194_v63, %v7188_v36  ;;  %v7199_v51 = vpack.c.bf16 %v7197_v46, %v7195_v3 }
0x1acc   :  { %v7200_v59 = vpack.c.bf16 %v7198_v23, %v7196_v41 }
0x1ace   :  { %7361 = vmatprep.mubr.bf16.mxu0 %v7200_v59 }
0x1acf   :  { %7362 = vmatmul.mubr.bf16.vlgmr.msra.gmra.mxu0 %v7199_v51 }
0x1b8f   :  { %v9227_v19 = vpop.f32.mrf.mxu0 }
0x1b91   :  { %v9228_v28 = vpop.f32.mrf.mxu0 }
0x1b92   :  { %v9229_v4 = vadd.f32 %v9228_v28, %v9227_v19 }
0x1b93   :  { %v9230_v10 = vpop.f32.mrf.mxu0 }
0x1b94   :  { %v7370_v26 = vsel %vm152_vm2, %v9229_v4, 0.0 }
0x1b95   :  { %v7371_v6 = vrot.slane %v7370_v26, 4  ;;  %v9231_v38 = vpop.f32.mrf.mxu0 }
0x1b96   :  { %v9232_v14 = vadd.f32 %v9231_v38, %v9230_v10 }
0x1b97   :  { %v7372_v16 = vadd.f32 %v7371_v6, %v7370_v26 }
0x1b98   :  { %v7377_v15 = vsel %vm152_vm2, %v9232_v14, 0.0 }
0x1b99   :  { %v7373_v17 = vrot.slane %v7372_v16, 2  ;;  %v7378_v24 = vrot.slane %v7377_v15, 4 }
0x1b9b   :  { %v7374_v1 = vadd.f32 %v7373_v17, %v7372_v16  ;;  %v7379_v25 = vadd.f32 %v7378_v24, %v7377_v15 }
0x1b9d   :  { %v7380_v7 = vrot.slane %v7379_v25, 2  ;;  %v7375_v12 = vrot.slane %v7374_v1, 1 }
0x1b9f   :  { %v7381_v43 = vadd.f32 %v7380_v7, %v7379_v25  ;;  %v7376_v55 = vadd.f32 %v7375_v12, %v7374_v1 }
0x1ba1   :  { %v7382_v29 = vrot.slane %v7381_v43, 1 }
0x1ba3   :  { %v7383_v39 = vadd.f32 %v7382_v29, %v7381_v43 }
0x1ba5   :  { %v7385_v27 = vsel %vm7384_vm3, %v7376_v55, %v7383_v39 }
0x1ba6   :  { %v7393_v8 = vadd.f32 %v8658_v60, %v7385_v27 }
0x1ba8   :  { %v7394_v21 = vmax.f32 %v7393_v8, 0.0 }
0x1baa   :  { %v7395_v20 = vpack.c.bf16 %v7394_v21, %v7394_v21 }
0x1bac   :  { %9295 = vmatmul.mubr.msk.bf16.vlgmr.msra.gmra.mxu1 %vm152_vm2, %v7395_v20 }
0x1c6c   :  { %v7456_v32 = vpop.f32.mrf.mxu1 }
0x1c6d   :  { %v7457_v35 = vadd.f32 %v8659_v61, %v7456_v32 }
0x1c6e   :  { %v9296_v49 = vpop.f32.mrf.mxu1 }
0x1c6f   :  { %7463 = vst.msk [vmem:[#allocation2] sm:$0x3] %vm7462_vm4, %v7457_v35 }
0x1c70   :  { %v7459_v13 = vpop.f32.mrf.mxu1 }
0x1c71   :  { %9796 = shalt.err (!%p9793_p4)
}
0x1c72   :  { %7473 = dma.vmem_to_hbm [thread:$0]  %s7471_s12, 32, %s12082_s21, [#allocation3]   ;;  %v9297_v40 = vpop.f32.mrf.mxu1 }
0x1c73   :  { %9805 = dma.done.wait [#allocation3], 32  }
0x1c74   :  { %9806 = vsyncadd [#allocation3], 4294967264 }
0x1c75   :  { %7477 = vsyncpa [#allocation3], 1 }

</bundles_post_ra>
